<compile_context>
chip_gen: v7x
topology: tpu7x:2x2x1
jax: 0.10.0
libtpu: 0.0.40
codegen_flags: <defaults>
</compile_context>

<pallas_src>
import functools

import numpy as np

import jax
import jax.numpy as jnp
from jax.experimental import pallas as pl
from jax.experimental.pallas import tpu as pltpu

LEAKY_SLOPE = 0.2

_W_SEGS = ("e_wfc", "e_whead", "q_wfc", "q_whead", "d_wfc2", "d_wc1", "d_wc2", "d_wc3")
_B_SEGS = ("e_bfc", "e_bhead", "q_bfc", "q_bhead", "d_b1", "d_bfc2", "d_bc1", "d_bc2",
           "d_bc3")


def _round_up(x, m):
    return ((x + m - 1) // m) * m


def _leaky(v):
    return jnp.maximum(v, LEAKY_SLOPE * v)


def _seg_widths(H, D, K):
    KD = K * D
    return {
        "e_wfc": H, "e_whead": 2 * KD + K, "q_wfc": H, "q_whead": 2 * D,
        "d_wfc2": H, "d_wc1": H, "d_wc2": H, "d_wc3": 1,
        "e_bfc": H, "e_bhead": 2 * KD + K, "q_bfc": H, "q_bhead": 2 * D,
        "d_b1": H, "d_bfc2": H, "d_bc1": H, "d_bc2": H, "d_bc3": 1,
    }


def _lane_offsets(names, widths):
    offs, off = {}, 0
    for n in names:
        offs[n] = off
        off += _round_up(widths[n], 128)
    return offs, off


def init_cvae_params(key, latent_dim, hidden_dim, param_dim, signal_dim,
                     num_components):
    """Deterministic parameter init (PyTorch-style uniform(+-1/sqrt(fan_in)))."""
    H, D, K, S = hidden_dim, latent_dim, num_components, signal_dim
    keys = iter(jax.random.split(key, 64))

    def u(shape, fan_in):
        b = 1.0 / np.sqrt(fan_in)
        return jax.random.uniform(next(keys), shape, jnp.float32, -b, b)

    def conv(cin, cout):      # torch Conv1d weight (out,in,3) stored as (3,in,out)
        return u((3, cin, cout), cin * 3), u((1, cout), cin * 3)

    def lin(fin, fout):       # torch Linear weight (out,in) stored as (in,out)
        return u((fin, fout), fin), u((1, fout), fin)

    def convt(cin, cout):     # ConvTranspose1d centre tap: (in,out)
        return u((cin, cout), cin * 3), u((1, cout), cin * 3)

    e_w1, e_b1 = conv(1, H)
    e_w2, e_b2 = conv(H, H)
    e_w3, e_b3 = conv(H, H)
    e_wfc, e_bfc = lin(H, H)
    e_wm, e_bm = lin(H, K * D)
    e_wv, e_bv = lin(H, K * D)
    e_ww, e_bw = lin(H, K)

    q_w1, q_b1 = conv(1, H)
    q_w2, q_b2 = conv(H, H)
    q_w3, q_b3 = conv(H, H)
    q_wfc, q_bfc = lin(H, H)
    q_wm, q_bm = lin(H, D)
    q_wv, q_bv = lin(H, D)

    d_wfc1, d_b1 = lin(D + S, H)
    d_wfc2, d_bfc2 = lin(H, H)
    d_wc1, d_bc1 = convt(H, H)
    d_wc2, d_bc2 = convt(H, H)
    d_wc3, d_bc3 = convt(H, 1)

    return [e_w1, e_b1, e_w2, e_b2, e_w3, e_b3, e_wfc, e_bfc,
            e_wm, e_bm, e_wv, e_bv, e_ww, e_bw,
            q_w1, q_b1, q_w2, q_b2, q_w3, q_b3, q_wfc, q_bfc,
            q_wm, q_bm, q_wv, q_bv,
            d_wfc1, d_b1, d_wfc2, d_bfc2,
            d_wc1, d_bc1, d_wc2, d_bc2, d_wc3, d_bc3]


def prepare_cvae_params(params, batch, *, latent_dim, hidden_dim, param_dim,
                        signal_dim, num_components):
    """One-time packing of CVAE parameters into lane-dense device slabs."""
    (e_w1, e_b1, e_w2, e_b2, e_w3, e_b3, e_wfc, e_bfc,
     e_wm, e_bm, e_wv, e_bv, e_ww, e_bw,
     q_w1, q_b1, q_w2, q_b2, q_w3, q_b3, q_wfc, q_bfc,
     q_wm, q_bm, q_wv, q_bv,
     d_wfc1, d_b1, d_wfc2, d_bfc2,
     d_wc1, d_bc1, d_wc2, d_bc2, d_wc3, d_bc3) = params

    H, D, K, S, P = hidden_dim, latent_dim, num_components, signal_dim, param_dim
    KD = K * D
    Lq = P + S
    N = batch * Lq
    C2 = 2 * H
    CW = max(C2, KD)
    f32 = jnp.float32

    def padlane(a, w=CW):
        a = a.astype(f32)
        if a.shape[1] < w:
            a = jnp.concatenate([a, jnp.zeros((a.shape[0], w - a.shape[1]), f32)],
                                axis=1)
        return a

    # ---- const slab: layer-1 tap rows, conv biases, GMM selection matrices ----
    w1_taps = padlane(jnp.concatenate([e_w1[:, 0, :], q_w1[:, 0, :]], axis=1))  # (3, CW)
    conv_b = padlane(jnp.concatenate(
        [jnp.concatenate([e_b1, q_b1], axis=1),
         jnp.concatenate([e_b2, q_b2], axis=1),
         jnp.concatenate([e_b3, q_b3], axis=1)], axis=0))                        # (3, CW)
    sel_expand = np.zeros((K, KD), np.float32)
    for k in range(K):
        sel_expand[k, k * D:(k + 1) * D] = 1.0
    sel_reduce = np.tile(np.eye(D, dtype=np.float32), (K, 1))                    # (KD, D)
    rows = [w1_taps, conv_b, jnp.zeros((2, CW), f32),
            padlane(jnp.asarray(sel_expand))]
    kpad = _round_up(K, 8) - K
    if kpad:
        rows.append(jnp.zeros((kpad, CW), f32))
    rows.append(padlane(jnp.asarray(sel_reduce)))
    const_cs = jnp.concatenate(rows, axis=0)     # (8 + round_up(K,8) + KD, CW)

    # ---- block-diagonal conv tap weights for layers 2/3 (fused towers) --------
    def tap_block(ew, qw):
        z = jnp.zeros((H, H), f32)
        return jnp.concatenate(
            [jnp.concatenate([ew.astype(f32), z], axis=1),
             jnp.concatenate([z, qw.astype(f32)], axis=1)], axis=0)              # (2H, 2H)

    conv_w23 = jnp.concatenate(
        [tap_block(e_w2[t], q_w2[t]) for t in range(3)]
        + [tap_block(e_w3[t], q_w3[t]) for t in range(3)], axis=0)               # (6*2H, 2H)

    # ---- pooling matrix: mean over valid positions of each tower --------------
    pool = np.zeros((2 * batch, N), np.float32)
    for b in range(batch):
        pool[b, b * Lq: b * Lq + S] = 1.0 / S         # r1 tower (ignores zero-pad tail)
        pool[batch + b, b * Lq: (b + 1) * Lq] = 1.0 / Lq
    pool = jnp.asarray(pool)

    # ---- lane-packed head weights / biases (128-lane aligned segments) --------
    widths = _seg_widths(H, D, K)
    w_parts = {"e_wfc": e_wfc,
               "e_whead": jnp.concatenate([e_wm, e_wv, e_ww], axis=1),
               "q_wfc": q_wfc,
               "q_whead": jnp.concatenate([q_wm, q_wv], axis=1),
               "d_wfc2": d_wfc2, "d_wc1": d_wc1, "d_wc2": d_wc2, "d_wc3": d_wc3}
    b_parts = {"e_bfc": e_bfc,
               "e_bhead": jnp.concatenate([e_bm, e_bv, e_bw], axis=1),
               "q_bfc": q_bfc,
               "q_bhead": jnp.concatenate([q_bm, q_bv], axis=1),
               "d_b1": d_b1, "d_bfc2": d_bfc2, "d_bc1": d_bc1, "d_bc2": d_bc2,
               "d_bc3": d_bc3}

    def pack(parts, names):
        cols = []
        for n in names:
            seg = parts[n].astype(f32)
            padw = _round_up(widths[n], 128)
            cols.append(seg)
            if padw > seg.shape[1]:
                cols.append(jnp.zeros((seg.shape[0], padw - seg.shape[1]), f32))
        return jnp.concatenate(cols, axis=1)

    return {
        "const_cs": const_cs,
        "conv_w23": conv_w23,
        "pool": pool,
        "head_w": pack(w_parts, _W_SEGS),
        "head_b": pack(b_parts, _B_SEGS),
        "d_wfc1": d_wfc1.astype(f32),
    }


@functools.partial(jax.jit, static_argnames=("latent_dim", "hidden_dim", "param_dim",
                                             "signal_dim", "num_components"))
def cvae_forward(prepared, x, y, eps_q, gumbel, eps_gmm, *, latent_dim, hidden_dim,
                 param_dim, signal_dim, num_components):
    """x: (B, param_dim), y: (B, signal_dim) -> (x_hat, q_mean, q_log_var, r1_z)."""
    f32 = jnp.float32
    B = x.shape[0]
    H, D, K, S, P = hidden_dim, latent_dim, num_components, signal_dim, param_dim
    KD = K * D
    Lq = P + S
    N = B * Lq
    C2 = 2 * H
    SEL_E_ROW = 8
    SEL_R_ROW = 8 + _round_up(K, 8)
    OUT_W = _round_up(3 * D + 1, 128)
    MW = _round_up(S + 2 * D + K, 128)
    EQ_OFF, G_OFF, EG_OFF = S, S + D, S + D + K

    widths = _seg_widths(H, D, K)
    woff, _ = _lane_offsets(_W_SEGS, widths)
    boff, _ = _lane_offsets(_B_SEGS, widths)

    # ---- per-call input slabs (built under jit; all weights are prepacked) ----
    x = x.astype(f32)
    y = y.astype(f32)
    y_pad = jnp.concatenate([y, jnp.zeros((B, Lq - S), f32)], axis=1)   # pad r1 seq
    e_col = y_pad.reshape(N, 1)
    q_col = jnp.concatenate([x, y], axis=1).reshape(N, 1)
    pos = jnp.tile(jnp.arange(Lq, dtype=f32), B).reshape(N, 1)
    conv_in = jnp.concatenate(
        [e_col, q_col,
         (pos != 0).astype(f32),          # mask_prev: kill the l-1 tap at l == 0
         (pos != Lq - 1).astype(f32),     # mask_next: kill the l+1 tap at l == Lq-1
         (pos < S).astype(f32),           # valid (non-padded) r1-tower positions
         jnp.zeros((N, 3), f32)], axis=1)                               # (N, 8)
    misc = jnp.concatenate(
        [y, eps_q.astype(f32), gumbel.astype(f32), eps_gmm.astype(f32),
         jnp.zeros((B, MW - (S + 2 * D + K)), f32)], axis=1)            # (B, MW)

    def kernel(conv_in_r, misc_r, cs_r, w23_r, pool_r, head_w_r, head_b_r,
               d_wfc1_r, out_r):
        def wseg(name):
            o = woff[name]
            return head_w_r[:, o:o + widths[name]]

        def bseg(name):
            o = boff[name]
            return head_b_r[:, o:o + widths[name]]

        def lin(h, wname, bname):
            return (jnp.dot(h, wseg(wname), preferred_element_type=jnp.float32)
                    + bseg(bname))

        ci = conv_in_r[...]                              # (N, 8)
        mi = misc_r[...]                                 # (B, MW)
        e_in, q_in = ci[:, 0:1], ci[:, 1:2]
        m_prev, m_next, e_valid = ci[:, 2:3], ci[:, 3:4], ci[:, 4:5]

        lane = jax.lax.broadcasted_iota(jnp.int32, (N, C2), 1)
        is_e = lane < H                                  # lanes [0,H): r1 channels
        pad_full = jnp.where(is_e, e_valid, 1.0)
        h = jnp.where(is_e, e_in, q_in)                  # fused layer-1 input (N, 2H)

        def sprev(v):                                    # v[l-1], zero at seq starts
            return pltpu.roll(v, 1, 0) * m_prev

        def snext(v):                                    # v[l+1], zero at seq ends
            return pltpu.roll(v, N - 1, 0) * m_next

        # Conv layer 1 (Cin == 1 per tower): pure VPU broadcast multiplies.
        h = (sprev(h) * cs_r[0:1, 0:C2] + h * cs_r[1:2, 0:C2]
             + snext(h) * cs_r[2:3, 0:C2] + cs_r[3:4, 0:C2])
        h = _leaky(h) * pad_full                         # keep padded r1 rows at zero

        # Conv layers 2/3: three accumulated block-diagonal (2H,2H) tap matmuls.
        for li in range(2):
            p, nx = sprev(h), snext(h)
            base = 3 * li
            acc = jnp.dot(p, w23_r[(base + 0) * C2:(base + 1) * C2, :],
                          preferred_element_type=jnp.float32)
            acc = acc + jnp.dot(h, w23_r[(base + 1) * C2:(base + 2) * C2, :],
                                preferred_element_type=jnp.float32)
            acc = acc + jnp.dot(nx, w23_r[(base + 2) * C2:(base + 3) * C2, :],
                                preferred_element_type=jnp.float32)
            h = _leaky(acc + cs_r[4 + li:5 + li, 0:C2])
            if li == 0:
                h = h * pad_full

        # TODO(synk): mean-pool over L repairs the Linear(hidden, hidden)-on-conv-
        # output shape bug in the reference; done as one matmul that also folds
        # the 1/L scale and the transpose back to batch-major.
        pooled = jnp.dot(pool_r[...], h, preferred_element_type=jnp.float32)  # (2B, 2H)
        he0 = pooled[0:B, 0:H]
        hq0 = pooled[B:2 * B, H:2 * H]

        # ------------- r1 encoder: y -> GMM(means, log_vars, weights) ----------
        he = _leaky(lin(he0, "e_wfc", "e_bfc"))
        head = lin(he, "e_whead", "e_bhead")             # (B, 2KD+K), one dot
        means = head[:, :KD]
        log_vars = head[:, KD:2 * KD]
        wlogit = head[:, 2 * KD:2 * KD + K]
        wexp = jnp.exp(wlogit - jnp.max(wlogit, axis=1, keepdims=True))
        weights = wexp * pl.reciprocal(jnp.sum(wexp, axis=1, keepdims=True),
                                       approx=True)      # softmax(dim=1)

        # Gumbel-max categorical on `weights` used as logits (bug-compatible with
        # Categorical(logits=softmax(w))), then a reparameterised component draw.
        g = weights + mi[:, G_OFF:G_OFF + K]
        onehot = (g >= jnp.max(g, axis=1, keepdims=True)).astype(jnp.float32)
        onehot = onehot * pl.reciprocal(jnp.sum(onehot, axis=1, keepdims=True),
                                        approx=True)     # tie-avg (measure zero)
        sel_expand = cs_r[SEL_E_ROW:SEL_E_ROW + K, 0:KD]
        sel_reduce = cs_r[SEL_R_ROW:SEL_R_ROW + KD, 0:D]
        oh_flat = jnp.dot(onehot, sel_expand, preferred_element_type=jnp.float32)
        scales = jnp.exp(0.5 * log_vars)
        stacked = jnp.concatenate([oh_flat * means, oh_flat * scales], axis=0)
        sel = jnp.dot(stacked, sel_reduce, preferred_element_type=jnp.float32)  # (2B, D)
        r1_z = sel[0:B, :] + sel[B:2 * B, :] * mi[:, EG_OFF:EG_OFF + D]

        # ------------- q encoder: cat(x, y) -> N(mean, var) ---------------------
        hq = _leaky(lin(hq0, "q_wfc", "q_bfc"))
        qhead = lin(hq, "q_whead", "q_bhead")            # (B, 2D) = [mean | logvar]
        q_mean = qhead[:, :D]
        q_log_var = qhead[:, D:2 * D]
        z = q_mean + jnp.exp(0.5 * q_log_var) * mi[:, EQ_OFF:EQ_OFF + D]

        # ------------- r2 decoder: (z, y) -> x_hat ------------------------------
        zy = jnp.concatenate([z, mi[:, 0:S]], axis=1)    # (B, D+S)
        a = _leaky(jnp.dot(zy, d_wfc1_r[...], preferred_element_type=jnp.float32)
                   + bseg("d_b1"))
        a = _leaky(lin(a, "d_wfc2", "d_bfc2"))
        # ConvTranspose1d(k=3, s=1, p=1) on a length-1 sequence == centre-tap matmul.
        c = _leaky(lin(a, "d_wc1", "d_bc1"))
        c = _leaky(lin(c, "d_wc2", "d_bc2"))
        x_hat = jnp.maximum(lin(c, "d_wc3", "d_bc3"), 0.0)   # (B, 1)

        # Single lane-dense packed output (one unmasked full-width store):
        # layout [ q_mean(D) | q_log_var(D) | r1_z(D) | x_hat(1) | zero pad ].
        pad = jnp.zeros((B, OUT_W - (3 * D + 1)), jnp.float32)
        out_r[...] = jnp.concatenate([qhead, r1_z, x_hat, pad], axis=1)

    inputs = [conv_in, misc, prepared["const_cs"], prepared["conv_w23"],
              prepared["pool"], prepared["head_w"], prepared["head_b"],
              prepared["d_wfc1"]]

    packed = pl.pallas_call(
        kernel,
        out_shape=jax.ShapeDtypeStruct((B, OUT_W), jnp.float32),
        in_specs=[pl.BlockSpec(memory_space=pltpu.MemorySpace.VMEM) for _ in inputs],
        out_specs=pl.BlockSpec(memory_space=pltpu.MemorySpace.VMEM),
    )(*inputs)

    q_mean = packed[:, 0:D]
    q_log_var = packed[:, D:2 * D]
    r1_z = packed[:, 2 * D:3 * D]
    x_hat = packed[:, 3 * D:3 * D + 1]
    return x_hat, q_mean, q_log_var, r1_z


if __name__ == "__main__":
    B = 4
    latent_dim = 8
    hidden_dim = 32
    param_dim = 8
    signal_dim = 32
    num_components = 8

    key = jax.random.PRNGKey(0)
    k_param, k_x, k_y, k_eq, k_g, k_eg = jax.random.split(key, 6)

    params = init_cvae_params(k_param, latent_dim, hidden_dim, param_dim,
                              signal_dim, num_components)
    prepared = prepare_cvae_params(params, B, latent_dim=latent_dim,
                                   hidden_dim=hidden_dim, param_dim=param_dim,
                                   signal_dim=signal_dim,
                                   num_components=num_components)

    x = jax.random.normal(k_x, (B, param_dim), jnp.float32)
    y = jax.random.normal(k_y, (B, signal_dim), jnp.float32)
    eps_q = jax.random.normal(k_eq, (B, latent_dim), jnp.float32)
    u = jax.random.uniform(k_g, (B, num_components), jnp.float32,
                           1e-6, 1.0 - 1e-6)
    gumbel = -jnp.log(-jnp.log(u))
    eps_gmm = jax.random.normal(k_eg, (B, latent_dim), jnp.float32)

    x_hat, q_mean, q_log_var, r1_z = cvae_forward(
        prepared, x, y, eps_q, gumbel, eps_gmm,
        latent_dim=latent_dim, hidden_dim=hidden_dim, param_dim=param_dim,
        signal_dim=signal_dim, num_components=num_components)
    jax.block_until_ready((x_hat, q_mean, q_log_var, r1_z))

    assert x_hat.shape == (B, 1)
    assert q_mean.shape == (B, latent_dim)
    assert q_log_var.shape == (B, latent_dim)
    assert r1_z.shape == (B, latent_dim)
    assert bool(jnp.all(jnp.isfinite(x_hat)))
    assert bool(jnp.all(jnp.isfinite(q_mean)))
    assert bool(jnp.all(jnp.isfinite(q_log_var)))
    assert bool(jnp.all(jnp.isfinite(r1_z)))
    assert bool(jnp.all(x_hat >= 0.0))  # final ReLU
    print("KERNEL_OK")
</pallas_src>

<mosaic_0001>
module attributes {stable_mosaic.version = 11 : i64} {
  func.func @kernel(%arg0: memref<160x8xf32, #tpu.memory_space<vmem>>, %arg1: memref<4x128xf32, #tpu.memory_space<vmem>>, %arg2: memref<80x64xf32, #tpu.memory_space<vmem>>, %arg3: memref<384x64xf32, #tpu.memory_space<vmem>>, %arg4: memref<8x160xf32, #tpu.memory_space<vmem>>, %arg5: memref<32x1152xf32, #tpu.memory_space<vmem>>, %arg6: memref<1x1280xf32, #tpu.memory_space<vmem>>, %arg7: memref<40x32xf32, #tpu.memory_space<vmem>>, %arg8: memref<4x128xf32, #tpu.memory_space<vmem>>) attributes {dimension_semantics = [], scalar_prefetch = 0 : i64, scratch_operands = 0 : i64, tpu.core_type = #tpu.core_type<tc>} {
    %c0 = arith.constant 0 : index
    %c0_0 = arith.constant 0 : index
    %0 = vector.load %arg0[%c0, %c0_0] : memref<160x8xf32, #tpu.memory_space<vmem>>, vector<160x8xf32>
    %c0_1 = arith.constant 0 : index
    %c0_2 = arith.constant 0 : index
    %1 = vector.load %arg1[%c0_1, %c0_2] : memref<4x128xf32, #tpu.memory_space<vmem>>, vector<4x128xf32>
    %2 = vector.extract_strided_slice %0 {offsets = [0, 0], sizes = [160, 1], strides = [1, 1]} : vector<160x8xf32> to vector<160x1xf32>
    %3 = vector.extract_strided_slice %0 {offsets = [0, 1], sizes = [160, 1], strides = [1, 1]} : vector<160x8xf32> to vector<160x1xf32>
    %4 = vector.extract_strided_slice %0 {offsets = [0, 2], sizes = [160, 1], strides = [1, 1]} : vector<160x8xf32> to vector<160x1xf32>
    %5 = vector.extract_strided_slice %0 {offsets = [0, 3], sizes = [160, 1], strides = [1, 1]} : vector<160x8xf32> to vector<160x1xf32>
    %6 = vector.extract_strided_slice %0 {offsets = [0, 4], sizes = [160, 1], strides = [1, 1]} : vector<160x8xf32> to vector<160x1xf32>
    %7 = tpu.iota {dimensions = array<i32: 1>} : vector<160x64xi32>
    %c32_i32 = arith.constant 32 : i32
    %8 = vector.broadcast %c32_i32 : i32 to vector<160x64xi32>
    %9 = arith.cmpi slt, %7, %8 : vector<160x64xi32>
    %cst = arith.constant 1.000000e+00 : f32
    %10 = vector.shape_cast %6 : vector<160x1xf32> to vector<160x1xf32>
    %11 = vector.broadcast %10 : vector<160x1xf32> to vector<160x64xf32>
    %12 = vector.broadcast %cst : f32 to vector<160x64xf32>
    %13 = arith.select %9, %11, %12 : vector<160x64xi1>, vector<160x64xf32>
    %14 = vector.shape_cast %2 : vector<160x1xf32> to vector<160x1xf32>
    %15 = vector.broadcast %14 : vector<160x1xf32> to vector<160x64xf32>
    %16 = vector.shape_cast %3 : vector<160x1xf32> to vector<160x1xf32>
    %17 = vector.broadcast %16 : vector<160x1xf32> to vector<160x64xf32>
    %18 = arith.select %9, %15, %17 : vector<160x64xi1>, vector<160x64xf32>
    %c1_i32 = arith.constant 1 : i32
    %19 = tpu.dynamic_rotate %18 by %c1_i32 dim 0 : vector<160x64xf32>, i32 -> vector<160x64xf32>
    %20 = vector.broadcast %4 : vector<160x1xf32> to vector<160x64xf32>
    %21 = arith.mulf %19, %20 : vector<160x64xf32>
    %c0_3 = arith.constant 0 : index
    %c0_4 = arith.constant 0 : index
    %22 = vector.load %arg2[%c0_3, %c0_4] : memref<80x64xf32, #tpu.memory_space<vmem>>, vector<1x64xf32>
    %23 = vector.broadcast %22 : vector<1x64xf32> to vector<160x64xf32>
    %24 = arith.mulf %21, %23 : vector<160x64xf32>
    %c1 = arith.constant 1 : index
    %c0_5 = arith.constant 0 : index
    %25 = vector.load %arg2[%c1, %c0_5] : memref<80x64xf32, #tpu.memory_space<vmem>>, vector<1x64xf32>
    %26 = vector.broadcast %25 : vector<1x64xf32> to vector<160x64xf32>
    %27 = arith.mulf %18, %26 : vector<160x64xf32>
    %28 = arith.addf %24, %27 : vector<160x64xf32>
    %c159_i32 = arith.constant 159 : i32
    %29 = tpu.dynamic_rotate %18 by %c159_i32 dim 0 : vector<160x64xf32>, i32 -> vector<160x64xf32>
    %30 = vector.broadcast %5 : vector<160x1xf32> to vector<160x64xf32>
    %31 = arith.mulf %29, %30 : vector<160x64xf32>
    %c2 = arith.constant 2 : index
    %c0_6 = arith.constant 0 : index
    %32 = vector.load %arg2[%c2, %c0_6] : memref<80x64xf32, #tpu.memory_space<vmem>>, vector<1x64xf32>
    %33 = vector.broadcast %32 : vector<1x64xf32> to vector<160x64xf32>
    %34 = arith.mulf %31, %33 : vector<160x64xf32>
    %35 = arith.addf %28, %34 : vector<160x64xf32>
    %c3 = arith.constant 3 : index
    %c0_7 = arith.constant 0 : index
    %36 = vector.load %arg2[%c3, %c0_7] : memref<80x64xf32, #tpu.memory_space<vmem>>, vector<1x64xf32>
    %37 = vector.broadcast %36 : vector<1x64xf32> to vector<160x64xf32>
    %38 = arith.addf %35, %37 : vector<160x64xf32>
    %cst_8 = arith.constant 2.000000e-01 : f32
    %39 = vector.broadcast %cst_8 : f32 to vector<160x64xf32>
    %40 = arith.mulf %39, %38 : vector<160x64xf32>
    %41 = arith.maximumf %38, %40 : vector<160x64xf32>
    %42 = arith.mulf %41, %13 : vector<160x64xf32>
    %c1_i32_9 = arith.constant 1 : i32
    %43 = tpu.dynamic_rotate %42 by %c1_i32_9 dim 0 : vector<160x64xf32>, i32 -> vector<160x64xf32>
    %44 = vector.broadcast %4 : vector<160x1xf32> to vector<160x64xf32>
    %45 = arith.mulf %43, %44 : vector<160x64xf32>
    %c159_i32_10 = arith.constant 159 : i32
    %46 = tpu.dynamic_rotate %42 by %c159_i32_10 dim 0 : vector<160x64xf32>, i32 -> vector<160x64xf32>
    %47 = vector.broadcast %5 : vector<160x1xf32> to vector<160x64xf32>
    %48 = arith.mulf %46, %47 : vector<160x64xf32>
    %c0_11 = arith.constant 0 : index
    %c0_12 = arith.constant 0 : index
    %49 = vector.load %arg3[%c0_11, %c0_12] : memref<384x64xf32, #tpu.memory_space<vmem>>, vector<64x64xf32>
    %cst_13 = arith.constant dense<0.000000e+00> : vector<160x64xf32>
    %50 = tpu.matmul %45, %49, %cst_13 {dimension_numbers = #tpu.dot_dimension_numbers<[1], [0], [0], [1], [0, 0, 1, 1], [], []>} : vector<160x64xf32>, vector<64x64xf32>, vector<160x64xf32> -> vector<160x64xf32>
    %c64 = arith.constant 64 : index
    %c0_14 = arith.constant 0 : index
    %51 = vector.load %arg3[%c64, %c0_14] : memref<384x64xf32, #tpu.memory_space<vmem>>, vector<64x64xf32>
    %cst_15 = arith.constant dense<0.000000e+00> : vector<160x64xf32>
    %52 = tpu.matmul %42, %51, %cst_15 {dimension_numbers = #tpu.dot_dimension_numbers<[1], [0], [0], [1], [0, 0, 1, 1], [], []>} : vector<160x64xf32>, vector<64x64xf32>, vector<160x64xf32> -> vector<160x64xf32>
    %53 = arith.addf %50, %52 : vector<160x64xf32>
    %c128 = arith.constant 128 : index
    %c0_16 = arith.constant 0 : index
    %54 = vector.load %arg3[%c128, %c0_16] : memref<384x64xf32, #tpu.memory_space<vmem>>, vector<64x64xf32>
    %cst_17 = arith.constant dense<0.000000e+00> : vector<160x64xf32>
    %55 = tpu.matmul %48, %54, %cst_17 {dimension_numbers = #tpu.dot_dimension_numbers<[1], [0], [0], [1], [0, 0, 1, 1], [], []>} : vector<160x64xf32>, vector<64x64xf32>, vector<160x64xf32> -> vector<160x64xf32>
    %56 = arith.addf %53, %55 : vector<160x64xf32>
    %c4 = arith.constant 4 : index
    %c0_18 = arith.constant 0 : index
    %57 = vector.load %arg2[%c4, %c0_18] : memref<80x64xf32, #tpu.memory_space<vmem>>, vector<1x64xf32>
    %58 = vector.broadcast %57 : vector<1x64xf32> to vector<160x64xf32>
    %59 = arith.addf %56, %58 : vector<160x64xf32>
    %cst_19 = arith.constant 2.000000e-01 : f32
    %60 = vector.broadcast %cst_19 : f32 to vector<160x64xf32>
    %61 = arith.mulf %60, %59 : vector<160x64xf32>
    %62 = arith.maximumf %59, %61 : vector<160x64xf32>
    %63 = arith.mulf %62, %13 : vector<160x64xf32>
    %c1_i32_20 = arith.constant 1 : i32
    %64 = tpu.dynamic_rotate %63 by %c1_i32_20 dim 0 : vector<160x64xf32>, i32 -> vector<160x64xf32>
    %65 = vector.broadcast %4 : vector<160x1xf32> to vector<160x64xf32>
    %66 = arith.mulf %64, %65 : vector<160x64xf32>
    %c159_i32_21 = arith.constant 159 : i32
    %67 = tpu.dynamic_rotate %63 by %c159_i32_21 dim 0 : vector<160x64xf32>, i32 -> vector<160x64xf32>
    %68 = vector.broadcast %5 : vector<160x1xf32> to vector<160x64xf32>
    %69 = arith.mulf %67, %68 : vector<160x64xf32>
    %c192 = arith.constant 192 : index
    %c0_22 = arith.constant 0 : index
    %70 = vector.load %arg3[%c192, %c0_22] : memref<384x64xf32, #tpu.memory_space<vmem>>, vector<64x64xf32>
    %cst_23 = arith.constant dense<0.000000e+00> : vector<160x64xf32>
    %71 = tpu.matmul %66, %70, %cst_23 {dimension_numbers = #tpu.dot_dimension_numbers<[1], [0], [0], [1], [0, 0, 1, 1], [], []>} : vector<160x64xf32>, vector<64x64xf32>, vector<160x64xf32> -> vector<160x64xf32>
    %c256 = arith.constant 256 : index
    %c0_24 = arith.constant 0 : index
    %72 = vector.load %arg3[%c256, %c0_24] : memref<384x64xf32, #tpu.memory_space<vmem>>, vector<64x64xf32>
    %cst_25 = arith.constant dense<0.000000e+00> : vector<160x64xf32>
    %73 = tpu.matmul %63, %72, %cst_25 {dimension_numbers = #tpu.dot_dimension_numbers<[1], [0], [0], [1], [0, 0, 1, 1], [], []>} : vector<160x64xf32>, vector<64x64xf32>, vector<160x64xf32> -> vector<160x64xf32>
    %74 = arith.addf %71, %73 : vector<160x64xf32>
    %c320 = arith.constant 320 : index
    %c0_26 = arith.constant 0 : index
    %75 = vector.load %arg3[%c320, %c0_26] : memref<384x64xf32, #tpu.memory_space<vmem>>, vector<64x64xf32>
    %cst_27 = arith.constant dense<0.000000e+00> : vector<160x64xf32>
    %76 = tpu.matmul %69, %75, %cst_27 {dimension_numbers = #tpu.dot_dimension_numbers<[1], [0], [0], [1], [0, 0, 1, 1], [], []>} : vector<160x64xf32>, vector<64x64xf32>, vector<160x64xf32> -> vector<160x64xf32>
    %77 = arith.addf %74, %76 : vector<160x64xf32>
    %c5 = arith.constant 5 : index
    %c0_28 = arith.constant 0 : index
    %78 = vector.load %arg2[%c5, %c0_28] : memref<80x64xf32, #tpu.memory_space<vmem>>, vector<1x64xf32>
    %79 = vector.broadcast %78 : vector<1x64xf32> to vector<160x64xf32>
    %80 = arith.addf %77, %79 : vector<160x64xf32>
    %cst_29 = arith.constant 2.000000e-01 : f32
    %81 = vector.broadcast %cst_29 : f32 to vector<160x64xf32>
    %82 = arith.mulf %81, %80 : vector<160x64xf32>
    %83 = arith.maximumf %80, %82 : vector<160x64xf32>
    %c0_30 = arith.constant 0 : index
    %c0_31 = arith.constant 0 : index
    %84 = vector.load %arg4[%c0_30, %c0_31] : memref<8x160xf32, #tpu.memory_space<vmem>>, vector<8x160xf32>
    %cst_32 = arith.constant dense<0.000000e+00> : vector<8x64xf32>
    %85 = tpu.matmul %84, %83, %cst_32 {dimension_numbers = #tpu.dot_dimension_numbers<[1], [0], [0], [1], [0, 0, 1, 1], [], []>} : vector<8x160xf32>, vector<160x64xf32>, vector<8x64xf32> -> vector<8x64xf32>
    %86 = vector.extract_strided_slice %85 {offsets = [0, 0], sizes = [4, 32], strides = [1, 1]} : vector<8x64xf32> to vector<4x32xf32>
    %87 = vector.extract_strided_slice %85 {offsets = [4, 32], sizes = [4, 32], strides = [1, 1]} : vector<8x64xf32> to vector<4x32xf32>
    %c0_33 = arith.constant 0 : index
    %c0_34 = arith.constant 0 : index
    %88 = vector.load %arg5[%c0_33, %c0_34] : memref<32x1152xf32, #tpu.memory_space<vmem>>, vector<32x32xf32>
    %cst_35 = arith.constant dense<0.000000e+00> : vector<4x32xf32>
    %89 = tpu.matmul %86, %88, %cst_35 {dimension_numbers = #tpu.dot_dimension_numbers<[1], [0], [0], [1], [0, 0, 1, 1], [], []>} : vector<4x32xf32>, vector<32x32xf32>, vector<4x32xf32> -> vector<4x32xf32>
    %c0_36 = arith.constant 0 : index
    %c0_37 = arith.constant 0 : index
    %90 = vector.load %arg6[%c0_36, %c0_37] : memref<1x1280xf32, #tpu.memory_space<vmem>>, vector<1x32xf32>
    %91 = vector.broadcast %90 : vector<1x32xf32> to vector<4x32xf32>
    %92 = arith.addf %89, %91 : vector<4x32xf32>
    %cst_38 = arith.constant 2.000000e-01 : f32
    %93 = vector.broadcast %cst_38 : f32 to vector<4x32xf32>
    %94 = arith.mulf %93, %92 : vector<4x32xf32>
    %95 = arith.maximumf %92, %94 : vector<4x32xf32>
    %c0_39 = arith.constant 0 : index
    %c128_40 = arith.constant 128 : index
    %96 = vector.load %arg5[%c0_39, %c128_40] : memref<32x1152xf32, #tpu.memory_space<vmem>>, vector<32x136xf32>
    %cst_41 = arith.constant dense<0.000000e+00> : vector<4x136xf32>
    %97 = tpu.matmul %95, %96, %cst_41 {dimension_numbers = #tpu.dot_dimension_numbers<[1], [0], [0], [1], [0, 0, 1, 1], [], []>} : vector<4x32xf32>, vector<32x136xf32>, vector<4x136xf32> -> vector<4x136xf32>
    %c0_42 = arith.constant 0 : index
    %c128_43 = arith.constant 128 : index
    %98 = vector.load %arg6[%c0_42, %c128_43] : memref<1x1280xf32, #tpu.memory_space<vmem>>, vector<1x136xf32>
    %99 = vector.broadcast %98 : vector<1x136xf32> to vector<4x136xf32>
    %100 = arith.addf %97, %99 : vector<4x136xf32>
    %101 = vector.extract_strided_slice %100 {offsets = [0, 0], sizes = [4, 64], strides = [1, 1]} : vector<4x136xf32> to vector<4x64xf32>
    %102 = vector.extract_strided_slice %100 {offsets = [0, 64], sizes = [4, 64], strides = [1, 1]} : vector<4x136xf32> to vector<4x64xf32>
    %103 = vector.extract_strided_slice %100 {offsets = [0, 128], sizes = [4, 8], strides = [1, 1]} : vector<4x136xf32> to vector<4x8xf32>
    %cst_44 = arith.constant dense<0xFF800000> : vector<4xf32>
    %104 = vector.multi_reduction <maximumf>, %103, %cst_44 [1] : vector<4x8xf32> to vector<4xf32>
    %105 = vector.shape_cast %104 : vector<4xf32> to vector<4x1xf32>
    %106 = vector.broadcast %105 : vector<4x1xf32> to vector<4x8xf32>
    %107 = arith.subf %103, %106 : vector<4x8xf32>
    %108 = math.exp %107 : vector<4x8xf32>
    %cst_45 = arith.constant dense<0.000000e+00> : vector<4xf32>
    %109 = vector.multi_reduction <add>, %108, %cst_45 [1] : vector<4x8xf32> to vector<4xf32>
    %110 = vector.shape_cast %109 : vector<4xf32> to vector<4x1xf32>
    %111 = tpu.reciprocal %110 {approx = true} : vector<4x1xf32> -> vector<4x1xf32>
    %112 = vector.broadcast %111 : vector<4x1xf32> to vector<4x8xf32>
    %113 = arith.mulf %108, %112 : vector<4x8xf32>
    %114 = vector.extract_strided_slice %1 {offsets = [0, 40], sizes = [4, 8], strides = [1, 1]} : vector<4x128xf32> to vector<4x8xf32>
    %115 = arith.addf %113, %114 : vector<4x8xf32>
    %cst_46 = arith.constant dense<0xFF800000> : vector<4xf32>
    %116 = vector.multi_reduction <maximumf>, %115, %cst_46 [1] : vector<4x8xf32> to vector<4xf32>
    %117 = vector.shape_cast %116 : vector<4xf32> to vector<4x1xf32>
    %118 = vector.broadcast %117 : vector<4x1xf32> to vector<4x8xf32>
    %119 = arith.cmpf oge, %115, %118 : vector<4x8xf32>
    %120 = arith.extui %119 : vector<4x8xi1> to vector<4x8xi32>
    %121 = arith.sitofp %120 : vector<4x8xi32> to vector<4x8xf32>
    %cst_47 = arith.constant dense<0.000000e+00> : vector<4xf32>
    %122 = vector.multi_reduction <add>, %121, %cst_47 [1] : vector<4x8xf32> to vector<4xf32>
    %123 = vector.shape_cast %122 : vector<4xf32> to vector<4x1xf32>
    %124 = tpu.reciprocal %123 {approx = true} : vector<4x1xf32> -> vector<4x1xf32>
    %125 = vector.broadcast %124 : vector<4x1xf32> to vector<4x8xf32>
    %126 = arith.mulf %121, %125 : vector<4x8xf32>
    %c8 = arith.constant 8 : index
    %c0_48 = arith.constant 0 : index
    %127 = vector.load %arg2[%c8, %c0_48] : memref<80x64xf32, #tpu.memory_space<vmem>>, vector<8x64xf32>
    %c16 = arith.constant 16 : index
    %c0_49 = arith.constant 0 : index
    %128 = vector.load %arg2[%c16, %c0_49] : memref<80x64xf32, #tpu.memory_space<vmem>>, vector<64x8xf32>
    %cst_50 = arith.constant dense<0.000000e+00> : vector<4x64xf32>
    %129 = tpu.matmul %126, %127, %cst_50 {dimension_numbers = #tpu.dot_dimension_numbers<[1], [0], [0], [1], [0, 0, 1, 1], [], []>} : vector<4x8xf32>, vector<8x64xf32>, vector<4x64xf32> -> vector<4x64xf32>
    %cst_51 = arith.constant 5.000000e-01 : f32
    %130 = vector.broadcast %cst_51 : f32 to vector<4x64xf32>
    %131 = arith.mulf %130, %102 : vector<4x64xf32>
    %132 = math.exp %131 : vector<4x64xf32>
    %133 = arith.mulf %129, %101 : vector<4x64xf32>
    %134 = arith.mulf %129, %132 : vector<4x64xf32>
    %135 = tpu.concatenate %133, %134 in 0 : vector<4x64xf32>, vector<4x64xf32> -> vector<8x64xf32>
    %cst_52 = arith.constant dense<0.000000e+00> : vector<8x8xf32>
    %136 = tpu.matmul %135, %128, %cst_52 {dimension_numbers = #tpu.dot_dimension_numbers<[1], [0], [0], [1], [0, 0, 1, 1], [], []>} : vector<8x64xf32>, vector<64x8xf32>, vector<8x8xf32> -> vector<8x8xf32>
    %137 = vector.extract_strided_slice %136 {offsets = [0, 0], sizes = [4, 8], strides = [1, 1]} : vector<8x8xf32> to vector<4x8xf32>
    %138 = vector.extract_strided_slice %136 {offsets = [4, 0], sizes = [4, 8], strides = [1, 1]} : vector<8x8xf32> to vector<4x8xf32>
    %139 = vector.extract_strided_slice %1 {offsets = [0, 48], sizes = [4, 8], strides = [1, 1]} : vector<4x128xf32> to vector<4x8xf32>
    %140 = arith.mulf %138, %139 : vector<4x8xf32>
    %141 = arith.addf %137, %140 : vector<4x8xf32>
    %c0_53 = arith.constant 0 : index
    %c384 = arith.constant 384 : index
    %142 = vector.load %arg5[%c0_53, %c384] : memref<32x1152xf32, #tpu.memory_space<vmem>>, vector<32x32xf32>
    %cst_54 = arith.constant dense<0.000000e+00> : vector<4x32xf32>
    %143 = tpu.matmul %87, %142, %cst_54 {dimension_numbers = #tpu.dot_dimension_numbers<[1], [0], [0], [1], [0, 0, 1, 1], [], []>} : vector<4x32xf32>, vector<32x32xf32>, vector<4x32xf32> -> vector<4x32xf32>
    %c0_55 = arith.constant 0 : index
    %c384_56 = arith.constant 384 : index
    %144 = vector.load %arg6[%c0_55, %c384_56] : memref<1x1280xf32, #tpu.memory_space<vmem>>, vector<1x32xf32>
    %145 = vector.broadcast %144 : vector<1x32xf32> to vector<4x32xf32>
    %146 = arith.addf %143, %145 : vector<4x32xf32>
    %cst_57 = arith.constant 2.000000e-01 : f32
    %147 = vector.broadcast %cst_57 : f32 to vector<4x32xf32>
    %148 = arith.mulf %147, %146 : vector<4x32xf32>
    %149 = arith.maximumf %146, %148 : vector<4x32xf32>
    %c0_58 = arith.constant 0 : index
    %c512 = arith.constant 512 : index
    %150 = vector.load %arg5[%c0_58, %c512] : memref<32x1152xf32, #tpu.memory_space<vmem>>, vector<32x16xf32>
    %cst_59 = arith.constant dense<0.000000e+00> : vector<4x16xf32>
    %151 = tpu.matmul %149, %150, %cst_59 {dimension_numbers = #tpu.dot_dimension_numbers<[1], [0], [0], [1], [0, 0, 1, 1], [], []>} : vector<4x32xf32>, vector<32x16xf32>, vector<4x16xf32> -> vector<4x16xf32>
    %c0_60 = arith.constant 0 : index
    %c512_61 = arith.constant 512 : index
    %152 = vector.load %arg6[%c0_60, %c512_61] : memref<1x1280xf32, #tpu.memory_space<vmem>>, vector<1x16xf32>
    %153 = vector.broadcast %152 : vector<1x16xf32> to vector<4x16xf32>
    %154 = arith.addf %151, %153 : vector<4x16xf32>
    %155 = vector.extract_strided_slice %154 {offsets = [0, 0], sizes = [4, 8], strides = [1, 1]} : vector<4x16xf32> to vector<4x8xf32>
    %156 = vector.extract_strided_slice %154 {offsets = [0, 8], sizes = [4, 8], strides = [1, 1]} : vector<4x16xf32> to vector<4x8xf32>
    %cst_62 = arith.constant 5.000000e-01 : f32
    %157 = vector.broadcast %cst_62 : f32 to vector<4x8xf32>
    %158 = arith.mulf %157, %156 : vector<4x8xf32>
    %159 = math.exp %158 : vector<4x8xf32>
    %160 = vector.extract_strided_slice %1 {offsets = [0, 32], sizes = [4, 8], strides = [1, 1]} : vector<4x128xf32> to vector<4x8xf32>
    %161 = arith.mulf %159, %160 : vector<4x8xf32>
    %162 = arith.addf %155, %161 : vector<4x8xf32>
    %163 = vector.extract_strided_slice %1 {offsets = [0, 0], sizes = [4, 32], strides = [1, 1]} : vector<4x128xf32> to vector<4x32xf32>
    %164 = tpu.concatenate %162, %163 in 1 : vector<4x8xf32>, vector<4x32xf32> -> vector<4x40xf32>
    %c0_63 = arith.constant 0 : index
    %c0_64 = arith.constant 0 : index
    %165 = vector.load %arg7[%c0_63, %c0_64] : memref<40x32xf32, #tpu.memory_space<vmem>>, vector<40x32xf32>
    %cst_65 = arith.constant dense<0.000000e+00> : vector<4x32xf32>
    %166 = tpu.matmul %164, %165, %cst_65 {dimension_numbers = #tpu.dot_dimension_numbers<[1], [0], [0], [1], [0, 0, 1, 1], [], []>} : vector<4x40xf32>, vector<40x32xf32>, vector<4x32xf32> -> vector<4x32xf32>
    %c0_66 = arith.constant 0 : index
    %c640 = arith.constant 640 : index
    %167 = vector.load %arg6[%c0_66, %c640] : memref<1x1280xf32, #tpu.memory_space<vmem>>, vector<1x32xf32>
    %168 = vector.broadcast %167 : vector<1x32xf32> to vector<4x32xf32>
    %169 = arith.addf %166, %168 : vector<4x32xf32>
    %cst_67 = arith.constant 2.000000e-01 : f32
    %170 = vector.broadcast %cst_67 : f32 to vector<4x32xf32>
    %171 = arith.mulf %170, %169 : vector<4x32xf32>
    %172 = arith.maximumf %169, %171 : vector<4x32xf32>
    %c0_68 = arith.constant 0 : index
    %c640_69 = arith.constant 640 : index
    %173 = vector.load %arg5[%c0_68, %c640_69] : memref<32x1152xf32, #tpu.memory_space<vmem>>, vector<32x32xf32>
    %cst_70 = arith.constant dense<0.000000e+00> : vector<4x32xf32>
    %174 = tpu.matmul %172, %173, %cst_70 {dimension_numbers = #tpu.dot_dimension_numbers<[1], [0], [0], [1], [0, 0, 1, 1], [], []>} : vector<4x32xf32>, vector<32x32xf32>, vector<4x32xf32> -> vector<4x32xf32>
    %c0_71 = arith.constant 0 : index
    %c768 = arith.constant 768 : index
    %175 = vector.load %arg6[%c0_71, %c768] : memref<1x1280xf32, #tpu.memory_space<vmem>>, vector<1x32xf32>
    %176 = vector.broadcast %175 : vector<1x32xf32> to vector<4x32xf32>
    %177 = arith.addf %174, %176 : vector<4x32xf32>
    %cst_72 = arith.constant 2.000000e-01 : f32
    %178 = vector.broadcast %cst_72 : f32 to vector<4x32xf32>
    %179 = arith.mulf %178, %177 : vector<4x32xf32>
    %180 = arith.maximumf %177, %179 : vector<4x32xf32>
    %c0_73 = arith.constant 0 : index
    %c768_74 = arith.constant 768 : index
    %181 = vector.load %arg5[%c0_73, %c768_74] : memref<32x1152xf32, #tpu.memory_space<vmem>>, vector<32x32xf32>
    %cst_75 = arith.constant dense<0.000000e+00> : vector<4x32xf32>
    %182 = tpu.matmul %180, %181, %cst_75 {dimension_numbers = #tpu.dot_dimension_numbers<[1], [0], [0], [1], [0, 0, 1, 1], [], []>} : vector<4x32xf32>, vector<32x32xf32>, vector<4x32xf32> -> vector<4x32xf32>
    %c0_76 = arith.constant 0 : index
    %c896 = arith.constant 896 : index
    %183 = vector.load %arg6[%c0_76, %c896] : memref<1x1280xf32, #tpu.memory_space<vmem>>, vector<1x32xf32>
    %184 = vector.broadcast %183 : vector<1x32xf32> to vector<4x32xf32>
    %185 = arith.addf %182, %184 : vector<4x32xf32>
    %cst_77 = arith.constant 2.000000e-01 : f32
    %186 = vector.broadcast %cst_77 : f32 to vector<4x32xf32>
    %187 = arith.mulf %186, %185 : vector<4x32xf32>
    %188 = arith.maximumf %185, %187 : vector<4x32xf32>
    %c0_78 = arith.constant 0 : index
    %c896_79 = arith.constant 896 : index
    %189 = vector.load %arg5[%c0_78, %c896_79] : memref<32x1152xf32, #tpu.memory_space<vmem>>, vector<32x32xf32>
    %cst_80 = arith.constant dense<0.000000e+00> : vector<4x32xf32>
    %190 = tpu.matmul %188, %189, %cst_80 {dimension_numbers = #tpu.dot_dimension_numbers<[1], [0], [0], [1], [0, 0, 1, 1], [], []>} : vector<4x32xf32>, vector<32x32xf32>, vector<4x32xf32> -> vector<4x32xf32>
    %c0_81 = arith.constant 0 : index
    %c1024 = arith.constant 1024 : index
    %191 = vector.load %arg6[%c0_81, %c1024] : memref<1x1280xf32, #tpu.memory_space<vmem>>, vector<1x32xf32>
    %192 = vector.broadcast %191 : vector<1x32xf32> to vector<4x32xf32>
    %193 = arith.addf %190, %192 : vector<4x32xf32>
    %cst_82 = arith.constant 2.000000e-01 : f32
    %194 = vector.broadcast %cst_82 : f32 to vector<4x32xf32>
    %195 = arith.mulf %194, %193 : vector<4x32xf32>
    %196 = arith.maximumf %193, %195 : vector<4x32xf32>
    %c0_83 = arith.constant 0 : index
    %c1024_84 = arith.constant 1024 : index
    %197 = vector.load %arg5[%c0_83, %c1024_84] : memref<32x1152xf32, #tpu.memory_space<vmem>>, vector<32x1xf32>
    %cst_85 = arith.constant dense<0.000000e+00> : vector<4x1xf32>
    %198 = tpu.matmul %196, %197, %cst_85 {dimension_numbers = #tpu.dot_dimension_numbers<[1], [0], [0], [1], [0, 0, 1, 1], [], []>} : vector<4x32xf32>, vector<32x1xf32>, vector<4x1xf32> -> vector<4x1xf32>
    %c0_86 = arith.constant 0 : index
    %c1152 = arith.constant 1152 : index
    %199 = vector.load %arg6[%c0_86, %c1152] : memref<1x1280xf32, #tpu.memory_space<vmem>>, vector<1x1xf32>
    %200 = vector.broadcast %199 : vector<1x1xf32> to vector<4x1xf32>
    %201 = arith.addf %198, %200 : vector<4x1xf32>
    %cst_87 = arith.constant 0.000000e+00 : f32
    %202 = vector.broadcast %cst_87 : f32 to vector<4x1xf32>
    %203 = arith.maximumf %201, %202 : vector<4x1xf32>
    %cst_88 = arith.constant 0.000000e+00 : f32
    %204 = vector.broadcast %cst_88 : f32 to vector<4x103xf32>
    %205 = tpu.concatenate %154, %141, %203, %204 in 1 : vector<4x16xf32>, vector<4x8xf32>, vector<4x1xf32>, vector<4x103xf32> -> vector<4x128xf32>
    %c0_89 = arith.constant 0 : index
    %c0_90 = arith.constant 0 : index
    %206 = vector.load %arg8[%c0_89, %c0_90] : memref<4x128xf32, #tpu.memory_space<vmem>>, vector<4x128xf32>
    tpu.vector_store %arg8[%c0_89, %c0_90], %205 {strides = array<i32>} : memref<4x128xf32, #tpu.memory_space<vmem>>, vector<4x128xf32>,
    return
  }
}

</mosaic_0001>

<bundles_post_ra>
// kernel: cvae_forward.1
= control target key start
LH: loop header
LB: loop body
LE: loop exit
PB: predicated region body
PF: predicated region fallthrough
CT: control target
= control target key end

     0   :  { %v7219_v0 = vmov 1   ;;  %v7221_v1 = vmov 4   ;;  %v7217_v7 = vmov 0   ;;  %v7227_v10 = vmov 3   ;;  %s4895_s24 = smov 88   ;;  %s4896_s25 = smov 104   ;;  %s7205_s0 = inlined_call_operand.vmem [shape: f32[160,8], index: 0, kind: input, shape index: {}]   ;;  %s7206_s3 = inlined_call_operand.vmem [shape: f32[384,64], index: 3, kind: input, shape index: {}]   ;;  %s7207_s2 = inlined_call_operand.vmem [shape: f32[80,64], index: 2, kind: input, shape index: {}]   ;;  %s7208_s4 = inlined_call_operand.vmem [shape: f32[8,160], index: 4, kind: input, shape index: {}]   ;;  %s7209_s5 = inlined_call_operand.vmem [shape: f32[32,1152], index: 5, kind: input, shape index: {}]   ;;  %s7210_s6 = inlined_call_operand.vmem [shape: f32[1,1280], index: 6, kind: input, shape index: {}]   ;;  %s7211_s1 = inlined_call_operand.vmem [shape: f32[4,128], index: 1, kind: input, shape index: {}]   ;;  %s7212_s7 = inlined_call_operand.vmem [shape: f32[40,32], index: 7, kind: input, shape index: {}]   ;;  %s7213_s8 = inlined_call_operand.vmem [shape: f32[4,128], index: 8, kind: output, shape index: {}]  }
   0x1   :  { %4815 = vset.pattern.permute.xlu1 %v7219_v0  ;;  %4838 = vset.pattern.permute.xlu0 %v7221_v1  ;;  %v4954_v2 = vld [vmem:[%s7205_s0 + $0x10] sm:$0xff]  ;;  %v4959_v3 = vld [vmem:[%s7205_s0] sm:$0xff]  ;;  %v4971_v5 = vld [vmem:[%s7205_s0 + $0x98] sm:$0xff]  ;;  %v7215_v23 = vmov 2   ;;  %v50_v38 = vlaneseq  ;;  %vm973_vm3 = vcmask 523264   ;;  %vm2668_vm4 = vcmask 261120  }
   0x2   :  { %65 = vperm.xlu0 %4838, %v4954_v2   ;;  %254 = vperm.xlu1 %4815, %v4959_v3   ;;  %v4966_v4 = vld [vmem:[%s7205_s0 + $0x30] sm:$0xff]  ;;  %v4978_v6 = vld [vmem:[%s7205_s0 + $0x8] sm:$0xff]  ;;  %v4988_v8 = vld [vmem:[%s7205_s0 + $0x18] sm:$0xff]  ;;  %vm4893_vm5 = vmmov 0   ;;  %vm2922_vm6 = vcmask 60416   ;;  %s4897_s26 = smov 64  }
   0x3   :  { %v4999_v9 = vld [vmem:[%s7205_s0 + $0x20] sm:$0xff]  ;;  %v5029_v14 = vld [vmem:[%s7205_s0 + $0x28] sm:$0xff]  ;;  %v5064_v18 = vld [vmem:[%s7205_s0 + $0x38] sm:$0xff]  ;;  %v5166_v42 = vand.u32 127, %v50_v38  ;;  %v5175_v45 = vshrl.u32 %v50_v38, 7  ;;  %vm2959_vm8 = vcmask 64512  }
   0x4   :  { %v5008_v11 = vld [vmem:[%s7205_s0 + $0x40] sm:$0xff]  ;;  %v5037_v15 = vld [vmem:[%s7205_s0 + $0x48] sm:$0xff]  ;;  %v5072_v19 = vld [vmem:[%s7205_s0 + $0x50] sm:$0xff]  ;;  %vm3045_vm9 = vcmask 1043456   ;;  %s4899_s13 = smov 8   ;;  %vm3329_vm10 = vcmask 326656  }
   0x5   :  { %v5016_v12 = vld [vmem:[%s7205_s0 + $0x60] sm:$0xff]  ;;  %v5046_v16 = vld [vmem:[%s7205_s0 + $0x68] sm:$0xff]  ;;  %v5080_v20 = vld [vmem:[%s7205_s0 + $0x58] sm:$0xff]  ;;  %vm52_vm0 = vcmp.lt.s32.totalorder %v5166_v42, 32  ;;  %vm586_vm1 = vcmp.lt.s32.totalorder %v5175_v45, 7  ;;  %vm375_vm2 = vcmp.lt.s32.totalorder %v5175_v45, 1 }
   0x6   :  { %85 = vperm.xlu0 %4838, %v4966_v4   ;;  %330 = vperm.xlu1 %4815, %v4971_v5   ;;  %v5024_v13 = vld [vmem:[%s7205_s0 + $0x80] sm:$0xff]  ;;  %v5053_v17 = vld [vmem:[%s7205_s0 + $0x88] sm:$0xff]  ;;  %v5088_v21 = vld [vmem:[%s7205_s0 + $0x70] sm:$0xff]  ;;  %vm3756_vm11 = vcmask 130048   ;;  %vm3758_vm12 = vcmask 195584   ;;  %vm3760_vm13 = vcmask 203776  }
   0x7   :  { %v5095_v22 = vld [vmem:[%s7205_s0 + $0x78] sm:$0xff]  ;;  %v965_v24 = vld [vmem:[%s7206_s3 + $0x40] sm:$0xff]  ;;  %v966_v25 = vld [vmem:[%s7206_s3 + $0x48] sm:$0xff] }
   0x8   :  { %v4524_v26 = vpack.c.bf16 %v966_v25, %v965_v24  ;;  %v967_v27 = vld [vmem:[%s7206_s3 + $0x50] sm:$0xff]  ;;  %v968_v28 = vld [vmem:[%s7206_s3 + $0x58] sm:$0xff]  ;;  %v969_v30 = vld [vmem:[%s7206_s3 + $0x60] sm:$0xff] }
   0x9   :  { %v4528_v29 = vpack.c.bf16 %v968_v28, %v967_v27  ;;  %v970_v31 = vld [vmem:[%s7206_s3 + $0x68] sm:$0xff]  ;;  %v971_v33 = vld [vmem:[%s7206_s3 + $0x70] sm:$0xff]  ;;  %v972_v34 = vld [vmem:[%s7206_s3 + $0x78] sm:$0xff] }
   0xa   :  { %4852 = vset.pattern.permute.xlu0 %v7217_v7  ;;  %258 = vperm.xlu1 %4815, %v4978_v6   ;;  %v4532_v32 = vpack.c.bf16 %v970_v31, %v969_v30  ;;  %v4536_v35 = vpack.c.bf16 %v972_v34, %v971_v33  ;;  %v5161_v39 = vld [vmem:[%s7205_s0 + $0x90] sm:$0xff] }
   0xb   :  { %174 = vperm.xlu0 %4852, %v4959_v3   ;;  %4525 = vmatprep.subr.bf16.mxu0 %v4524_v26 }
   0xc   :  { %4527 = vmatpush3.bf16.msra.mxu0 %v4524_v26 }
   0xd   :  { %4529 = vmatprep.subr.bf16.mxu0 %v4528_v29 }
   0xe   :  { %262 = vperm.xlu1 %4815, %v4954_v2  }
   0xf   :  { %250 = vperm.xlu0 %4852, %v4971_v5  }
  0x10   :  { %4531 = vmatpush3.bf16.msra.mxu0 %v4528_v29 }
  0x11   :  { %4533 = vmatprep.subr.bf16.mxu0 %v4532_v32 }
  0x12   :  { %4816 = vset.pattern.permute.xlu1 %v7217_v7 }
  0x13   :  { %178 = vperm.xlu0 %4852, %v4978_v6   ;;  %186 = vperm.xlu1 %4816, %v4988_v8  }
  0x14   :  { %4535 = vmatpush3.bf16.msra.mxu0 %v4532_v32 }
  0x15   :  { %4537 = vmatprep.subr.bf16.mxu0 %v4536_v35 }
  0x17   :  { %182 = vperm.xlu0 %4852, %v4954_v2   ;;  %4817 = vset.pattern.permute.xlu1 %v7219_v0 }
  0x18   :  { %266 = vperm.xlu1 %4817, %v4988_v8   ;;  %4539 = vmatpush3.bf16.msra.mxu0 %v4536_v35 }
  0x1b   :  { %190 = vperm.xlu0 %4852, %v4999_v9  }
  0x1c   :  { %4818 = vset.pattern.permute.xlu1 %v7227_v10 }
  0x1d   :  { %608 = vperm.xlu1 %4818, %v4959_v3  }
  0x1f   :  { %198 = vperm.xlu0 %4852, %v4966_v4  }
  0x21   :  { %4819 = vset.pattern.permute.xlu1 %v7219_v0 }
  0x22   :  { %270 = vperm.xlu1 %4819, %v4999_v9  }
  0x23   :  { %206 = vperm.xlu0 %4852, %v5008_v11  }
  0x26   :  { %4820 = vset.pattern.permute.xlu1 %v7227_v10 }
  0x27   :  { %222 = vperm.xlu0 %4852, %v5016_v12   ;;  %612 = vperm.xlu1 %4820, %v4978_v6  }
  0x2b   :  { %238 = vperm.xlu0 %4852, %v5024_v13   ;;  %4821 = vset.pattern.permute.xlu1 %v7217_v7 }
  0x2c   :  { %194 = vperm.xlu1 %4821, %v5029_v14  }
  0x2f   :  { %4857 = vset.pattern.permute.xlu0 %v7219_v0 }
  0x30   :  { %290 = vperm.xlu0 %4857, %v5037_v15   ;;  %4822 = vset.pattern.permute.xlu1 %v7219_v0 }
  0x31   :  { %274 = vperm.xlu1 %4822, %v5029_v14  }
  0x34   :  { %306 = vperm.xlu0 %4857, %v5046_v16  }
  0x35   :  { %4823 = vset.pattern.permute.xlu1 %v7227_v10 }
  0x36   :  { %616 = vperm.xlu1 %4823, %v4954_v2  }
  0x38   :  { %322 = vperm.xlu0 %4857, %v5053_v17  }
  0x3a   :  { %4824 = vset.pattern.permute.xlu1 %v7219_v0 }
  0x3b   :  { %278 = vperm.xlu1 %4824, %v4966_v4  }
  0x3c   :  { %4862 = vset.pattern.permute.xlu0 %v7227_v10 }
  0x3d   :  { %632 = vperm.xlu0 %4862, %v4966_v4  }
  0x3f   :  { %4825 = vset.pattern.permute.xlu1 %v7227_v10 }
  0x40   :  { %620 = vperm.xlu1 %4825, %v4988_v8  }
  0x41   :  { %636 = vperm.xlu0 %4862, %v5064_v18  }
  0x44   :  { %4826 = vset.pattern.permute.xlu1 %v7217_v7 }
  0x45   :  { %648 = vperm.xlu0 %4862, %v5072_v19   ;;  %202 = vperm.xlu1 %4826, %v5064_v18  }
  0x49   :  { %652 = vperm.xlu0 %4862, %v5080_v20   ;;  %4827 = vset.pattern.permute.xlu1 %v7219_v0 }
  0x4a   :  { %282 = vperm.xlu1 %4827, %v5064_v18  }
  0x4d   :  { %664 = vperm.xlu0 %4862, %v5088_v21  }
  0x4e   :  { %4828 = vset.pattern.permute.xlu1 %v7227_v10 }
  0x4f   :  { %624 = vperm.xlu1 %4828, %v4999_v9  }
  0x51   :  { %668 = vperm.xlu0 %4862, %v5095_v22  }
  0x53   :  { %4829 = vset.pattern.permute.xlu1 %v7219_v0 }
  0x54   :  { %286 = vperm.xlu1 %4829, %v5008_v11  }
  0x55   :  { %672 = vperm.xlu0 %4862, %v5024_v13  }
  0x58   :  { %4830 = vset.pattern.permute.xlu1 %v7227_v10 }
  0x59   :  { %4869 = vset.pattern.permute.xlu0 %v7215_v23  ;;  %628 = vperm.xlu1 %4830, %v5029_v14  }
  0x5a   :  { %397 = vperm.xlu0 %4869, %v4959_v3  }
  0x5d   :  { %4831 = vset.pattern.permute.xlu1 %v7221_v1 }
  0x5e   :  { %401 = vperm.xlu0 %4869, %v4978_v6   ;;  %55 = vperm.xlu1 %4831, %v4959_v3  }
  0x62   :  { %405 = vperm.xlu0 %4869, %v4954_v2   ;;  %4832 = vset.pattern.permute.xlu1 %v7217_v7 }
  0x63   :  { %210 = vperm.xlu1 %4832, %v5037_v15  }
  0x66   :  { %409 = vperm.xlu0 %4869, %v4988_v8  }
  0x67   :  { %4833 = vset.pattern.permute.xlu1 %v7215_v23 }
  0x68   :  { %425 = vperm.xlu1 %4833, %v5064_v18  }
  0x6a   :  { %413 = vperm.xlu0 %4869, %v4999_v9  }
  0x6c   :  { %4834 = vset.pattern.permute.xlu1 %v7221_v1 }
  0x6d   :  { %60 = vperm.xlu1 %4834, %v4978_v6  }
  0x6e   :  { %417 = vperm.xlu0 %4869, %v5029_v14  }
  0x71   :  { %4835 = vset.pattern.permute.xlu1 %v7217_v7 }
  0x72   :  { %421 = vperm.xlu0 %4869, %v4966_v4   ;;  %214 = vperm.xlu1 %4835, %v5072_v19  }
  0x76   :  { %433 = vperm.xlu0 %4869, %v5037_v15   ;;  %4836 = vset.pattern.permute.xlu1 %v7219_v0 }
  0x77   :  { %294 = vperm.xlu1 %4836, %v5072_v19  }
  0x7a   :  { %437 = vperm.xlu0 %4869, %v5072_v19  }
  0x7b   :  { %4837 = vset.pattern.permute.xlu1 %v7215_v23 }
  0x7c   :  { %429 = vperm.xlu1 %4837, %v5008_v11  }
  0x7e   :  { %449 = vperm.xlu0 %4869, %v5046_v16  }
  0x80   :  { %4839 = vset.pattern.permute.xlu1 %v7217_v7 }
  0x81   :  { %218 = vperm.xlu1 %4839, %v5080_v20   ;;  %v255_v36 = vpop.permute.xlu1 %254  ;;  %v5155_v37 = vpop.permute.xlu0 %65 }
  0x82   :  { %453 = vperm.xlu0 %4869, %v5088_v21  }
  0x85   :  { %4840 = vset.pattern.permute.xlu1 %v7219_v0  ;;  %v331_v40 = vpop.permute.xlu1 %330  ;;  %v5164_v41 = vpop.permute.xlu0 %85 }
  0x86   :  { %298 = vperm.xlu1 %4840, %v5080_v20   ;;  %469 = vperm.xlu0 %4869, %v5161_v39  }
  0x89   :  { %v259_v43 = vpop.permute.xlu1 %258 }
  0x8a   :  { %v175_v44 = vpop.permute.xlu0 %174  ;;  %4841 = vset.pattern.permute.xlu1 %v7221_v1  ;;  %4872 = vset.pattern.permute.xlu0 %v7221_v1 }
  0x8b   :  { %70 = vperm.xlu1 %4841, %v4988_v8   ;;  %105 = vperm.xlu0 %4872, %v5072_v19   ;;  %v5179_v46 = vsel %vm52_vm0, %v175_v44, %v255_v36 }
  0x8c   :  { %v566_v50 = vrot.slane %v5179_v46, 1  ;;  %v353_v56 = vrot.slane %v5179_v46, 7 }
  0x8d   :  { %v263_v47 = vpop.permute.xlu1 %262 }
  0x8e   :  { %v251_v48 = vpop.permute.xlu0 %250 }
  0x8f   :  { %v5183_v49 = vsel %vm52_vm0, %v251_v48, %v331_v40  ;;  %4842 = vset.pattern.permute.xlu1 %v7227_v10  ;;  %120 = vperm.xlu0 %4872, %v5046_v16  }
  0x90   :  { %7321 = vst [vmem:[#allocation2_spill] sm:$0xff] %v5183_v49  ;;  %v7214_v51 = vrot.slane %v5183_v49, 1  ;;  %640 = vperm.xlu1 %4842, %v5008_v11  }
  0x92   :  { %v179_v52 = vpop.permute.xlu0 %178  ;;  %v5191_v53 = vpop.permute.xlu1 %186  ;;  %v5197_v54 = vsel %vm586_vm1, %v7214_v51, %v566_v50 }
  0x93   :  { %7322 = vst [vmem:[#allocation3_spill] sm:$0xff] %v5197_v54  ;;  %v5201_v55 = vsel %vm52_vm0, %v179_v52, %v259_v43  ;;  %130 = vperm.xlu0 %4872, %v5095_v22  }
  0x94   :  { %v354_v57 = vrot.slane %v5201_v55, 7  ;;  %v567_v58 = vrot.slane %v5201_v55, 1  ;;  %4843 = vset.pattern.permute.xlu1 %v7219_v0 }
  0x95   :  { %302 = vperm.xlu1 %4843, %v5016_v12  }
  0x96   :  { %v183_v59 = vpop.permute.xlu0 %182  ;;  %v5212_v60 = vsel %vm586_vm1, %v566_v50, %v567_v58  ;;  %v5218_v61 = vsel %vm375_vm2, %v353_v56, %v354_v57 }
  0x97   :  { %v5222_v62 = vsel %vm52_vm0, %v183_v59, %v263_v47  ;;  %v5224_v63 = vpop.permute.xlu1 %266  ;;  %140 = vperm.xlu0 %4872, %v5053_v17   ;;  %v7226_v59 = vrot.slane %v5183_v49, 7  ;;  %v5354_v49 = vld [vmem:[%s7207_s2 + $0x2] ss:$0 sm:$0xff] }
  0x98   :  { %v7220_v2 = vrot.slane %v5222_v62, 7  ;;  %v7223_v3 = vrot.slane %v5222_v62, 1 }
  0x99   :  { %4844 = vset.pattern.permute.xlu1 %v7227_v10 }
  0x9a   :  { %644 = vperm.xlu1 %4844, %v5037_v15   ;;  %v5231_v4 = vpop.permute.xlu0 %190  ;;  %v5237_v6 = vsel %vm586_vm1, %v567_v58, %v7223_v3  ;;  %v5243_v8 = vsel %vm375_vm2, %v354_v57, %v7220_v2 }
  0x9b   :  { %145 = vperm.xlu0 %4872, %v5161_v39  }
  0x9c   :  { %v5246_v19 = vpop.permute.xlu1 %608 }
  0x9d   :  { %7323 = vst [vmem:[#allocation4_spill] sm:$0xff] %v5246_v19 }
  0x9e   :  { %4845 = vset.pattern.permute.xlu1 %v7221_v1  ;;  %v5249_v24 = vpop.permute.xlu0 %198 }
  0x9f   :  { %75 = vperm.xlu1 %4845, %v4999_v9   ;;  %4876 = vset.pattern.permute.xlu0 %v7227_v10 }
  0xa1   :  { %v271_v25 = vpop.permute.xlu1 %270 }
  0xa2   :  { %v5253_v26 = vpop.permute.xlu0 %206 }
  0xa3   :  { %4846 = vset.pattern.permute.xlu1 %v7217_v7 }
  0xa4   :  { %226 = vperm.xlu1 %4846, %v5046_v16  }
  0xa6   :  { %v5257_v27 = vpop.permute.xlu1 %612  ;;  %v5259_v28 = vpop.permute.xlu0 %222 }
  0xa7   :  { %7324 = vst [vmem:[#allocation5_spill] sm:$0xff] %v5257_v27 }
  0xa8   :  { %4847 = vset.pattern.permute.xlu1 %v7215_v23 }
  0xa9   :  { %441 = vperm.xlu1 %4847, %v5080_v20  }
  0xaa   :  { %v5263_v29 = vpop.permute.xlu0 %238 }
  0xab   :  { %v5265_v9 = vpop.permute.xlu1 %194 }
  0xad   :  { %4848 = vset.pattern.permute.xlu1 %v7221_v1 }
  0xae   :  { %80 = vperm.xlu1 %4848, %v5029_v14  }
  0xaf   :  { %v5269_v30 = vpop.permute.xlu0 %290 }
  0xb0   :  { %v5271_v31 = vpop.permute.xlu1 %274 }
  0xb2   :  { %4849 = vset.pattern.permute.xlu1 %v7217_v7 }
  0xb3   :  { %230 = vperm.xlu1 %4849, %v5088_v21   ;;  %v5275_v32 = vpop.permute.xlu0 %306 }
  0xb5   :  { %v5277_v33 = vpop.permute.xlu1 %616 }
  0xb6   :  { %7325 = vst [vmem:[#allocation6_spill] sm:$0xff] %v5277_v33 }
  0xb7   :  { %4850 = vset.pattern.permute.xlu1 %v7219_v0  ;;  %v5280_v34 = vpop.permute.xlu0 %322 }
  0xb8   :  { %310 = vperm.xlu1 %4850, %v5088_v21  }
  0xba   :  { %v279_v35 = vpop.permute.xlu1 %278 }
  0xbc   :  { %4851 = vset.pattern.permute.xlu1 %v7215_v23  ;;  %v5284_v14 = vpop.permute.xlu0 %632  ;;  %v5325_v23 = vld [vmem:[%s7207_s2 + $0x1] ss:$0 sm:$0xff] }
  0xbd   :  { %7326 = vst [vmem:[#allocation7_spill] sm:$0xff] %v5284_v14  ;;  %445 = vperm.xlu1 %4851, %v5016_v12  }
  0xbf   :  { %v5287_v36 = vpop.permute.xlu1 %620 }
  0xc0   :  { %7327 = vst [vmem:[#allocation8_spill] sm:$0xff] %v5287_v36  ;;  %v5289_v38 = vpop.permute.xlu0 %636 }
  0xc1   :  { %7328 = vst [vmem:[#allocation9_spill] sm:$0xff] %v5289_v38  ;;  %4853 = vset.pattern.permute.xlu1 %v7217_v7 }
  0xc2   :  { %234 = vperm.xlu1 %4853, %v5095_v22  }
  0xc4   :  { %v203_v40 = vpop.permute.xlu1 %202  ;;  %v5293_v43 = vpop.permute.xlu0 %648 }
  0xc5   :  { %7329 = vst [vmem:[#allocation10_spill] sm:$0xff] %v5293_v43 }
  0xc6   :  { %4854 = vset.pattern.permute.xlu1 %v7219_v0 }
  0xc7   :  { %314 = vperm.xlu1 %4854, %v5095_v22  }
  0xc8   :  { %v5297_v44 = vpop.permute.xlu0 %652 }
  0xc9   :  { %7330 = vst [vmem:[#allocation11_spill] sm:$0xff] %v5297_v44  ;;  %v283_v47 = vpop.permute.xlu1 %282 }
  0xcb   :  { %4855 = vset.pattern.permute.xlu1 %v7221_v1  ;;  %v5346_v1 = vsel %vm52_vm0, %v5231_v4, %v271_v25  ;;  %v5379_v25 = vsel %vm52_vm0, %v203_v40, %v283_v47  ;;  %v7341_v47 = vrot.slane %v5222_v62, 7 }
  0xcc   :  { %90 = vperm.xlu1 %4855, %v5064_v18   ;;  %v5301_v48 = vpop.permute.xlu0 %664  ;;  %v5317_v18 = vsel %vm52_vm0, %v5191_v53, %v5224_v63  ;;  %v395_v53 = vsel %vm375_vm2, %v7226_v59, %v353_v56  ;;  %v687_v63 = vmul.f32 %v5246_v19, %v5212_v60  ;;  %v526_v56 = vmul.f32 %v5325_v23, %v5179_v46 }
  0xcd   :  { %7331 = vst [vmem:[#allocation12_spill] sm:$0xff] %v5301_v48  ;;  %v569_v7 = vrot.slane %v5317_v18, 1  ;;  %v527_v60 = vmul.f32 %v5325_v23, %v5201_v55  ;;  %v7337_v59 = vrot.slane %v5222_v62, 1  ;;  %v7340_v40 = vrot.slane %v5317_v18, 7 }
  0xce   :  { %v5303_v50 = vpop.permute.xlu1 %624 }
  0xcf   :  { %7332 = vst [vmem:[#allocation13_spill] sm:$0xff] %v5303_v50 }
  0xd0   :  { %4856 = vset.pattern.permute.xlu1 %v7227_v10  ;;  %v5306_v52 = vpop.permute.xlu0 %668 }
  0xd1   :  { %7333 = vst [vmem:[#allocation14_spill] sm:$0xff] %v5306_v52  ;;  %656 = vperm.xlu1 %4856, %v5016_v12  }
  0xd3   :  { %v287_v57 = vpop.permute.xlu1 %286 }
  0xd4   :  { %v5309_v58 = vpop.permute.xlu0 %672 }
  0xd5   :  { %7334 = vst [vmem:[#allocation15_spill] sm:$0xff] %v5309_v58  ;;  %4858 = vset.pattern.permute.xlu1 %v7219_v0  ;;  %v5331_v0 = vld [vmem:[%s7207_s2] ss:$0 sm:$0xff] }
  0xd6   :  { %318 = vperm.xlu1 %4858, %v5024_v13  }
  0xd8   :  { %v5320_v51 = vpop.permute.xlu1 %628 }
  0xd9   :  { %7335 = vst [vmem:[#allocation16_spill] sm:$0xff] %v5320_v51  ;;  %v5333_v2 = vpop.permute.xlu0 %397 }
  0xda   :  { %7336 = vst [vmem:[#allocation17_spill] sm:$0xff] %v5333_v2  ;;  %v476_v3 = vmul.f32 %v5333_v2, %v395_v53  ;;  %4859 = vset.pattern.permute.xlu1 %v7227_v10  ;;  %v688_v53 = vmul.f32 %v5257_v27, %v5237_v6  ;;  %v603_v10 = vsel %vm586_vm1, %v7337_v59, %v569_v7  ;;  %v7339_v27 = vmov 4  }
  0xdb   :  { %660 = vperm.xlu1 %4859, %v5046_v16   ;;  %v5372_v16 = vsel %vm52_vm0, %v5253_v26, %v287_v57  ;;  %v528_v59 = vmul.f32 %v5325_v23, %v5222_v62  ;;  %v529_v26 = vmul.f32 %v5325_v23, %v5317_v18  ;;  %v689_v57 = vmul.f32 %v5277_v33, %v603_v10 }
  0xdc   :  { %v501_v4 = vmul.f32 %v5331_v0, %v476_v3  ;;  %v712_v3 = vmul.f32 %v5354_v49, %v687_v63  ;;  %v5391_v63 = vld [vmem:[%s7207_s2 + $0x3] ss:$0 sm:$0xff]  ;;  %v574_v10 = vrot.slane %v5372_v16, 1  ;;  %v713_v19 = vmul.f32 %v5354_v49, %v688_v53 }
  0xdd   :  { %v5374_v46 = vpop.permute.xlu0 %401  ;;  %v56_v55 = vpop.permute.xlu1 %55  ;;  %v5413_v62 = vsel %vm52_vm0, %v5265_v9, %v5271_v31  ;;  %v714_v9 = vmul.f32 %v5354_v49, %v689_v57  ;;  %v7344_v57 = vmov 0  }
  0xde   :  { %7338 = vst [vmem:[#allocation18_spill] sm:$0xff] %v5374_v46  ;;  %v546_v6 = vadd.f32 %v526_v56, %v501_v4  ;;  %v477_v54 = vmul.f32 %v5374_v46, %v5218_v61  ;;  %v392_v61 = vsel %vm375_vm2, %v7341_v47, %v7340_v40  ;;  %v5403_v56 = vsel %vm52_vm0, %v5249_v24, %v279_v35 }
  0xdf   :  { %4860 = vset.pattern.permute.xlu1 %v7339_v27  ;;  %v7342_v40 = vrot.slane %v5346_v1, 1  ;;  %v7245_v35 = vrot.slane %v5379_v25, 7  ;;  %v7347_v46 = vrot.slane %v5372_v16, 7  ;;  %v5464_v58 = vsel %vm52_vm0, %v56_v55, 1.0 }
  0xe0   :  { %v502_v4 = vmul.f32 %v5331_v0, %v477_v54  ;;  %v732_v33 = vadd.f32 %v712_v3, %v546_v6  ;;  %95 = vperm.xlu1 %4860, %v5008_v11   ;;  %v7237_v54 = vrot.slane %v5379_v25, 1  ;;  %7348 = vst [vmem:[#allocation20_spill] sm:$0xff] %v5464_v58 }
  0xe1   :  { %v602_v24 = vsel %vm586_vm1, %v569_v7, %v7342_v40  ;;  %v5420_v47 = vpop.permute.xlu0 %405 }
  0xe2   :  { %7343 = vst [vmem:[#allocation19_spill] sm:$0xff] %v5420_v47  ;;  %v547_v11 = vadd.f32 %v527_v60, %v502_v4  ;;  %v757_v53 = vadd.f32 %v5391_v63, %v732_v33  ;;  %v478_v3 = vmul.f32 %v5420_v47, %v5243_v8  ;;  %v211_v6 = vpop.permute.xlu1 %210  ;;  %v598_v33 = vsel %vm586_vm1, %v7237_v54, %v574_v10 }
  0xe3   :  { %v5432_v7 = vsel %vm52_vm0, %v211_v6, %v5269_v30  ;;  %v690_v40 = vmul.f32 %v5287_v36, %v602_v24  ;;  %v7345_v30 = vrot.slane %v5403_v56, 7  ;;  %v694_v2 = vmul.f32 %v5289_v38, %v598_v33 }
  0xe4   :  { %v777_v60 = vmul.f32 0.2, %v757_v53  ;;  %v503_v8 = vmul.f32 %v5331_v0, %v478_v3  ;;  %4861 = vset.pattern.permute.xlu1 %v7344_v57  ;;  %v733_v3 = vadd.f32 %v713_v19, %v547_v11  ;;  %v7346_v24 = vrot.slane %v5432_v7, 7 }
  0xe5   :  { %v5443_v31 = vpop.permute.xlu0 %409  ;;  %242 = vperm.xlu1 %4861, %v5053_v17   ;;  %v388_v6 = vsel %vm375_vm2, %v7345_v30, %v7245_v35 }
  0xe6   :  { %v797_v54 = vmax.f32 %v757_v53, %v777_v60  ;;  %v548_v4 = vadd.f32 %v528_v59, %v503_v8  ;;  %v479_v47 = vmul.f32 %v5443_v31, %v392_v61  ;;  %v5459_v36 = vsel %vm375_vm2, %v7347_v46, %v7346_v24 }
  0xe7   :  { %v5466_v30 = vpop.permute.xlu1 %425  ;;  %v758_v19 = vadd.f32 %v5391_v63, %v733_v3  ;;  %v7350_v59 = vrot.slane %v5432_v7, 1  ;;  %v7246_v60 = vrot.slane %v5403_v56, 1  ;;  %v715_v8 = vmul.f32 %v5354_v49, %v690_v40 }
  0xe8   :  { %7349 = vst [vmem:[#allocation21_spill] sm:$0xff] %v5466_v30  ;;  %v5476_v11 = vmul.f32 %v797_v54, %v5464_v58  ;;  %v734_v46 = vadd.f32 %v714_v9, %v548_v4  ;;  %v504_v53 = vmul.f32 %v5331_v0, %v479_v47  ;;  %v483_v33 = vmul.f32 %v5466_v30, %v388_v6 }
  0xe9   :  { %v5473_v61 = vsel %vm586_vm1, %v574_v10, %v7350_v59  ;;  %v5483_v3 = vpop.permute.xlu0 %413  ;;  %v7351_v24 = vmov 2   ;;  %v778_v10 = vmul.f32 0.2, %v758_v19  ;;  %v533_v54 = vmul.f32 %v5325_v23, %v5379_v25 }
  0xea   :  { %4863 = vset.pattern.permute.xlu1 %v7351_v24  ;;  %v549_v59 = vadd.f32 %v529_v26, %v504_v53  ;;  %v508_v9 = vmul.f32 %v5331_v0, %v483_v33  ;;  %4150 = vmatprep.mubr.msk.f32.mxu0 %vm973_vm3, %v5476_v11  ;;  %v5495_v47 = vsel %vm52_vm0, %v5155_v37, 1.0  ;;  %v7247_v40 = vrot.slane %v5413_v62, 1 }
  0xeb   :  { %457 = vperm.xlu1 %4863, %v5095_v22   ;;  %7352 = vst [vmem:[#allocation22_spill] sm:$0xff] %v5495_v47  ;;  %v759_v6 = vadd.f32 %v5391_v63, %v734_v46  ;;  %v798_v26 = vmax.f32 %v758_v19, %v778_v10  ;;  %v719_v22 = vmul.f32 %v5354_v49, %v694_v2  ;;  %v7355_v46 = vrot.slane %v5413_v62, 7 }
  0xec   :  { %v553_v35 = vadd.f32 %v533_v54, %v508_v9  ;;  %v61_v53 = vpop.permute.xlu1 %60  ;;  %v735_v33 = vadd.f32 %v715_v8, %v549_v59  ;;  %v600_v37 = vsel %vm586_vm1, %v7247_v40, %v7246_v60  ;;  %v7356_v19 = vrot.slane %v5346_v1, 7 }
  0xed   :  { %v5509_v4 = vsel %vm52_vm0, %v61_v53, 1.0  ;;  %v5511_v55 = vpop.permute.xlu0 %417  ;;  %v779_v8 = vmul.f32 0.2, %v759_v6  ;;  %v692_v10 = vmul.f32 %v5320_v51, %v600_v37  ;;  %v531_v53 = vmul.f32 %v5325_v23, %v5413_v62 }
  0xee   :  { %7353 = vst [vmem:[#allocation23_spill] sm:$0xff] %v5509_v4  ;;  %7354 = vst [vmem:[#allocation24_spill] sm:$0xff] %v5511_v55  ;;  %v390_v2 = vsel %vm375_vm2, %v7356_v19, %v7355_v46  ;;  %v818_v54 = vmul.f32 %v798_v26, %v5509_v4  ;;  %v5523_v9 = vadd.f32 %v719_v22, %v553_v35  ;;  %v7250_v40 = vrot.slane %v5476_v11, 7 }
  0xef   :  { %v481_v59 = vmul.f32 %v5511_v55, %v390_v2  ;;  %4864 = vset.pattern.permute.xlu1 %v7339_v27  ;;  %v799_v60 = vmax.f32 %v759_v6, %v779_v8  ;;  %v717_v22 = vmul.f32 %v5354_v49, %v692_v10  ;;  %v7249_v58 = vrot.slane %v5476_v11, 1 }
  0xf0   :  { %100 = vperm.xlu1 %4864, %v5037_v15   ;;  %v838_v46 = vrot.slane %v818_v54, 7  ;;  %v898_v19 = vrot.slane %v818_v54, 1  ;;  %4151 = vmatmul.mubr.msk.f32.vlgmr.msra.gmra.mrb[0].mxu0 %vm973_vm3, %v818_v54  ;;  %v7365_v51 = vrot.slane %v5317_v18, 7 }
  0xf1   :  { %v506_v37 = vmul.f32 %v5331_v0, %v481_v59  ;;  %v5531_v26 = vpop.permute.xlu0 %421  ;;  %v215_v2 = vpop.permute.xlu1 %214  ;;  %v5534_v35 = vmul.f32 %v799_v60, %v5495_v47 }
  0xf2   :  { %v5542_v15 = vsel %vm375_vm2, %v7250_v40, %v838_v46  ;;  %v5556_v10 = vsel %vm586_vm1, %v7249_v58, %v898_v19  ;;  %v535_v58 = vmul.f32 %v5325_v23, %v5432_v7 }
  0xf3   :  { %v551_v6 = vadd.f32 %v531_v53, %v506_v37  ;;  %v7253_v8 = vrot.slane %v5534_v35, 7  ;;  %v7251_v54 = vrot.slane %v5534_v35, 1  ;;  %4153 = vmatprep.mubr.msk.f32.mxu0 %vm973_vm3, %v5534_v35  ;;  %7357 = vst [vmem:[#allocation25_spill] sm:$0xff] %v5556_v10  ;;  %v7368_v10 = vrot.slane %v5413_v62, 1 }
  0xf4   :  { %4865 = vset.pattern.permute.xlu1 %v7344_v57 }
  0xf5   :  { %246 = vperm.xlu1 %4865, %v5161_v39   ;;  %v5550_v60 = vadd.f32 %v717_v22, %v551_v6  ;;  %v5562_v59 = vsel %vm586_vm1, %v898_v19, %v7251_v54  ;;  %v5564_v53 = vpop.permute.xlu0 %433  ;;  %v5570_v57 = vsel %vm375_vm2, %v838_v46, %v7253_v8  ;;  %v7360_v54 = vmov 1  }
  0xf6   :  { %7358 = vst [vmem:[#allocation26_spill] sm:$0xff] %v5562_v59  ;;  %7359 = vst [vmem:[#allocation27_spill] sm:$0xff] %v5564_v53  ;;  %v485_v37 = vmul.f32 %v5564_v53, %v5459_v36  ;;  %v295_v22 = vpop.permute.xlu1 %294  ;;  %v7362_v36 = vrot.slane %v5432_v7, 7 }
  0xf7   :  { %v343_v6 = vsel %vm52_vm0, %v215_v2, %v295_v22 }
  0xf8   :  { %v510_v19 = vmul.f32 %v5331_v0, %v485_v37  ;;  %v363_v40 = vrot.slane %v343_v6, 7  ;;  %v576_v47 = vrot.slane %v343_v6, 1  ;;  %v7363_v37 = vrot.slane %v5432_v7, 1 }
  0xf9   :  { %4866 = vset.pattern.permute.xlu1 %v7360_v54  ;;  %v5581_v46 = vpop.permute.xlu0 %437  ;;  %v536_v38 = vmul.f32 %v5325_v23, %v343_v6  ;;  %v7364_v7 = vrot.slane %v5346_v1, 7 }
  0xfa   :  { %326 = vperm.xlu1 %4866, %v5161_v39   ;;  %7361 = vst [vmem:[#allocation28_spill] sm:$0xff] %v5581_v46  ;;  %v5583_v8 = vadd.f32 %v535_v58, %v510_v19  ;;  %v385_v2 = vsel %vm375_vm2, %v7362_v36, %v363_v40  ;;  %v5596_v54 = vsel %vm586_vm1, %v7363_v37, %v576_v47 }
  0xfb   :  { %v486_v22 = vmul.f32 %v5581_v46, %v385_v2  ;;  %v5590_v4 = vpop.permute.xlu1 %429  ;;  %v760_v2 = vadd.f32 %v5391_v63, %v735_v33  ;;  %v391_v37 = vsel %vm375_vm2, %v7365_v51, %v7364_v7  ;;  %v7366_v51 = vrot.slane %v5372_v16, 7 }
  0xfc   :  { %v480_v6 = vmul.f32 %v5483_v3, %v391_v37  ;;  %v7367_v7 = vrot.slane %v5379_v25, 7 }
  0xfd   :  { %v511_v58 = vmul.f32 %v5331_v0, %v486_v22 }
  0xfe   :  { %4867 = vset.pattern.permute.xlu1 %v7351_v24  ;;  %v505_v18 = vmul.f32 %v5331_v0, %v480_v6  ;;  %v387_v37 = vsel %vm375_vm2, %v7367_v7, %v7366_v51 }
  0xff   :  { %461 = vperm.xlu1 %4867, %v5024_v13   ;;  %v556_v19 = vadd.f32 %v536_v38, %v511_v58  ;;  %v780_v38 = vmul.f32 0.2, %v760_v2  ;;  %v484_v46 = vmul.f32 %v5590_v4, %v387_v37 }
 0x100   :  { %v219_v36 = vpop.permute.xlu1 %218 }
 0x101   :  { %v800_v30 = vmax.f32 %v760_v2, %v780_v38  ;;  %v509_v38 = vmul.f32 %v5331_v0, %v484_v46  ;;  %v534_v46 = vmul.f32 %v5325_v23, %v5372_v16 }
 0x103   :  { %465 = vperm.xlu1 %4867, %v5053_v17  }
 0x105   :  { %v299_v22 = vpop.permute.xlu1 %298 }
 0x106   :  { %v5613_v59 = vsel %vm52_vm0, %v219_v36, %v299_v22 }
 0x107   :  { %4868 = vset.pattern.permute.xlu1 %v7339_v27  ;;  %v364_v58 = vrot.slane %v5613_v59, 7  ;;  %v577_v33 = vrot.slane %v5613_v59, 1 }
 0x108   :  { %110 = vperm.xlu1 %4868, %v5080_v20   ;;  %v7369_v20 = vrot.slane %v5346_v1, 1 }
 0x109   :  { %v595_v36 = vsel %vm586_vm1, %v576_v47, %v577_v33  ;;  %v5630_v22 = vsel %vm375_vm2, %v363_v40, %v364_v58  ;;  %v530_v47 = vmul.f32 %v5325_v23, %v5346_v1 }
 0x10a   :  { %v601_v6 = vsel %vm586_vm1, %v7369_v20, %v7368_v10  ;;  %v697_v53 = vmul.f32 %v5293_v43, %v595_v36  ;;  %v71_v51 = vpop.permute.xlu1 %70  ;;  %v7372_v20 = vrot.slane %v5413_v62, 7  ;;  %v958_v62 = vld [vmem:[%s7206_s3 + $0x8] sm:$0xff] }
 0x10b   :  { %v691_v7 = vmul.f32 %v5303_v50, %v601_v6  ;;  %v5645_v40 = vsel %vm52_vm0, %v71_v51, 1.0  ;;  %v550_v2 = vadd.f32 %v530_v47, %v505_v18  ;;  %v7374_v51 = vmov 3  }
 0x10c   :  { %7370 = vst [vmem:[#allocation29_spill] sm:$0xff] %v5645_v40  ;;  %4870 = vset.pattern.permute.xlu1 %v7351_v24  ;;  %v5649_v55 = vmul.f32 %v800_v30, %v5645_v40  ;;  %v722_v10 = vmul.f32 %v5354_v49, %v697_v53  ;;  %v7371_v30 = vrot.slane %v5403_v56, 7  ;;  %v7375_v47 = vrot.slane %v5534_v35, 7 }
 0x10d   :  { %473 = vperm.xlu1 %4870, %v4971_v5   ;;  %v716_v24 = vmul.f32 %v5354_v49, %v691_v7 }
 0x10e   :  { %v7270_v1 = vrot.slane %v5649_v55, 7  ;;  %v900_v37 = vrot.slane %v5649_v55, 1  ;;  %4154 = vmatmul.mubr.msk.f32.gmra.mrb[2].mxu0 %vm973_vm3, %v5649_v55  ;;  %v5658_v36 = vadd.f32 %v722_v10, %v556_v19  ;;  %v389_v53 = vsel %vm375_vm2, %v7372_v20, %v7371_v30  ;;  %v957_v19 = vld [vmem:[%s7206_s3] sm:$0xff] }
 0x10f   :  { %v5667_v18 = vpop.permute.xlu1 %640  ;;  %v482_v10 = vmul.f32 %v5531_v26, %v389_v53  ;;  %v4540_v30 = vpack.c.bf16 %v958_v62, %v957_v19  ;;  %v554_v20 = vadd.f32 %v534_v46, %v509_v38  ;;  %v736_v43 = vadd.f32 %v716_v24, %v550_v2 }
 0x110   :  { %7373 = vst [vmem:[#allocation30_spill] sm:$0xff] %v5667_v18  ;;  %v695_v6 = vmul.f32 %v5667_v18, %v5473_v61  ;;  %v5686_v16 = vsel %vm375_vm2, %v7375_v47, %v7270_v1  ;;  %v7376_v61 = vrot.slane %v5534_v35, 1  ;;  %v7377_v47 = vrot.slane %v5379_v25, 1 }
 0x111   :  { %4871 = vset.pattern.permute.xlu1 %v7374_v51  ;;  %4541 = vmatprep.subr.bf16.mxu0 %v4540_v30  ;;  %v7378_v1 = vrot.slane %v5403_v56, 1  ;;  %v507_v53 = vmul.f32 %v5331_v0, %v482_v10  ;;  %v761_v38 = vadd.f32 %v5391_v63, %v736_v43  ;;  %v960_v43 = vld [vmem:[%s7206_s3 + $0x18] sm:$0xff] }
 0x112   :  { %v5694_v7 = vsel %vm586_vm1, %v7376_v61, %v900_v37  ;;  %676 = vperm.xlu1 %4871, %v5053_v17   ;;  %v720_v40 = vmul.f32 %v5354_v49, %v695_v6  ;;  %4543 = vmatpush3.bf16.msra.mxu0 %v4540_v30 }
 0x113   :  { %v599_v35 = vsel %vm586_vm1, %v7378_v1, %v7377_v47 }
 0x114   :  { %v303_v18 = vpop.permute.xlu1 %302  ;;  %v5705_v61 = vadd.f32 %v720_v40, %v554_v20  ;;  %v532_v40 = vmul.f32 %v5325_v23, %v5403_v56  ;;  %v693_v1 = vmul.f32 %v5284_v14, %v599_v35 }
 0x115   :  { %v5711_v17 = vsel %vm52_vm0, %v5259_v28, %v303_v18 }
 0x116   :  { %4873 = vset.pattern.permute.xlu1 %v7339_v27  ;;  %v365_v25 = vrot.slane %v5711_v17, 7  ;;  %v578_v2 = vrot.slane %v5711_v17, 1  ;;  %v552_v18 = vadd.f32 %v532_v40, %v507_v53 }
 0x117   :  { %115 = vperm.xlu1 %4873, %v5016_v12   ;;  %v959_v12 = vld [vmem:[%s7206_s3 + $0x10] sm:$0xff] }
 0x118   :  { %v594_v24 = vsel %vm586_vm1, %v577_v33, %v578_v2  ;;  %v5725_v28 = vsel %vm375_vm2, %v364_v58, %v365_v25  ;;  %v781_v33 = vmul.f32 0.2, %v761_v38  ;;  %v4544_v6 = vpack.c.bf16 %v960_v43, %v959_v12  ;;  %v961_v12 = vld [vmem:[%s7206_s3 + $0x20] sm:$0xff] }
 0x119   :  { %v5727_v46 = vpop.permute.xlu1 %644  ;;  %v718_v58 = vmul.f32 %v5354_v49, %v693_v1 }
 0x11a   :  { %7379 = vst [vmem:[#allocation31_spill] sm:$0xff] %v5727_v46  ;;  %v696_v56 = vmul.f32 %v5727_v46, %v5596_v54  ;;  %4545 = vmatprep.subr.bf16.mxu0 %v4544_v6  ;;  %v801_v10 = vmax.f32 %v761_v38, %v781_v33 }
 0x11b   :  { %4874 = vset.pattern.permute.xlu1 %v7374_v51  ;;  %v738_v62 = vadd.f32 %v718_v58, %v552_v18  ;;  %4547 = vmatpush3.bf16.msra.mxu0 %v4544_v6  ;;  %v698_v58 = vmul.f32 %v5297_v44, %v594_v24 }
 0x11c   :  { %684 = vperm.xlu1 %4874, %v4971_v5   ;;  %v721_v19 = vmul.f32 %v5354_v49, %v696_v56  ;;  %v5781_v56 = vpop.permute.xlu0 %449 }
 0x11d   :  { %v763_v47 = vadd.f32 %v5391_v63, %v738_v62 }
 0x11e   :  { %v76_v30 = vpop.permute.xlu1 %75  ;;  %v5742_v20 = vadd.f32 %v721_v19, %v5583_v8 }
 0x11f   :  { %v5746_v54 = vsel %vm52_vm0, %v76_v30, 1.0  ;;  %v537_v30 = vmul.f32 %v5325_v23, %v5613_v59 }
 0x120   :  { %7380 = vst [vmem:[#allocation32_spill] sm:$0xff] %v5746_v54  ;;  %680 = vperm.xlu1 %4874, %v5161_v39   ;;  %v821_v51 = vmul.f32 %v801_v10, %v5746_v54  ;;  %v7381_v39 = vrot.slane %v5649_v55, 7  ;;  %v962_v55 = vld [vmem:[%s7206_s3 + $0x28] sm:$0xff] }
 0x121   :  { %v4548_v43 = vpack.c.bf16 %v962_v55, %v961_v12 }
 0x122   :  { %v841_v35 = vrot.slane %v821_v51, 7  ;;  %v901_v53 = vrot.slane %v821_v51, 1  ;;  %4156 = vmatprep.mubr.msk.f32.mxu0 %vm973_vm3, %v821_v51  ;;  %v964_v51 = vld [vmem:[%s7206_s3 + $0x38] sm:$0xff] }
 0x123   :  { %v227_v38 = vpop.permute.xlu1 %226  ;;  %4549 = vmatprep.subr.bf16.mxu0 %v4548_v43 }
 0x124   :  { %4875 = vset.pattern.permute.xlu1 %v7339_v27  ;;  %v5756_v8 = vsel %vm52_vm0, %v227_v38, %v5275_v32  ;;  %v5763_v40 = vsel %vm375_vm2, %v7381_v39, %v841_v35  ;;  %v5769_v1 = vsel %vm586_vm1, %v900_v37, %v901_v53  ;;  %v762_v32 = vadd.f32 %v5391_v63, %v5550_v60 }
 0x125   :  { %125 = vperm.xlu1 %4875, %v5088_v21   ;;  %v366_v27 = vrot.slane %v5756_v8, 7  ;;  %v579_v18 = vrot.slane %v5756_v8, 1  ;;  %v783_v21 = vmul.f32 0.2, %v763_v47  ;;  %4551 = vmatpush3.bf16.msra.mxu0 %v4548_v43 }
 0x126   :  { %v782_v62 = vmul.f32 0.2, %v762_v32 }
 0x127   :  { %v382_v37 = vsel %vm375_vm2, %v365_v25, %v366_v27  ;;  %v5787_v33 = vsel %vm586_vm1, %v578_v2, %v579_v18  ;;  %v803_v10 = vmax.f32 %v763_v47, %v783_v21  ;;  %v5799_v25 = vsel %vm52_vm0, %v5164_v41, 1.0 }
 0x128   :  { %v489_v60 = vmul.f32 %v5781_v56, %v382_v37  ;;  %v5791_v6 = vpop.permute.xlu1 %441  ;;  %7382 = vst [vmem:[#allocation33_spill] sm:$0xff] %v5799_v25  ;;  %v723_v21 = vmul.f32 %v5354_v49, %v698_v58 }
 0x129   :  { %135 = vperm.xlu1 %4875, %v5024_v13   ;;  %v487_v19 = vmul.f32 %v5791_v6, %v5630_v22  ;;  %v539_v13 = vmul.f32 %v5325_v23, %v5756_v8  ;;  %v963_v22 = vld [vmem:[%s7206_s3 + $0x30] sm:$0xff]  ;;  %v802_v8 = vmax.f32 %v762_v32, %v782_v62  ;;  %v823_v59 = vmul.f32 %v803_v10, %v5799_v25 }
 0x12a   :  { %v514_v2 = vmul.f32 %v5331_v0, %v489_v60  ;;  %v4552_v47 = vpack.c.bf16 %v964_v51, %v963_v22 }
 0x12b   :  { %v512_v24 = vmul.f32 %v5331_v0, %v487_v19  ;;  %v843_v32 = vrot.slane %v823_v59, 7  ;;  %v903_v60 = vrot.slane %v823_v59, 1 }
 0x12c   :  { %v5813_v41 = vadd.f32 %v539_v13, %v514_v2  ;;  %4553 = vmatprep.subr.bf16.mxu0 %v4552_v47  ;;  %v1424_v13 = vld [vmem:[%s7206_s3 + $0x80] sm:$0xff] }
 0x12d   :  { %150 = vperm.xlu1 %4875, %v4971_v5   ;;  %v557_v38 = vadd.f32 %v537_v30, %v512_v24  ;;  %v81_v39 = vpop.permute.xlu1 %80  ;;  %4555 = vmatpush3.bf16.msra.mxu0 %v4552_v47  ;;  %v5854_v47 = vpop.permute.xlu0 %453 }
 0x12e   :  { %v5820_v12 = vsel %vm52_vm0, %v81_v39, 1.0  ;;  %7386 = vst [vmem:[#allocation37_spill] sm:$0xff] %v5854_v47 }
 0x12f   :  { %7383 = vst [vmem:[#allocation34_spill] sm:$0xff] %v5820_v12  ;;  %v822_v55 = vmul.f32 %v802_v8, %v5820_v12  ;;  %v5823_v43 = vadd.f32 %v723_v21, %v557_v38 }
 0x131   :  { %v842_v37 = vrot.slane %v822_v55, 7  ;;  %v902_v5 = vrot.slane %v822_v55, 1  ;;  %4157 = vmatmul.mubr.msk.f32.gmra.mrb[4].mxu0 %vm973_vm3, %v822_v55 }
 0x132   :  { %4159 = vmatprep.mubr.msk.f32.mxu0 %vm973_vm3, %v823_v59  ;;  %v231_v19 = vpop.permute.xlu1 %230 }
 0x133   :  { %v5829_v58 = vsel %vm375_vm2, %v841_v35, %v842_v37  ;;  %v5833_v62 = vsel %vm375_vm2, %v842_v37, %v843_v32  ;;  %v5837_v10 = vsel %vm586_vm1, %v901_v53, %v902_v5  ;;  %v5841_v2 = vsel %vm586_vm1, %v902_v5, %v903_v60  ;;  %v1425_v35 = vld [vmem:[%s7206_s3 + $0x88] sm:$0xff] }
 0x134   :  { %7384 = vst [vmem:[#allocation35_spill] sm:$0xff] %v5837_v10  ;;  %7385 = vst [vmem:[#allocation36_spill] sm:$0xff] %v5841_v2  ;;  %v5849_v30 = vpack.c.bf16 %v1425_v35, %v1424_v13  ;;  %v538_v5 = vmul.f32 %v5325_v23, %v5711_v17 }
 0x136   :  { %4557 = vmatprep.subr.bf16.mxu0 %v5849_v30 }
 0x137   :  { %v311_v24 = vpop.permute.xlu1 %310 }
 0x138   :  { %v347_v22 = vsel %vm52_vm0, %v231_v19, %v311_v24 }
 0x139   :  { %v367_v53 = vrot.slane %v347_v22, 7  ;;  %v580_v51 = vrot.slane %v347_v22, 1  ;;  %v540_v37 = vmul.f32 %v5325_v23, %v347_v22 }
 0x13b   :  { %v381_v38 = vsel %vm375_vm2, %v366_v27, %v367_v53  ;;  %v592_v8 = vsel %vm586_vm1, %v579_v18, %v580_v51  ;;  %v764_v18 = vadd.f32 %v5391_v63, %v5523_v9 }
 0x13c   :  { %v490_v39 = vmul.f32 %v5854_v47, %v381_v38  ;;  %v5861_v59 = vpop.permute.xlu1 %445 }
 0x13d   :  { %v488_v21 = vmul.f32 %v5861_v59, %v5725_v28  ;;  %v784_v28 = vmul.f32 0.2, %v764_v18 }
 0x13e   :  { %v515_v55 = vmul.f32 %v5331_v0, %v490_v39 }
 0x13f   :  { %v513_v19 = vmul.f32 %v5331_v0, %v488_v21 }
 0x140   :  { %v560_v27 = vadd.f32 %v540_v37, %v515_v55  ;;  %v804_v55 = vmax.f32 %v764_v18, %v784_v28 }
 0x141   :  { %v558_v13 = vadd.f32 %v538_v5, %v513_v19  ;;  %v235_v35 = vpop.permute.xlu1 %234 }
 0x146   :  { %v315_v24 = vpop.permute.xlu1 %314 }
 0x147   :  { %v5874_v38 = vsel %vm52_vm0, %v235_v35, %v315_v24 }
 0x148   :  { %v7275_v39 = vrot.slane %v5874_v38, 7  ;;  %v581_v22 = vrot.slane %v5874_v38, 1 }
 0x14a   :  { %v591_v17 = vsel %vm586_vm1, %v580_v51, %v581_v22  ;;  %v380_v21 = vsel %vm375_vm2, %v367_v53, %v7275_v39 }
 0x14b   :  { %v701_v9 = vmul.f32 %v5301_v48, %v591_v17  ;;  %v91_v37 = vpop.permute.xlu1 %90 }
 0x14c   :  { %v5887_v5 = vsel %vm52_vm0, %v91_v37, 1.0 }
 0x14d   :  { %7387 = vst [vmem:[#allocation38_spill] sm:$0xff] %v5887_v5  ;;  %v824_v19 = vmul.f32 %v804_v55, %v5887_v5  ;;  %v726_v35 = vmul.f32 %v5354_v49, %v701_v9 }
 0x14f   :  { %v844_v24 = vrot.slane %v824_v19, 7  ;;  %v904_v25 = vrot.slane %v824_v19, 1  ;;  %4160 = vmatmul.mubr.msk.f32.gmra.mrb[6].mxu0 %vm973_vm3, %v824_v19  ;;  %v5892_v51 = vadd.f32 %v726_v35, %v560_v27  ;;  %v765_v27 = vadd.f32 %v5391_v63, %v5705_v61 }
 0x150   :  { %v5894_v54 = vpop.permute.xlu1 %656 }
 0x151   :  { %7388 = vst [vmem:[#allocation39_spill] sm:$0xff] %v5894_v54  ;;  %v699_v53 = vmul.f32 %v5894_v54, %v5787_v33  ;;  %v5900_v18 = vsel %vm375_vm2, %v843_v32, %v844_v24  ;;  %v5904_v28 = vsel %vm586_vm1, %v903_v60, %v904_v25  ;;  %v785_v19 = vmul.f32 0.2, %v765_v27 }
 0x152   :  { %7389 = vst [vmem:[#allocation40_spill] sm:$0xff] %v5904_v28  ;;  %v7407_v28 = vld [vmem:[#allocation15_spill] sm:$0xff] }
 0x153   :  { %v724_v17 = vmul.f32 %v5354_v49, %v699_v53  ;;  %v805_v35 = vmax.f32 %v765_v27, %v785_v19 }
 0x155   :  { %v319_v9 = vpop.permute.xlu1 %318  ;;  %v5907_v55 = vadd.f32 %v724_v17, %v558_v13 }
 0x156   :  { %v5919_v53 = vsel %vm52_vm0, %v5263_v29, %v319_v9  ;;  %v766_v9 = vadd.f32 %v5391_v63, %v5742_v20 }
 0x15a   :  { %v5911_v37 = vpop.permute.xlu1 %660 }
 0x15b   :  { %7390 = vst [vmem:[#allocation41_spill] sm:$0xff] %v5911_v37  ;;  %v700_v33 = vmul.f32 %v5911_v37, %v592_v8  ;;  %v7281_v8 = vrot.slane %v5919_v53, 1 }
 0x15d   :  { %v725_v32 = vmul.f32 %v5354_v49, %v700_v33  ;;  %v5928_v33 = vpop.permute.xlu0 %469  ;;  %v590_v19 = vsel %vm586_vm1, %v581_v22, %v7281_v8 }
 0x15e   :  { %7392 = vst [vmem:[#allocation43_spill] sm:$0xff] %v5928_v33 }
 0x15f   :  { %v96_v39 = vpop.permute.xlu1 %95  ;;  %v745_v60 = vadd.f32 %v725_v32, %v5813_v41  ;;  %v767_v41 = vadd.f32 %v5391_v63, %v5658_v36  ;;  %v702_v36 = vmul.f32 %v5306_v52, %v590_v19 }
 0x160   :  { %v5923_v13 = vsel %vm52_vm0, %v96_v39, 1.0 }
 0x161   :  { %7391 = vst [vmem:[#allocation42_spill] sm:$0xff] %v5923_v13  ;;  %v825_v61 = vmul.f32 %v805_v35, %v5923_v13  ;;  %v787_v32 = vmul.f32 0.2, %v767_v41  ;;  %v106_v13 = vpop.permute.xlu0 %105  ;;  %v727_v54 = vmul.f32 %v5354_v49, %v702_v36  ;;  %v768_v36 = vadd.f32 %v5391_v63, %v5823_v43  ;;  %v1893_v43 = vld [vmem:[%s7206_s3 + $0x118] sm:$0xff] }
 0x162   :  { %v5955_v48 = vsel %vm52_vm0, %v106_v13, 1.0 }
 0x163   :  { %v845_v17 = vrot.slane %v825_v61, 7  ;;  %v905_v5 = vrot.slane %v825_v61, 1  ;;  %4162 = vmatprep.mubr.msk.f32.mxu0 %vm973_vm3, %v825_v61  ;;  %v786_v61 = vmul.f32 0.2, %v766_v9  ;;  %v807_v20 = vmax.f32 %v767_v41, %v787_v32  ;;  %7395 = vst [vmem:[#allocation46_spill] sm:$0xff] %v5955_v48 }
 0x164   :  { %v243_v27 = vpop.permute.xlu1 %242 }
 0x165   :  { %v5934_v29 = vsel %vm375_vm2, %v844_v24, %v845_v17  ;;  %v5938_v39 = vsel %vm586_vm1, %v904_v25, %v905_v5  ;;  %v541_v25 = vmul.f32 %v5325_v23, %v5874_v38  ;;  %v806_v8 = vmax.f32 %v766_v9, %v786_v61  ;;  %v1890_v61 = vld [vmem:[%s7206_s3 + $0x100] sm:$0xff] }
 0x166   :  { %7393 = vst [vmem:[#allocation44_spill] sm:$0xff] %v5938_v39  ;;  %v5968_v41 = vmul.f32 %v807_v20, %v5955_v48 }
 0x16a   :  { %v5946_v35 = vpop.permute.xlu1 %457 }
 0x16b   :  { %7394 = vst [vmem:[#allocation45_spill] sm:$0xff] %v5946_v35  ;;  %v491_v24 = vmul.f32 %v5946_v35, %v380_v21 }
 0x16d   :  { %v516_v12 = vmul.f32 %v5331_v0, %v491_v24 }
 0x16f   :  { %v561_v22 = vadd.f32 %v541_v25, %v516_v12  ;;  %v101_v37 = vpop.permute.xlu1 %100  ;;  %v788_v25 = vmul.f32 0.2, %v768_v36 }
 0x170   :  { %v5960_v21 = vsel %vm52_vm0, %v101_v37, 1.0 }
 0x171   :  { %7396 = vst [vmem:[#allocation47_spill] sm:$0xff] %v5960_v21  ;;  %v5963_v19 = vmul.f32 %v806_v8, %v5960_v21  ;;  %v5965_v52 = vadd.f32 %v727_v54, %v561_v22 }
 0x173   :  { %v7289_v13 = vrot.slane %v5963_v19, 7  ;;  %v7288_v12 = vrot.slane %v5963_v19, 1  ;;  %4163 = vmatmul.mubr.msk.f32.gmra.mrb[8].mxu0 %vm973_vm3, %v5963_v19 }
 0x174   :  { %4165 = vmatprep.mubr.msk.f32.mxu0 %vm973_vm3, %v5968_v41  ;;  %v247_v37 = vpop.permute.xlu1 %246 }
 0x175   :  { %v5980_v54 = vsel %vm375_vm2, %v845_v17, %v7289_v13  ;;  %v5986_v8 = vsel %vm586_vm1, %v905_v5, %v7288_v12  ;;  %v1891_v17 = vld [vmem:[%s7206_s3 + $0x108] sm:$0xff]  ;;  %v1892_v5 = vld [vmem:[%s7206_s3 + $0x110] sm:$0xff]  ;;  %v350_v12 = vsel %vm52_vm0, %v243_v27, %v5280_v34  ;;  %v808_v13 = vmax.f32 %v768_v36, %v788_v25 }
 0x176   :  { %7397 = vst [vmem:[#allocation48_spill] sm:$0xff] %v5986_v8  ;;  %v4572_v20 = vpack.c.bf16 %v1891_v17, %v1890_v61  ;;  %v4576_v22 = vpack.c.bf16 %v1893_v43, %v1892_v5  ;;  %v770_v61 = vadd.f32 %v5391_v63, %v745_v60  ;;  %v369_v5 = vrot.slane %v5919_v53, 7 }
 0x177   :  { %v370_v43 = vrot.slane %v350_v12, 7  ;;  %v583_v60 = vrot.slane %v350_v12, 1  ;;  %v543_v39 = vmul.f32 %v5325_v23, %v350_v12  ;;  %v772_v12 = vadd.f32 %v5391_v63, %v5965_v52 }
 0x178   :  { %4573 = vmatprep.subr.bf16.mxu1 %v4572_v20 }
 0x179   :  { %v327_v9 = vpop.permute.xlu1 %326  ;;  %4575 = vmatpush3.bf16.msra.mxu1 %v4572_v20  ;;  %v378_v25 = vsel %vm375_vm2, %v369_v5, %v370_v43 }
 0x17a   :  { %4577 = vmatprep.subr.bf16.mxu1 %v4576_v22  ;;  %v6020_v20 = vsel %vm52_vm0, %v247_v37, %v327_v9  ;;  %v769_v37 = vadd.f32 %v5391_v63, %v5907_v55  ;;  %v121_v9 = vpop.permute.xlu0 %120 }
 0x17b   :  { %v371_v27 = vrot.slane %v6020_v20, 7  ;;  %v7403_v46 = vrot.slane %v6020_v20, 1 }
 0x17d   :  { %4579 = vmatpush3.bf16.msra.mxu1 %v4576_v22 }
 0x17e   :  { %v5988_v32 = vpop.permute.xlu1 %461 }
 0x17f   :  { %7398 = vst [vmem:[#allocation49_spill] sm:$0xff] %v5988_v32 }
 0x182   :  { %v5992_v24 = vpop.permute.xlu1 %465 }
 0x183   :  { %7399 = vst [vmem:[#allocation50_spill] sm:$0xff] %v5992_v24 }
 0x187   :  { %v111_v48 = vpop.permute.xlu1 %110 }
 0x188   :  { %v6011_v21 = vsel %vm52_vm0, %v111_v48, 1.0  ;;  %v790_v48 = vmul.f32 0.2, %v770_v61 }
 0x189   :  { %7400 = vst [vmem:[#allocation51_spill] sm:$0xff] %v6011_v21  ;;  %v6015_v17 = vmul.f32 %v808_v13, %v6011_v21  ;;  %v7402_v13 = vrot.slane %v5874_v38, 7  ;;  %v493_v21 = vmul.f32 %v5992_v24, %v378_v25  ;;  %v588_v38 = vsel %vm586_vm1, %v583_v60, %v7403_v46 }
 0x18a   :  { %v810_v44 = vmax.f32 %v770_v61, %v790_v48  ;;  %v789_v48 = vmul.f32 0.2, %v769_v37  ;;  %v542_v46 = vmul.f32 %v5325_v23, %v5919_v53 }
 0x18b   :  { %4166 = vmatmul.mubr.msk.f32.gmra.mrb[10].mxu0 %vm973_vm3, %v6015_v17  ;;  %v379_v36 = vsel %vm375_vm2, %v7402_v13, %v369_v5  ;;  %v7405_v5 = vrot.slane %v5919_v53, 1  ;;  %v518_v8 = vmul.f32 %v5331_v0, %v493_v21  ;;  %v377_v21 = vsel %vm375_vm2, %v370_v43, %v371_v27 }
 0x18c   :  { %v6024_v34 = vpop.permute.xlu1 %473  ;;  %v492_v22 = vmul.f32 %v5988_v32, %v379_v36  ;;  %v6050_v36 = vsel %vm52_vm0, %v121_v9, 1.0  ;;  %v809_v53 = vmax.f32 %v769_v37, %v789_v48  ;;  %v7302_v52 = vrot.slane %v6015_v17, 7 }
 0x18d   :  { %7401 = vst [vmem:[#allocation52_spill] sm:$0xff] %v6024_v34  ;;  %v589_v55 = vsel %vm586_vm1, %v7405_v5, %v583_v60  ;;  %7406 = vst [vmem:[#allocation54_spill] sm:$0xff] %v6050_v36  ;;  %v6060_v60 = vmul.f32 %v810_v44, %v6050_v36  ;;  %v7408_v5 = vld [vmem:[#allocation2_spill] sm:$0xff]  ;;  %v563_v44 = vadd.f32 %v543_v39, %v518_v8 }
 0x18e   :  { %v517_v25 = vmul.f32 %v5331_v0, %v492_v22  ;;  %v703_v14 = vmul.f32 %v7407_v28, %v589_v55  ;;  %v7409_v9 = vrot.slane %v7408_v5, 7  ;;  %v7417_v28 = vrot.slane %v6020_v20, 1 }
 0x18f   :  { %v7306_v43 = vrot.slane %v6060_v60, 7 }
 0x190   :  { %v562_v55 = vadd.f32 %v542_v46, %v517_v25  ;;  %v728_v48 = vmul.f32 %v5354_v49, %v703_v14  ;;  %v792_v46 = vmul.f32 0.2, %v772_v12  ;;  %v131_v14 = vpop.permute.xlu0 %130 }
 0x191   :  { %v6042_v13 = vpop.permute.xlu1 %676 }
 0x192   :  { %7404 = vst [vmem:[#allocation53_spill] sm:$0xff] %v6042_v13  ;;  %v704_v61 = vmul.f32 %v6042_v13, %v588_v38  ;;  %v376_v38 = vsel %vm375_vm2, %v371_v27, %v7409_v9  ;;  %v545_v9 = vmul.f32 %v5325_v23, %v7408_v5  ;;  %v494_v27 = vmul.f32 %v5928_v33, %v377_v21 }
 0x193   :  { %v495_v22 = vmul.f32 %v6024_v34, %v376_v38 }
 0x194   :  { %v729_v13 = vmul.f32 %v5354_v49, %v704_v61 }
 0x195   :  { %v520_v39 = vmul.f32 %v5331_v0, %v495_v22  ;;  %v771_v22 = vadd.f32 %v5391_v63, %v5892_v51 }
 0x196   :  { %v116_v2 = vpop.permute.xlu1 %115  ;;  %v749_v37 = vadd.f32 %v729_v13, %v563_v44  ;;  %v748_v13 = vadd.f32 %v728_v48, %v562_v55  ;;  %v7413_v48 = vrot.slane %v6015_v17, 1 }
 0x197   :  { %v6074_v36 = vsel %vm52_vm0, %v116_v2, 1.0  ;;  %v910_v2 = vrot.slane %v6060_v60, 1 }
 0x198   :  { %7410 = vst [vmem:[#allocation2_spill] sm:$0xff] %v6074_v36  ;;  %v829_v61 = vmul.f32 %v809_v53, %v6074_v36  ;;  %v7412_v53 = vld [vmem:[#allocation3_spill] sm:$0xff]  ;;  %v774_v55 = vadd.f32 %v5391_v63, %v749_v37  ;;  %v565_v36 = vadd.f32 %v545_v9, %v520_v39  ;;  %v812_v37 = vmax.f32 %v772_v12, %v792_v46  ;;  %v141_v46 = vpop.permute.xlu0 %140 }
 0x19a   :  { %v849_v8 = vrot.slane %v829_v61, 7  ;;  %v909_v25 = vrot.slane %v829_v61, 1  ;;  %4168 = vmatprep.mubr.msk.f32.mxu0 %vm973_vm3, %v829_v61 }
 0x19b   :  { %4169 = vmatmul.mubr.msk.f32.gmra.mrb[12].mxu0 %vm973_vm3, %v6060_v60  ;;  %v6089_v21 = vpop.permute.xlu1 %684 }
 0x19c   :  { %7411 = vst [vmem:[#allocation55_spill] sm:$0xff] %v6089_v21  ;;  %v706_v44 = vmul.f32 %v6089_v21, %v7412_v53  ;;  %v6099_v61 = vsel %vm375_vm2, %v7302_v52, %v849_v8  ;;  %v6105_v38 = vsel %vm375_vm2, %v849_v8, %v7306_v43  ;;  %v6112_v53 = vsel %vm586_vm1, %v7413_v48, %v909_v25 }
 0x19d   :  { %7414 = vst [vmem:[#allocation3_spill] sm:$0xff] %v6112_v53  ;;  %v6116_v51 = vsel %vm586_vm1, %v909_v25, %v910_v2  ;;  %v519_v52 = vmul.f32 %v5331_v0, %v494_v27  ;;  %v6122_v8 = vsel %vm52_vm0, %v131_v14, 1.0  ;;  %v7416_v43 = vrot.slane %v7408_v5, 1 }
 0x19e   :  { %7415 = vst [vmem:[#allocation56_spill] sm:$0xff] %v6116_v51  ;;  %v731_v21 = vmul.f32 %v5354_v49, %v706_v44  ;;  %v773_v25 = vadd.f32 %v5391_v63, %v748_v13  ;;  %v544_v0 = vmul.f32 %v5325_v23, %v6020_v20  ;;  %v791_v27 = vmul.f32 0.2, %v771_v22 }
 0x19f   :  { %v587_v48 = vsel %vm586_vm1, %v7417_v28, %v7416_v43  ;;  %v6130_v53 = vpop.permute.xlu1 %680  ;;  %v794_v14 = vmul.f32 0.2, %v774_v55  ;;  %v832_v44 = vmul.f32 %v812_v37, %v6122_v8  ;;  %v6145_v20 = vsel %vm52_vm0, %v141_v46, 1.0  ;;  %v146_v37 = vpop.permute.xlu0 %145 }
 0x1a0   :  { %7418 = vst [vmem:[#allocation57_spill] sm:$0xff] %v6130_v53  ;;  %v705_v9 = vmul.f32 %v6130_v53, %v587_v48  ;;  %v751_v39 = vadd.f32 %v731_v21, %v565_v36  ;;  %v564_v12 = vadd.f32 %v544_v0, %v519_v52  ;;  %v793_v51 = vmul.f32 0.2, %v773_v25 }
 0x1a1   :  { %v811_v43 = vmax.f32 %v771_v22, %v791_v27  ;;  %v814_v50 = vmax.f32 %v774_v55, %v794_v14  ;;  %v852_v52 = vrot.slane %v832_v44, 7 }
 0x1a2   :  { %v730_v5 = vmul.f32 %v5354_v49, %v705_v9  ;;  %v776_v13 = vadd.f32 %v5391_v63, %v751_v39  ;;  %v813_v21 = vmax.f32 %v773_v25, %v793_v51  ;;  %v7419_v25 = vrot.slane %v6060_v60, 7 }
 0x1a3   :  { %v6151_v27 = vmul.f32 %v814_v50, %v6145_v20 }
 0x1a4   :  { %v750_v28 = vadd.f32 %v730_v5, %v564_v12  ;;  %v126_v10 = vpop.permute.xlu1 %125  ;;  %v796_v0 = vmul.f32 0.2, %v776_v13  ;;  %v6173_v12 = vsel %vm52_vm0, %v146_v37, 1.0 }
 0x1a5   :  { %v6141_v23 = vsel %vm52_vm0, %v126_v10, 1.0  ;;  %v912_v10 = vrot.slane %v832_v44, 1  ;;  %7420 = vst [vmem:[#allocation58_spill] sm:$0xff] %v6173_v12 }
 0x1a6   :  { %v775_v36 = vadd.f32 %v5391_v63, %v750_v28  ;;  %v831_v49 = vmul.f32 %v811_v43, %v6141_v23  ;;  %v816_v28 = vmax.f32 %v776_v13, %v796_v0 }
 0x1a8   :  { %v851_v22 = vrot.slane %v831_v49, 7  ;;  %v911_v48 = vrot.slane %v831_v49, 1  ;;  %4171 = vmatprep.mubr.msk.f32.mxu0 %vm973_vm3, %v831_v49  ;;  %v136_v55 = vpop.permute.xlu1 %135  ;;  %v795_v9 = vmul.f32 0.2, %v775_v36  ;;  %v914_v49 = vrot.slane %v6151_v27, 1 }
 0x1a9   :  { %v6155_v39 = vsel %vm52_vm0, %v136_v55, 1.0  ;;  %4172 = vmatmul.mubr.msk.f32.gmra.mrb[14].mxu0 %vm973_vm3, %v832_v44 }
 0x1aa   :  { %v6159_v63 = vmul.f32 %v813_v21, %v6155_v39  ;;  %v815_v51 = vmax.f32 %v775_v36, %v795_v9  ;;  %v6165_v14 = vsel %vm375_vm2, %v7419_v25, %v851_v22  ;;  %v6169_v50 = vsel %vm375_vm2, %v851_v22, %v852_v52  ;;  %v1426_v9 = vld [vmem:[%s7206_s3 + $0x90] sm:$0xff] }
 0x1ab   :  { %v6177_v46 = vsel %vm586_vm1, %v910_v2, %v911_v48  ;;  %v6181_v5 = vsel %vm586_vm1, %v911_v48, %v912_v10 }
 0x1ac   :  { %v7309_v60 = vrot.slane %v6159_v63, 7  ;;  %v913_v44 = vrot.slane %v6159_v63, 1  ;;  %4174 = vmatprep.mubr.msk.f32.mxu0 %vm973_vm3, %v6159_v63  ;;  %v151_v43 = vpop.permute.xlu1 %150  ;;  %v6188_v36 = vmul.f32 %v815_v51, %v6173_v12  ;;  %v7422_v51 = vrot.slane %v5476_v11, 7 }
 0x1ad   :  { %v6193_v2 = vsel %vm52_vm0, %v151_v43, 1.0  ;;  %4175 = vmatmul.mubr.msk.f32.gmra.mrb[16].mxu0 %vm973_vm3, %v6151_v27  ;;  %v7423_v43 = vld [vmem:[#allocation17_spill] sm:$0xff] }
 0x1ae   :  { %7421 = vst [vmem:[#allocation59_spill] sm:$0xff] %v6193_v2  ;;  %v836_v21 = vmul.f32 %v816_v28, %v6193_v2  ;;  %v915_v37 = vrot.slane %v6188_v36, 1  ;;  %4177 = vmatprep.mubr.msk.f32.mxu0 %vm973_vm3, %v6188_v36  ;;  %v6205_v13 = vsel %vm375_vm2, %v852_v52, %v7309_v60  ;;  %v6209_v42 = vsel %vm586_vm1, %v912_v10, %v913_v44  ;;  %v1427_v52 = vld [vmem:[%s7206_s3 + $0x98] sm:$0xff]  ;;  %v7425_v60 = vld [vmem:[#allocation18_spill] sm:$0xff] }
 0x1af   :  { %v6213_v22 = vsel %vm586_vm1, %v913_v44, %v914_v49  ;;  %v855_v0 = vrot.slane %v6188_v36, 7  ;;  %v878_v12 = vmul.f32 %v5542_v15, %v7425_v60  ;;  %v4560_v2 = vpack.c.bf16 %v1427_v52, %v1426_v9  ;;  %v1430_v9 = vld [vmem:[%s7206_s3 + $0xb0] sm:$0xff] }
 0x1b0   :  { %v856_v48 = vrot.slane %v836_v21, 7  ;;  %v916_v55 = vrot.slane %v836_v21, 1  ;;  %v6225_v10 = vsel %vm586_vm1, %v914_v49, %v915_v37  ;;  %v880_v15 = vmul.f32 %v5686_v16, %v5443_v31 }
 0x1b1   :  { %4178 = vmatmul.mubr.msk.f32.gmra.mrb[18].mxu0 %vm973_vm3, %v836_v21  ;;  %v7424_v21 = vrot.slane %v5476_v11, 1  ;;  %v1429_v11 = vld [vmem:[%s7206_s3 + $0xa8] sm:$0xff] }
 0x1b2   :  { %v876_v25 = vsel %vm375_vm2, %v856_v48, %v7422_v51  ;;  %v857_v44 = vsel %vm375_vm2, %v855_v0, %v856_v48  ;;  %v6235_v28 = vsel %vm586_vm1, %v915_v37, %v916_v55  ;;  %v7426_v51 = vld [vmem:[#allocation19_spill] sm:$0xff]  ;;  %v1428_v37 = vld [vmem:[%s7206_s3 + $0xa0] sm:$0xff] }
 0x1b3   :  { %v877_v36 = vmul.f32 %v876_v25, %v7423_v43  ;;  %v6242_v49 = vsel %vm586_vm1, %v916_v55, %v7424_v21  ;;  %v879_v48 = vmul.f32 %v5570_v57, %v7426_v51  ;;  %v4564_v55 = vpack.c.bf16 %v1429_v11, %v1428_v37  ;;  %v7431_v11 = vld [vmem:[#allocation28_spill] sm:$0xff] }
 0x1b4   :  { %v881_v57 = vmul.f32 %v5763_v40, %v5483_v3  ;;  %v883_v40 = vmul.f32 %v5833_v62, %v5531_v26  ;;  %v847_v25 = vrot.slane %v5968_v41, 7 }
 0x1b5   :  { %4196 = vmatprep.mubr.msk.f32.mxu0 %vm973_vm3, %v877_v36  ;;  %v7428_v36 = vld [vmem:[#allocation21_spill] sm:$0xff] }
 0x1b6   :  { %4197 = vmatmul.mubr.msk.f32.vlgmr.msra.gmra.mrb[0].mxu0 %vm973_vm3, %v878_v12  ;;  %v1431_v12 = vld [vmem:[%s7206_s3 + $0xb8] sm:$0xff]  ;;  %v884_v21 = vmul.f32 %v5900_v18, %v7428_v36  ;;  %v7432_v18 = vrot.slane %v6015_v17, 7 }
 0x1b7   :  { %4199 = vmatprep.mubr.msk.f32.mxu0 %vm973_vm3, %v879_v48  ;;  %4559 = vmatpush3.bf16.msra.mxu0 %v5849_v30  ;;  %v7427_v30 = vld [vmem:[#allocation24_spill] sm:$0xff]  ;;  %v4568_v52 = vpack.c.bf16 %v1431_v12, %v1430_v9  ;;  %v7430_v48 = vld [vmem:[#allocation27_spill] sm:$0xff]  ;;  %v891_v9 = vmul.f32 %v6165_v14, %v5854_v47  ;;  %v854_v12 = vrot.slane %v6151_v27, 7 }
 0x1b8   :  { %4561 = vmatprep.subr.bf16.mxu0 %v4560_v2  ;;  %v882_v16 = vmul.f32 %v5829_v58, %v7427_v30  ;;  %v7429_v58 = vrot.slane %v5963_v19, 7  ;;  %v886_v37 = vmul.f32 %v5980_v54, %v7430_v48  ;;  %v890_v54 = vmul.f32 %v6105_v38, %v5781_v56  ;;  %v7483_v47 = vld [vmem:[#allocation59_spill] sm:$0xff] }
 0x1b9   :  { %v858_v14 = vsel %vm375_vm2, %v854_v12, %v855_v0  ;;  %v7436_v0 = vld [vmem:[#allocation5_spill] sm:$0xff] }
 0x1ba   :  { %4200 = vmatmul.mubr.msk.f32.gmra.mrb[2].mxu0 %vm973_vm3, %v880_v15  ;;  %v866_v62 = vsel %vm375_vm2, %v7429_v58, %v847_v25  ;;  %v7438_v58 = vld [vmem:[#allocation6_spill] sm:$0xff] }
 0x1bb   :  { %4202 = vmatprep.mubr.msk.f32.mxu0 %vm973_vm3, %v881_v57  ;;  %4563 = vmatpush3.bf16.msra.mxu0 %v4560_v2  ;;  %v885_v2 = vmul.f32 %v5934_v29, %v5590_v4  ;;  %v887_v15 = vmul.f32 %v866_v62, %v7431_v11  ;;  %v865_v29 = vsel %vm375_vm2, %v847_v25, %v7432_v18  ;;  %v7441_v18 = vld [vmem:[#allocation35_spill] sm:$0xff] }
 0x1bc   :  { %4565 = vmatprep.subr.bf16.mxu0 %v4564_v55  ;;  %v889_v57 = vmul.f32 %v6099_v61, %v5861_v59  ;;  %v893_v61 = vmul.f32 %v6205_v13, %v5988_v32  ;;  %v7435_v13 = vld [vmem:[#allocation25_spill] sm:$0xff]  ;;  %v939_v62 = vmul.f32 %v5694_v7, %v7438_v58 }
 0x1be   :  { %4203 = vmatmul.mubr.msk.f32.gmra.mrb[4].mxu0 %vm973_vm3, %v882_v16  ;;  %v892_v16 = vmul.f32 %v6169_v50, %v5946_v35  ;;  %v7434_v50 = vld [vmem:[#allocation4_spill] sm:$0xff] }
 0x1bf   :  { %4205 = vmatprep.mubr.msk.f32.mxu0 %vm973_vm3, %v883_v40  ;;  %4567 = vmatpush3.bf16.msra.mxu0 %v4564_v55  ;;  %v888_v55 = vmul.f32 %v865_v29, %v5791_v6  ;;  %v895_v40 = vmul.f32 %v858_v14, %v5928_v33  ;;  %v937_v25 = vmul.f32 %v7435_v13, %v7434_v50  ;;  %v7449_v14 = vld [vmem:[#allocation48_spill] sm:$0xff]  ;;  %v7451_v13 = vrot.slane %v6015_v17, 1  ;;  %v7458_v17 = vld [vmem:[#allocation41_spill] sm:$0xff] }
 0x1c0   :  { %4569 = vmatprep.subr.bf16.mxu0 %v4568_v52 }
 0x1c2   :  { %4206 = vmatmul.mubr.msk.f32.gmra.mrb[6].mxu0 %vm973_vm3, %v884_v21  ;;  %v7437_v21 = vld [vmem:[#allocation26_spill] sm:$0xff] }
 0x1c3   :  { %4208 = vmatprep.mubr.msk.f32.mxu0 %vm973_vm3, %v885_v2  ;;  %4571 = vmatpush3.bf16.msra.mxu0 %v4568_v52  ;;  %v7433_v52 = vrot.slane %v6159_v63, 7  ;;  %v896_v63 = vmul.f32 %v857_v44, %v6024_v34  ;;  %v938_v2 = vmul.f32 %v7437_v21, %v7436_v0  ;;  %v7478_v0 = vld [vmem:[#allocation51_spill] sm:$0xff] }
 0x1c5   :  { %v859_v38 = vsel %vm375_vm2, %v7433_v52, %v854_v12  ;;  %v7445_v12 = vld [vmem:[#allocation40_spill] sm:$0xff] }
 0x1c6   :  { %4209 = vmatmul.mubr.msk.f32.gmra.mrb[8].mxu0 %vm973_vm3, %v886_v37  ;;  %v894_v27 = vmul.f32 %v859_v38, %v5992_v24  ;;  %v7439_v37 = vld [vmem:[#allocation8_spill] sm:$0xff]  ;;  %v7448_v38 = vld [vmem:[#allocation30_spill] sm:$0xff] }
 0x1c7   :  { %4211 = vmatprep.mubr.msk.f32.mxu0 %vm973_vm3, %v887_v15  ;;  %v940_v44 = vmul.f32 %v5769_v1, %v7439_v37  ;;  %v7440_v15 = vld [vmem:[#allocation13_spill] sm:$0xff] }
 0x1c8   :  { %v941_v29 = vmul.f32 %v7441_v18, %v7440_v15  ;;  %v7446_v1 = vld [vmem:[#allocation9_spill] sm:$0xff] }
 0x1ca   :  { %4212 = vmatmul.mubr.msk.f32.gmra.mrb[10].mxu0 %vm973_vm3, %v888_v55  ;;  %v7442_v55 = vld [vmem:[#allocation16_spill] sm:$0xff] }
 0x1cb   :  { %4214 = vmatprep.mubr.msk.f32.mxu0 %vm973_vm3, %v889_v57  ;;  %v7443_v57 = vld [vmem:[#allocation36_spill] sm:$0xff] }
 0x1ce   :  { %4215 = vmatmul.mubr.msk.f32.gmra.mrb[12].mxu0 %vm973_vm3, %v890_v54  ;;  %v942_v54 = vmul.f32 %v7443_v57, %v7442_v55  ;;  %v7457_v57 = vld [vmem:[#allocation56_spill] sm:$0xff] }
 0x1cf   :  { %4217 = vmatprep.mubr.msk.f32.mxu0 %vm973_vm3, %v891_v9  ;;  %v7444_v9 = vld [vmem:[#allocation7_spill] sm:$0xff] }
 0x1d0   :  { %v943_v7 = vmul.f32 %v7445_v12, %v7444_v9  ;;  %v950_v12 = vmul.f32 %v6177_v46, %v7458_v17 }
 0x1d2   :  { %4218 = vmatmul.mubr.msk.f32.gmra.mrb[14].mxu0 %vm973_vm3, %v892_v16  ;;  %v907_v16 = vrot.slane %v5968_v41, 1 }
 0x1d3   :  { %4220 = vmatprep.mubr.msk.f32.mxu0 %vm973_vm3, %v893_v61  ;;  %v7447_v61 = vld [vmem:[#allocation44_spill] sm:$0xff] }
 0x1d4   :  { %v944_v52 = vmul.f32 %v7447_v61, %v7446_v1  ;;  %v925_v41 = vsel %vm586_vm1, %v907_v16, %v7451_v13  ;;  %v7460_v61 = vld [vmem:[#allocation14_spill] sm:$0xff] }
 0x1d6   :  { %4221 = vmatmul.mubr.msk.f32.gmra.mrb[16].mxu0 %vm973_vm3, %v894_v27  ;;  %v945_v27 = vmul.f32 %v7449_v14, %v7448_v38  ;;  %v7461_v14 = vld [vmem:[#allocation15_spill] sm:$0xff] }
 0x1d7   :  { %4223 = vmatprep.mubr.msk.f32.mxu0 %vm973_vm3, %v895_v40  ;;  %v7450_v40 = vrot.slane %v5963_v19, 1  ;;  %v7454_v19 = vld [vmem:[#allocation11_spill] sm:$0xff] }
 0x1da   :  { %4224 = vmatmul.mubr.msk.f32.gmra.mrb[18].mxu0 %vm973_vm3, %v896_v63  ;;  %v926_v63 = vsel %vm586_vm1, %v7450_v40, %v907_v16  ;;  %v7462_v40 = vld [vmem:[#allocation53_spill] sm:$0xff] }
 0x1db   :  { %4242 = vmatprep.mubr.msk.f32.mxu0 %vm973_vm3, %v937_v25  ;;  %v7452_v25 = vld [vmem:[#allocation31_spill] sm:$0xff]  ;;  %v954_v46 = vmul.f32 %v6225_v10, %v7462_v40 }
 0x1dc   :  { %v946_v21 = vmul.f32 %v926_v63, %v7452_v25  ;;  %v7463_v63 = vld [vmem:[#allocation55_spill] sm:$0xff] }
 0x1dd   :  { %v1895_v10 = vld [vmem:[%s7206_s3 + $0x128] sm:$0xff] }
 0x1de   :  { %4243 = vmatmul.mubr.msk.f32.vlgmr.msra.gmra.mrb[0].mxu0 %vm973_vm3, %v938_v2  ;;  %v7453_v2 = vld [vmem:[#allocation10_spill] sm:$0xff] }
 0x1df   :  { %4245 = vmatprep.mubr.msk.f32.mxu0 %vm973_vm3, %v939_v62  ;;  %v947_v62 = vmul.f32 %v925_v41, %v7453_v2 }
 0x1e2   :  { %4246 = vmatmul.mubr.msk.f32.gmra.mrb[2].mxu0 %vm973_vm3, %v940_v44  ;;  %v7455_v44 = vld [vmem:[#allocation3_spill] sm:$0xff] }
 0x1e3   :  { %4248 = vmatprep.mubr.msk.f32.mxu0 %vm973_vm3, %v941_v29  ;;  %v948_v18 = vmul.f32 %v7455_v44, %v7454_v19  ;;  %v7456_v29 = vld [vmem:[#allocation39_spill] sm:$0xff] }
 0x1e6   :  { %4249 = vmatmul.mubr.msk.f32.gmra.mrb[4].mxu0 %vm973_vm3, %v942_v54  ;;  %v949_v54 = vmul.f32 %v7457_v57, %v7456_v29 }
 0x1e7   :  { %4251 = vmatprep.mubr.msk.f32.mxu0 %vm973_vm3, %v943_v7  ;;  %v7459_v7 = vld [vmem:[#allocation12_spill] sm:$0xff] }
 0x1e8   :  { %v951_v16 = vmul.f32 %v6181_v5, %v7459_v7  ;;  %v955_v5 = vmul.f32 %v6235_v28, %v6130_v53  ;;  %v1896_v28 = vld [vmem:[%s7206_s3 + $0x130] sm:$0xff] }
 0x1ea   :  { %4252 = vmatmul.mubr.msk.f32.gmra.mrb[6].mxu0 %vm973_vm3, %v944_v52  ;;  %v952_v52 = vmul.f32 %v6209_v42, %v7460_v61  ;;  %v956_v42 = vmul.f32 %v6242_v49, %v7463_v63  ;;  %v1897_v49 = vld [vmem:[%s7206_s3 + $0x138] sm:$0xff] }
 0x1eb   :  { %4254 = vmatprep.mubr.msk.f32.mxu0 %vm973_vm3, %v945_v27  ;;  %v953_v27 = vmul.f32 %v6213_v22, %v7461_v14  ;;  %v1894_v22 = vld [vmem:[%s7206_s3 + $0x120] sm:$0xff]  ;;  %v4584_v41 = vpack.c.bf16 %v1897_v49, %v1896_v28 }
 0x1ec   :  { %v4580_v13 = vpack.c.bf16 %v1895_v10, %v1894_v22  ;;  %v1884_v10 = vld [vmem:[%s7206_s3 + $0xd0] sm:$0xff] }
 0x1ee   :  { %4255 = vmatmul.mubr.msk.f32.gmra.mrb[8].mxu0 %vm973_vm3, %v946_v21  ;;  %4581 = vmatprep.subr.bf16.mxu1 %v4580_v13  ;;  %v1882_v21 = vld [vmem:[%s7206_s3 + $0xc0] sm:$0xff] }
 0x1ef   :  { %4257 = vmatprep.mubr.msk.f32.mxu0 %vm973_vm3, %v947_v62  ;;  %4583 = vmatpush3.bf16.msra.mxu1 %v4580_v13  ;;  %v1883_v62 = vld [vmem:[%s7206_s3 + $0xc8] sm:$0xff]  ;;  %v1885_v13 = vld [vmem:[%s7206_s3 + $0xd8] sm:$0xff] }
 0x1f0   :  { %4585 = vmatprep.subr.bf16.mxu1 %v4584_v41  ;;  %v4588_v44 = vpack.c.bf16 %v1883_v62, %v1882_v21 }
 0x1f2   :  { %4258 = vmatmul.mubr.msk.f32.gmra.mrb[10].mxu0 %vm973_vm3, %v948_v18  ;;  %v6414_v18 = vld [vmem:[%s7207_s2 + $0x4] ss:$0 sm:$0xff] }
 0x1f3   :  { %4260 = vmatprep.mubr.msk.f32.mxu0 %vm973_vm3, %v949_v54  ;;  %4587 = vmatpush3.bf16.msra.mxu1 %v4584_v41  ;;  %v7464_v41 = vld [vmem:[#allocation23_spill] sm:$0xff] }
 0x1f4   :  { %4589 = vmatprep.subr.bf16.mxu1 %v4588_v44 }
 0x1f6   :  { %4261 = vmatmul.mubr.msk.f32.gmra.mrb[12].mxu0 %vm973_vm3, %v950_v12 }
 0x1f7   :  { %4263 = vmatprep.mubr.msk.f32.mxu0 %vm973_vm3, %v951_v16 }
 0x1fa   :  { %4264 = vmatmul.mubr.msk.f32.gmra.mrb[14].mxu0 %vm973_vm3, %v952_v52 }
 0x1fb   :  { %4266 = vmatprep.mubr.msk.f32.mxu0 %vm973_vm3, %v953_v27 }
 0x1fe   :  { %4267 = vmatmul.mubr.msk.f32.gmra.mrb[16].mxu0 %vm973_vm3, %v954_v46 }
 0x1ff   :  { %4269 = vmatprep.mubr.msk.f32.mxu0 %vm973_vm3, %v955_v5 }
 0x202   :  { %4270 = vmatmul.mubr.msk.f32.gmra.mrb[18].mxu0 %vm973_vm3, %v956_v42 }
 0x2b1   :  { %v4244_v57 = vpop.f32.mrb[0].mxu0 }
 0x2b2   :  { %v1683_v54 = vadd.f32 %v4244_v57, %v6414_v18  ;;  %v1558_v12 = vpop.f32.mrb[1].mxu0 }
 0x2b3   :  { %v1682_v16 = vadd.f32 %v6414_v18, %v1558_v12 }
 0x2b4   :  { %v1703_v52 = vmul.f32 0.2, %v1683_v54 }
 0x2b5   :  { %v1702_v27 = vmul.f32 0.2, %v1682_v16  ;;  %v4247_v46 = vpop.f32.mrb[2].mxu0 }
 0x2b6   :  { %v1723_v5 = vmax.f32 %v1683_v54, %v1703_v52  ;;  %v1685_v42 = vadd.f32 %v4247_v46, %v6414_v18  ;;  %v1568_v22 = vpop.f32.mrb[3].mxu0  ;;  %v7465_v54 = vld [vmem:[#allocation20_spill] sm:$0xff]  ;;  %v4592_v46 = vpack.c.bf16 %v1885_v13, %v1884_v10  ;;  %v7466_v10 = vld [vmem:[#allocation29_spill] sm:$0xff] }
 0x2b7   :  { %v1722_v28 = vmax.f32 %v1682_v16, %v1702_v27  ;;  %v1684_v49 = vadd.f32 %v6414_v18, %v1568_v22  ;;  %v1886_v22 = vld [vmem:[%s7206_s3 + $0xe0] sm:$0xff] }
 0x2b8   :  { %v1743_v21 = vmul.f32 %v1723_v5, %v7464_v41  ;;  %v1705_v62 = vmul.f32 0.2, %v1685_v42 }
 0x2b9   :  { %v1704_v57 = vmul.f32 0.2, %v1684_v49  ;;  %v4250_v12 = vpop.f32.mrb[4].mxu0  ;;  %v6428_v52 = vmul.f32 %v1722_v28, %v7465_v54 }
 0x2ba   :  { %v1763_v63 = vrot.slane %v1743_v21, 7  ;;  %v1823_v53 = vrot.slane %v1743_v21, 1  ;;  %v1725_v40 = vmax.f32 %v1685_v42, %v1705_v62  ;;  %v1687_v14 = vadd.f32 %v4250_v12, %v6414_v18  ;;  %v1578_v61 = vpop.f32.mrb[5].mxu0  ;;  %v1887_v42 = vld [vmem:[%s7206_s3 + $0xe8] sm:$0xff] }
 0x2bb   :  { %v1724_v7 = vmax.f32 %v1684_v49, %v1704_v57  ;;  %v1686_v16 = vadd.f32 %v6414_v18, %v1578_v61  ;;  %v7313_v27 = vrot.slane %v6428_v52, 7  ;;  %v7314_v5 = vrot.slane %v6428_v52, 1  ;;  %4288 = vmatprep.mubr.msk.f32.mxu1 %vm973_vm3, %v6428_v52  ;;  %v7467_v61 = vld [vmem:[#allocation22_spill] sm:$0xff] }
 0x2bc   :  { %v6443_v13 = vmul.f32 %v1725_v40, %v7466_v10  ;;  %v1707_v28 = vmul.f32 0.2, %v1687_v14  ;;  %4289 = vmatmul.mubr.msk.f32.vlgmr.msra.gmra.mrb[0].mxu1 %vm973_vm3, %v1743_v21 }
 0x2bd   :  { %v6447_v49 = vmul.f32 %v1724_v7, %v7467_v61  ;;  %v1706_v41 = vmul.f32 0.2, %v1686_v16  ;;  %v6453_v62 = vsel %vm375_vm2, %v7313_v27, %v1763_v63  ;;  %v4253_v57 = vpop.f32.mrb[6].mxu0  ;;  %4591 = vmatpush3.bf16.msra.mxu1 %v4588_v44  ;;  %v6459_v40 = vsel %vm586_vm1, %v7314_v5, %v1823_v53  ;;  %v1888_v44 = vld [vmem:[%s7206_s3 + $0xf0] sm:$0xff] }
 0x2be   :  { %7468 = vst [vmem:[#allocation17_spill] sm:$0xff] %v6459_v40  ;;  %v1727_v12 = vmax.f32 %v1687_v14, %v1707_v28  ;;  %v1588_v21 = vpop.f32.mrb[7].mxu0  ;;  %4593 = vmatprep.subr.bf16.mxu1 %v4592_v46  ;;  %v4596_v7 = vpack.c.bf16 %v1887_v42, %v1886_v22  ;;  %v1689_v27 = vadd.f32 %v4253_v57, %v6414_v18  ;;  %v1889_v14 = vld [vmem:[%s7206_s3 + $0xf8] sm:$0xff]  ;;  %v1765_v22 = vrot.slane %v6443_v13, 7  ;;  %v7469_v42 = vld [vmem:[#allocation34_spill] sm:$0xff] }
 0x2bf   :  { %v1764_v54 = vrot.slane %v6447_v49, 7  ;;  %v1824_v10 = vrot.slane %v6447_v49, 1  ;;  %v1726_v61 = vmax.f32 %v1686_v16, %v1706_v41  ;;  %4291 = vmatprep.mubr.msk.f32.mxu1 %vm973_vm3, %v6447_v49  ;;  %v1688_v16 = vadd.f32 %v6414_v18, %v1588_v21  ;;  %v7471_v41 = vld [vmem:[#allocation32_spill] sm:$0xff] }
 0x2c0   :  { %v6474_v28 = vmul.f32 %v1727_v12, %v7469_v42  ;;  %4292 = vmatmul.mubr.msk.f32.gmra.mrb[2].mxu1 %vm973_vm3, %v6443_v13  ;;  %v1709_v5 = vmul.f32 0.2, %v1689_v27  ;;  %v4600_v21 = vpack.c.bf16 %v1889_v14, %v1888_v44  ;;  %v7472_v44 = vld [vmem:[#allocation38_spill] sm:$0xff] }
 0x2c1   :  { %v6481_v49 = vsel %vm586_vm1, %v1823_v53, %v1824_v10  ;;  %v6484_v57 = vmul.f32 %v1726_v61, %v7471_v41  ;;  %v4256_v17 = vpop.f32.mrb[8].mxu0  ;;  %4595 = vmatpush3.bf16.msra.mxu1 %v4592_v46  ;;  %v6488_v29 = vsel %vm375_vm2, %v1763_v63, %v1764_v54  ;;  %v1708_v12 = vmul.f32 0.2, %v1688_v16  ;;  %v2348_v63 = vld [vmem:[%s7206_s3 + $0x140] sm:$0xff]  ;;  %v7473_v61 = vld [vmem:[#allocation33_spill] sm:$0xff] }
 0x2c2   :  { %7470 = vst [vmem:[#allocation18_spill] sm:$0xff] %v6481_v49  ;;  %v1598_v42 = vpop.f32.mrb[9].mxu0  ;;  %4597 = vmatprep.subr.bf16.mxu1 %v4596_v7  ;;  %v1729_v2 = vmax.f32 %v1689_v27, %v1709_v5  ;;  %v1691_v53 = vadd.f32 %v4256_v17, %v6414_v18  ;;  %v2349_v27 = vld [vmem:[%s7206_s3 + $0x148] sm:$0xff]  ;;  %v6506_v17 = vsel %vm375_vm2, %v1764_v54, %v1765_v22  ;;  %v1767_v5 = vrot.slane %v6474_v28, 7 }
 0x2c3   :  { %v1766_v19 = vrot.slane %v6484_v57, 7  ;;  %4294 = vmatprep.mubr.msk.f32.mxu1 %vm973_vm3, %v6484_v57  ;;  %v1728_v41 = vmax.f32 %v1688_v16, %v1708_v12  ;;  %v1690_v46 = vadd.f32 %v6414_v18, %v1598_v42  ;;  %v1826_v32 = vrot.slane %v6484_v57, 1 }
 0x2c4   :  { %4295 = vmatmul.mubr.msk.f32.gmra.mrb[4].mxu1 %vm973_vm3, %v6474_v28  ;;  %v6510_v14 = vmul.f32 %v1729_v2, %v7472_v44  ;;  %v1711_v16 = vmul.f32 0.2, %v1691_v53  ;;  %v6521_v2 = vpack.c.bf16 %v2349_v27, %v2348_v63  ;;  %v7475_v27 = vrot.slane %v6443_v13, 1 }
 0x2c5   :  { %v4259_v12 = vpop.f32.mrb[10].mxu0  ;;  %4599 = vmatpush3.bf16.msra.mxu1 %v4596_v7  ;;  %v6514_v42 = vsel %vm375_vm2, %v1765_v22, %v1766_v19  ;;  %v6517_v25 = vmul.f32 %v1728_v41, %v7473_v61  ;;  %v1710_v38 = vmul.f32 0.2, %v1690_v46  ;;  %v7474_v61 = vld [vmem:[#allocation47_spill] sm:$0xff]  ;;  %v6534_v63 = vsel %vm375_vm2, %v1766_v19, %v1767_v5 }
 0x2c6   :  { %v1693_v1 = vadd.f32 %v4259_v12, %v6414_v18  ;;  %v1608_v54 = vpop.f32.mrb[11].mxu0  ;;  %4601 = vmatprep.subr.bf16.mxu1 %v4600_v21  ;;  %v1731_v9 = vmax.f32 %v1691_v53, %v1711_v16  ;;  %v1769_v44 = vrot.slane %v6510_v14, 7 }
 0x2c7   :  { %v1692_v55 = vadd.f32 %v6414_v18, %v1608_v54  ;;  %v1768_v7 = vrot.slane %v6517_v25, 7  ;;  %v1730_v15 = vmax.f32 %v1690_v46, %v1710_v38  ;;  %4297 = vmatprep.mubr.msk.f32.mxu1 %vm973_vm3, %v6517_v25  ;;  %v6540_v38 = vsel %vm586_vm1, %v1824_v10, %v7475_v27  ;;  %v7477_v46 = vld [vmem:[#allocation42_spill] sm:$0xff] }
 0x2c8   :  { %v1713_v22 = vmul.f32 0.2, %v1693_v1  ;;  %v6528_v41 = vmul.f32 %v1731_v9, %v7474_v61  ;;  %4298 = vmatmul.mubr.msk.f32.gmra.mrb[6].mxu1 %vm973_vm3, %v6510_v14  ;;  %7476 = vst [vmem:[#allocation19_spill] sm:$0xff] %v6540_v38 }
 0x2c9   :  { %v1712_v12 = vmul.f32 0.2, %v1692_v55  ;;  %v4262_v53 = vpop.f32.mrb[12].mxu0  ;;  %v6543_v16 = vmul.f32 %v1730_v15, %v7477_v46  ;;  %4603 = vmatpush3.bf16.msra.mxu1 %v4600_v21  ;;  %v7479_v15 = vld [vmem:[#allocation46_spill] sm:$0xff] }
 0x2ca   :  { %v1733_v9 = vmax.f32 %v1693_v1, %v1713_v22  ;;  %v1695_v54 = vadd.f32 %v4262_v53, %v6414_v18  ;;  %v1618_v61 = vpop.f32.mrb[13].mxu0  ;;  %4605 = vmatprep.subr.bf16.mxu1 %v6521_v2  ;;  %v1771_v19 = vrot.slane %v6528_v41, 7  ;;  %v6562_v22 = vsel %vm375_vm2, %v1767_v5, %v1768_v7  ;;  %v7480_v5 = vld [vmem:[#allocation54_spill] sm:$0xff] }
 0x2cb   :  { %v1732_v37 = vmax.f32 %v1692_v55, %v1712_v12  ;;  %v1694_v58 = vadd.f32 %v6414_v18, %v1618_v61  ;;  %v1770_v49 = vrot.slane %v6543_v16, 7  ;;  %4300 = vmatprep.mubr.msk.f32.mxu1 %vm973_vm3, %v6543_v16  ;;  %v1831_v57 = vrot.slane %v6528_v41, 1 }
 0x2cc   :  { %v6551_v10 = vmul.f32 %v1733_v9, %v7478_v0  ;;  %v1715_v27 = vmul.f32 0.2, %v1695_v54  ;;  %4301 = vmatmul.mubr.msk.f32.gmra.mrb[8].mxu1 %vm973_vm3, %v6528_v41  ;;  %v6566_v0 = vsel %vm375_vm2, %v1768_v7, %v1769_v44  ;;  %v7481_v7 = vld [vmem:[#allocation2_spill] sm:$0xff] }
 0x2cd   :  { %v6556_v1 = vmul.f32 %v1732_v37, %v7479_v15  ;;  %v1714_v21 = vmul.f32 0.2, %v1694_v58  ;;  %v4265_v55 = vpop.f32.mrb[14].mxu0 }
 0x2ce   :  { %v1735_v12 = vmax.f32 %v1695_v54, %v1715_v27  ;;  %v1697_v53 = vadd.f32 %v4265_v55, %v6414_v18  ;;  %v1628_v46 = vpop.f32.mrb[15].mxu0  ;;  %v1773_v61 = vrot.slane %v6551_v10, 7  ;;  %v6584_v27 = vsel %vm375_vm2, %v1769_v44, %v1770_v49 }
 0x2cf   :  { %v1734_v9 = vmax.f32 %v1694_v58, %v1714_v21  ;;  %v1696_v37 = vadd.f32 %v6414_v18, %v1628_v46  ;;  %4303 = vmatprep.mubr.msk.f32.mxu1 %vm973_vm3, %v6556_v1  ;;  %v1772_v15 = vrot.slane %v6556_v1, 7  ;;  %v6588_v21 = vsel %vm375_vm2, %v1770_v49, %v1771_v19 }
 0x2d0   :  { %v6575_v38 = vmul.f32 %v1735_v12, %v7480_v5  ;;  %v1717_v40 = vmul.f32 0.2, %v1697_v53  ;;  %4304 = vmatmul.mubr.msk.f32.gmra.mrb[10].mxu1 %vm973_vm3, %v6551_v10 }
 0x2d1   :  { %v6578_v50 = vmul.f32 %v1734_v9, %v7481_v7  ;;  %v1716_v54 = vmul.f32 0.2, %v1696_v37  ;;  %v4268_v58 = vpop.f32.mrb[16].mxu0 }
 0x2d2   :  { %v1737_v55 = vmax.f32 %v1697_v53, %v1717_v40  ;;  %v1699_v12 = vadd.f32 %v4268_v58, %v6414_v18  ;;  %v1638_v46 = vpop.f32.mrb[17].mxu0  ;;  %v1775_v7 = vrot.slane %v6575_v38, 7  ;;  %v1835_v41 = vrot.slane %v6575_v38, 1 }
 0x2d3   :  { %v1736_v5 = vmax.f32 %v1696_v37, %v1716_v54  ;;  %v1698_v9 = vadd.f32 %v6414_v18, %v1638_v46  ;;  %4306 = vmatprep.mubr.msk.f32.mxu1 %vm973_vm3, %v6578_v50  ;;  %v1774_v34 = vrot.slane %v6578_v50, 7  ;;  %v6606_v37 = vsel %vm375_vm2, %v1771_v19, %v1772_v15  ;;  %v2351_v19 = vld [vmem:[%s7206_s3 + $0x158] sm:$0xff] }
 0x2d4   :  { %v6597_v44 = vmul.f32 %v1737_v55, %v6122_v8  ;;  %v1719_v33 = vmul.f32 0.2, %v1699_v12  ;;  %4307 = vmatmul.mubr.msk.f32.gmra.mrb[12].mxu1 %vm973_vm3, %v6575_v38  ;;  %v6610_v54 = vsel %vm375_vm2, %v1772_v15, %v1773_v61 }
 0x2d5   :  { %v6600_v49 = vmul.f32 %v1736_v5, %v6141_v23  ;;  %v1718_v40 = vmul.f32 0.2, %v1698_v9  ;;  %v4271_v53 = vpop.f32.mrb[18].mxu0  ;;  %v2350_v5 = vld [vmem:[%s7206_s3 + $0x150] sm:$0xff] }
 0x2d6   :  { %v1739_v58 = vmax.f32 %v1699_v12, %v1719_v33  ;;  %v1701_v8 = vadd.f32 %v4271_v53, %v6414_v18  ;;  %v1648_v55 = vpop.f32.mrb[19].mxu0  ;;  %v1777_v15 = vrot.slane %v6597_v44, 7  ;;  %v6634_v53 = vsel %vm375_vm2, %v1773_v61, %v1774_v34 }
 0x2d7   :  { %v1738_v46 = vmax.f32 %v1698_v9, %v1718_v40  ;;  %v1700_v23 = vadd.f32 %v6414_v18, %v1648_v55  ;;  %4309 = vmatprep.mubr.msk.f32.mxu1 %vm973_vm3, %v6600_v49  ;;  %v1776_v33 = vrot.slane %v6600_v49, 7  ;;  %v6638_v55 = vsel %vm375_vm2, %v1774_v34, %v1775_v7 }
 0x2d8   :  { %v6625_v12 = vmul.f32 %v1739_v58, %v6145_v20  ;;  %v1721_v9 = vmul.f32 0.2, %v1701_v8  ;;  %4310 = vmatmul.mubr.msk.f32.gmra.mrb[14].mxu1 %vm973_vm3, %v6597_v44  ;;  %7482 = vst [vmem:[#allocation24_spill] sm:$0xff] %v6638_v55  ;;  %v1803_v20 = vmul.f32 %v6453_v62, %v7425_v60  ;;  %v1828_v34 = vrot.slane %v6517_v25, 1 }
 0x2d9   :  { %v6628_v18 = vmul.f32 %v1738_v46, %v6155_v39  ;;  %v1720_v40 = vmul.f32 0.2, %v1700_v23  ;;  %v6643_v39 = vpack.c.bf16 %v2351_v19, %v2350_v5  ;;  %v1827_v46 = vrot.slane %v6474_v28, 1 }
 0x2da   :  { %v1779_v58 = vrot.slane %v6625_v12, 7  ;;  %v1741_v24 = vmax.f32 %v1701_v8, %v1721_v9  ;;  %v6654_v60 = vsel %vm375_vm2, %v1775_v7, %v1776_v33  ;;  %v6658_v62 = vsel %vm375_vm2, %v1776_v33, %v1777_v15  ;;  %v7484_v8 = vld [vmem:[#allocation58_spill] sm:$0xff] }
 0x2db   :  { %v1778_v35 = vrot.slane %v6628_v18, 7  ;;  %v1740_v61 = vmax.f32 %v1700_v23, %v1720_v40  ;;  %4312 = vmatprep.mubr.msk.f32.mxu1 %vm973_vm3, %v6628_v18  ;;  %v1829_v28 = vrot.slane %v6510_v14, 1  ;;  %v1833_v25 = vrot.slane %v6551_v10, 1 }
 0x2dc   :  { %v1761_v55 = vmul.f32 %v1741_v24, %v7483_v47  ;;  %4313 = vmatmul.mubr.msk.f32.gmra.mrb[16].mxu1 %vm973_vm3, %v6625_v12  ;;  %v1830_v24 = vrot.slane %v6543_v16, 1  ;;  %v1832_v14 = vrot.slane %v6556_v1, 1  ;;  %v7485_v33 = vrot.slane %v6443_v13, 1 }
 0x2dd   :  { %v1760_v23 = vmul.f32 %v1740_v61, %v7484_v8  ;;  %v6667_v47 = vsel %vm375_vm2, %v1777_v15, %v1778_v35  ;;  %v6673_v5 = vsel %vm375_vm2, %v1778_v35, %v1779_v58  ;;  %v1834_v16 = vrot.slane %v6578_v50, 1 }
 0x2de   :  { %v1781_v7 = vrot.slane %v1761_v55, 7  ;;  %v6682_v15 = vsel %vm586_vm1, %v7485_v33, %v1826_v32  ;;  %v7486_v10 = vrot.slane %v6428_v52, 7  ;;  %v6691_v1 = vsel %vm586_vm1, %v1826_v32, %v1827_v46 }
 0x2df   :  { %v1780_v19 = vrot.slane %v1760_v23, 7  ;;  %4315 = vmatprep.mubr.msk.f32.mxu1 %vm973_vm3, %v1760_v23  ;;  %v6695_v38 = vsel %vm586_vm1, %v1827_v46, %v1828_v34  ;;  %v1836_v13 = vrot.slane %v6600_v49, 1  ;;  %v1837_v32 = vrot.slane %v6597_v44, 1 }
 0x2e0   :  { %v1801_v35 = vsel %vm375_vm2, %v1781_v7, %v7486_v10  ;;  %4316 = vmatmul.mubr.msk.f32.gmra.mrb[18].mxu1 %vm973_vm3, %v1761_v55  ;;  %v1839_v61 = vrot.slane %v6625_v12, 1  ;;  %v1838_v46 = vrot.slane %v6628_v18, 1  ;;  %v6713_v49 = vsel %vm586_vm1, %v1828_v34, %v1829_v28  ;;  %v7496_v10 = vld [vmem:[#allocation17_spill] sm:$0xff] }
 0x2e1   :  { %v1802_v9 = vmul.f32 %v1801_v35, %v7423_v43  ;;  %v6702_v50 = vsel %vm375_vm2, %v1779_v58, %v1780_v19  ;;  %v6706_v40 = vsel %vm375_vm2, %v1780_v19, %v1781_v7  ;;  %v1840_v8 = vrot.slane %v1760_v23, 1  ;;  %v2352_v43 = vld [vmem:[%s7206_s3 + $0x160] sm:$0xff]  ;;  %v2353_v58 = vld [vmem:[%s7206_s3 + $0x168] sm:$0xff]  ;;  %v7497_v35 = vld [vmem:[#allocation5_spill] sm:$0xff] }
 0x2e2   :  { %v6724_v44 = vsel %vm586_vm1, %v1829_v28, %v1830_v24  ;;  %v6728_v12 = vsel %vm586_vm1, %v1830_v24, %v1831_v57  ;;  %v6732_v18 = vsel %vm586_vm1, %v1831_v57, %v1832_v14  ;;  %v1804_v34 = vmul.f32 %v6488_v29, %v7426_v51 }
 0x2e3   :  { %4334 = vmatprep.mubr.msk.f32.mxu1 %vm973_vm3, %v1802_v9  ;;  %v6738_v23 = vsel %vm586_vm1, %v1832_v14, %v1833_v25  ;;  %v1841_v7 = vrot.slane %v1761_v55, 1  ;;  %v6743_v28 = vsel %vm586_vm1, %v1833_v25, %v1834_v16  ;;  %v6747_v24 = vsel %vm586_vm1, %v1834_v16, %v1835_v41  ;;  %v2355_v14 = vld [vmem:[%s7206_s3 + $0x178] sm:$0xff]  ;;  %v7499_v9 = vld [vmem:[#allocation6_spill] sm:$0xff] }
 0x2e4   :  { %4335 = vmatmul.mubr.msk.f32.vlgmr.msra.gmra.mrb[0].mxu1 %vm973_vm3, %v1803_v20  ;;  %v6751_v57 = vsel %vm586_vm1, %v1835_v41, %v1836_v13  ;;  %v1805_v51 = vmul.f32 %v6506_v17, %v5443_v31  ;;  %v4612_v29 = vpack.c.bf16 %v2353_v58, %v2352_v43  ;;  %v6760_v55 = vsel %vm586_vm1, %v1836_v13, %v1837_v32  ;;  %v2354_v17 = vld [vmem:[%s7206_s3 + $0x170] sm:$0xff]  ;;  %v7498_v13 = vld [vmem:[#allocation18_spill] sm:$0xff] }
 0x2e5   :  { %4337 = vmatprep.mubr.msk.f32.mxu1 %vm973_vm3, %v1804_v34  ;;  %4607 = vmatpush3.bf16.msra.mxu1 %v6521_v2  ;;  %v6764_v20 = vsel %vm586_vm1, %v1837_v32, %v1838_v46  ;;  %v6768_v25 = vsel %vm586_vm1, %v1838_v46, %v1839_v61  ;;  %v6772_v2 = vsel %vm586_vm1, %v1839_v61, %v1840_v8  ;;  %v7487_v19 = vrot.slane %v6428_v52, 1  ;;  %v7500_v32 = vld [vmem:[#allocation19_spill] sm:$0xff]  ;;  %v7501_v61 = vld [vmem:[#allocation8_spill] sm:$0xff]  ;;  %v7502_v46 = vld [vmem:[#allocation13_spill] sm:$0xff] }
 0x2e6   :  { %4609 = vmatprep.subr.bf16.mxu1 %v6643_v39  ;;  %v1806_v31 = vmul.f32 %v6514_v42, %v5483_v3  ;;  %v6785_v41 = vsel %vm586_vm1, %v1840_v8, %v1841_v7  ;;  %v1807_v3 = vmul.f32 %v6534_v63, %v7427_v30  ;;  %v4616_v42 = vpack.c.bf16 %v2355_v14, %v2354_v17  ;;  %v7488_v63 = vld [vmem:[#allocation24_spill] sm:$0xff]  ;;  %v7504_v34 = vld [vmem:[#allocation7_spill] sm:$0xff]  ;;  %v7508_v17 = vld [vmem:[#allocation10_spill] sm:$0xff] }
 0x2e7   :  { %v6791_v33 = vsel %vm586_vm1, %v1841_v7, %v7487_v19  ;;  %v1808_v16 = vmul.f32 %v6562_v22, %v5531_v26  ;;  %v1809_v52 = vmul.f32 %v6566_v0, %v7428_v36  ;;  %v1811_v26 = vmul.f32 %v6588_v21, %v7430_v48  ;;  %v7489_v22 = vld [vmem:[#allocation37_spill] sm:$0xff]  ;;  %v7492_v21 = vld [vmem:[#allocation50_spill] sm:$0xff]  ;;  %v7503_v43 = vld [vmem:[#allocation16_spill] sm:$0xff] }
 0x2e8   :  { %4338 = vmatmul.mubr.msk.f32.gmra.mrb[2].mxu1 %vm973_vm3, %v1805_v51  ;;  %v1812_v30 = vmul.f32 %v6606_v37, %v7431_v11  ;;  %v1813_v36 = vmul.f32 %v6610_v54, %v5791_v6  ;;  %v1815_v48 = vmul.f32 %v7488_v63, %v5781_v56  ;;  %v1816_v11 = vmul.f32 %v6654_v60, %v7489_v22  ;;  %v7490_v0 = vld [vmem:[#allocation45_spill] sm:$0xff]  ;;  %v7493_v37 = vld [vmem:[#allocation43_spill] sm:$0xff]  ;;  %v6923_v22 = vld [vmem:[%s7207_s2 + $0x5] ss:$0 sm:$0xff] }
 0x2e9   :  { %4340 = vmatprep.mubr.msk.f32.mxu1 %vm973_vm3, %v1806_v31  ;;  %4611 = vmatpush3.bf16.msra.mxu1 %v6643_v39  ;;  %v1810_v39 = vmul.f32 %v6584_v27, %v5590_v4  ;;  %v1814_v4 = vmul.f32 %v6634_v53, %v5861_v59  ;;  %v1817_v6 = vmul.f32 %v6658_v62, %v7490_v0  ;;  %v7491_v27 = vld [vmem:[#allocation49_spill] sm:$0xff]  ;;  %v7494_v53 = vld [vmem:[#allocation52_spill] sm:$0xff]  ;;  %v7507_v31 = vld [vmem:[#allocation31_spill] sm:$0xff] }
 0x2ea   :  { %4613 = vmatprep.subr.bf16.mxu1 %v4612_v29  ;;  %v1818_v59 = vmul.f32 %v6667_v47, %v7491_v27  ;;  %v1819_v56 = vmul.f32 %v6673_v5, %v7492_v21  ;;  %v1820_v54 = vmul.f32 %v6702_v50, %v7493_v37  ;;  %v1821_v60 = vmul.f32 %v6706_v40, %v7494_v53  ;;  %v7495_v62 = vld [vmem:[#allocation4_spill] sm:$0xff]  ;;  %v7505_v51 = vld [vmem:[#allocation9_spill] sm:$0xff]  ;;  %v7509_v14 = vld [vmem:[#allocation11_spill] sm:$0xff] }
 0x2eb   :  { %v1862_v47 = vmul.f32 %v7496_v10, %v7495_v62  ;;  %v1863_v5 = vmul.f32 %v7498_v13, %v7497_v35  ;;  %v1864_v50 = vmul.f32 %v7500_v32, %v7499_v9  ;;  %v1865_v40 = vmul.f32 %v6682_v15, %v7501_v61  ;;  %v7510_v19 = vld [vmem:[#allocation39_spill] sm:$0xff]  ;;  %v2745_v63 = vld [vmem:[%s7209_s5 + $0xd8] sm:$0xff] }
 0x2ec   :  { %4341 = vmatmul.mubr.msk.f32.gmra.mrb[4].mxu1 %vm973_vm3, %v1807_v3  ;;  %v1866_v8 = vmul.f32 %v6691_v1, %v7502_v46  ;;  %v1867_v58 = vmul.f32 %v6695_v38, %v7503_v43  ;;  %v1868_v7 = vmul.f32 %v6713_v49, %v7504_v34  ;;  %v1869_v15 = vmul.f32 %v6724_v44, %v7505_v51  ;;  %v7511_v3 = vld [vmem:[#allocation41_spill] sm:$0xff] }
 0x2ed   :  { %4343 = vmatprep.mubr.msk.f32.mxu1 %vm973_vm3, %v1808_v16  ;;  %4615 = vmatpush3.bf16.msra.mxu1 %v4612_v29  ;;  %v7506_v29 = vld [vmem:[#allocation30_spill] sm:$0xff]  ;;  %v1871_v38 = vmul.f32 %v6732_v18, %v7507_v31  ;;  %v1872_v49 = vmul.f32 %v6738_v23, %v7508_v17  ;;  %v1873_v44 = vmul.f32 %v6743_v28, %v7509_v14 }
 0x2ee   :  { %4617 = vmatprep.subr.bf16.mxu1 %v4616_v42  ;;  %v1870_v1 = vmul.f32 %v6728_v12, %v7506_v29  ;;  %v1874_v12 = vmul.f32 %v6747_v24, %v7510_v19  ;;  %v1875_v18 = vmul.f32 %v6751_v57, %v7511_v3  ;;  %v7513_v16 = vld [vmem:[#allocation14_spill] sm:$0xff] }
 0x2ef   :  { %v1877_v28 = vmul.f32 %v6764_v20, %v7513_v16 }
 0x2f0   :  { %4344 = vmatmul.mubr.msk.f32.gmra.mrb[6].mxu1 %vm973_vm3, %v1809_v52  ;;  %v7514_v52 = vld [vmem:[#allocation15_spill] sm:$0xff] }
 0x2f1   :  { %4346 = vmatprep.mubr.msk.f32.mxu1 %vm973_vm3, %v1810_v39  ;;  %4619 = vmatpush3.bf16.msra.mxu1 %v4616_v42  ;;  %v7512_v42 = vld [vmem:[#allocation12_spill] sm:$0xff]  ;;  %v1878_v24 = vmul.f32 %v6768_v25, %v7514_v52  ;;  %v7515_v39 = vld [vmem:[#allocation53_spill] sm:$0xff]  ;;  %v4892_v25 = vmov 0.0|0.0  }
 0x2f2   :  { %v1876_v23 = vmul.f32 %v6760_v55, %v7512_v42  ;;  %v1879_v57 = vmul.f32 %v6772_v2, %v7515_v39  ;;  %4620 = vmatprep.subr.bf16.mxu0 %v4892_v25  ;;  %4650 = vmatprep.subr.bf16.mxu1 %v4892_v25  ;;  %v2667_v2 = vld [vmem:[%s7208_s4 + $0x8] sm:$0xff] }
 0x2f3   :  { %3893 = vmatprep.mubr.msk.f32.mxu0 %vm2668_vm4, %v2667_v2 }
 0x2f4   :  { %4347 = vmatmul.mubr.msk.f32.gmra.mrb[8].mxu1 %vm973_vm3, %v1811_v26  ;;  %v7516_v26 = vld [vmem:[#allocation57_spill] sm:$0xff] }
 0x2f5   :  { %4349 = vmatprep.mubr.msk.f32.mxu1 %vm973_vm3, %v1812_v30  ;;  %v1880_v55 = vmul.f32 %v6785_v41, %v7516_v26  ;;  %v7517_v30 = vld [vmem:[#allocation55_spill] sm:$0xff]  ;;  %v2742_v41 = vld [vmem:[%s7209_s5] sm:$0xff] }
 0x2f6   :  { %v1881_v20 = vmul.f32 %v6791_v33, %v7517_v30  ;;  %v2743_v33 = vld [vmem:[%s7209_s5 + $0x48] sm:$0xff] }
 0x2f8   :  { %4350 = vmatmul.mubr.msk.f32.gmra.mrb[10].mxu1 %vm973_vm3, %v1813_v36  ;;  %v2744_v36 = vld [vmem:[%s7209_s5 + $0x90] sm:$0xff] }
 0x2f9   :  { %4352 = vmatprep.mubr.msk.f32.mxu1 %vm973_vm3, %v1814_v4  ;;  %v4651_v4 = vpack.c.bf16 %v2743_v33, %v2742_v41 }
 0x2fc   :  { %4353 = vmatmul.mubr.msk.f32.gmra.mrb[12].mxu1 %vm973_vm3, %v1815_v48  ;;  %v4654_v48 = vpack.c.bf16 %v2745_v63, %v2744_v36 }
 0x2fd   :  { %4355 = vmatprep.mubr.msk.f32.mxu1 %vm973_vm3, %v1816_v11 }
 0x300   :  { %4356 = vmatmul.mubr.msk.f32.gmra.mrb[14].mxu1 %vm973_vm3, %v1817_v6 }
 0x301   :  { %4358 = vmatprep.mubr.msk.f32.mxu1 %vm973_vm3, %v1818_v59 }
 0x304   :  { %4359 = vmatmul.mubr.msk.f32.gmra.mrb[16].mxu1 %vm973_vm3, %v1819_v56 }
 0x305   :  { %4361 = vmatprep.mubr.msk.f32.mxu1 %vm973_vm3, %v1820_v54 }
 0x308   :  { %4362 = vmatmul.mubr.msk.f32.gmra.mrb[18].mxu1 %vm973_vm3, %v1821_v60 }
 0x309   :  { %4380 = vmatprep.mubr.msk.f32.mxu1 %vm973_vm3, %v1862_v47 }
 0x30c   :  { %4381 = vmatmul.mubr.msk.f32.vlgmr.msra.gmra.mrb[0].mxu1 %vm973_vm3, %v1863_v5 }
 0x30d   :  { %4383 = vmatprep.mubr.msk.f32.mxu1 %vm973_vm3, %v1864_v50  ;;  %4652 = vmatpush3.bf16.msra.mxu1 %v4651_v4 }
 0x30e   :  { %4653 = vmatprep.subr.bf16.mxu1 %v4892_v25 }
 0x310   :  { %4384 = vmatmul.mubr.msk.f32.gmra.mrb[2].mxu1 %vm973_vm3, %v1865_v40 }
 0x311   :  { %4386 = vmatprep.mubr.msk.f32.mxu1 %vm973_vm3, %v1866_v8  ;;  %4655 = vmatpush3.bf16.msra.mxu1 %v4654_v48 }
 0x312   :  { %4664 = vmatprep.subr.bf16.mxu1 %v4892_v25 }
 0x314   :  { %4387 = vmatmul.mubr.msk.f32.gmra.mrb[4].mxu1 %vm973_vm3, %v1867_v58 }
 0x315   :  { %4389 = vmatprep.mubr.msk.f32.mxu1 %vm973_vm3, %v1868_v7 }
 0x318   :  { %4390 = vmatmul.mubr.msk.f32.gmra.mrb[6].mxu1 %vm973_vm3, %v1869_v15 }
 0x319   :  { %4392 = vmatprep.mubr.msk.f32.mxu1 %vm973_vm3, %v1870_v1 }
 0x31c   :  { %4393 = vmatmul.mubr.msk.f32.gmra.mrb[8].mxu1 %vm973_vm3, %v1871_v38 }
 0x31d   :  { %4395 = vmatprep.mubr.msk.f32.mxu1 %vm973_vm3, %v1872_v49 }
 0x320   :  { %4396 = vmatmul.mubr.msk.f32.gmra.mrb[10].mxu1 %vm973_vm3, %v1873_v44 }
 0x321   :  { %4398 = vmatprep.mubr.msk.f32.mxu1 %vm973_vm3, %v1874_v12 }
 0x324   :  { %4399 = vmatmul.mubr.msk.f32.gmra.mrb[12].mxu1 %vm973_vm3, %v1875_v18 }
 0x325   :  { %4401 = vmatprep.mubr.msk.f32.mxu1 %vm973_vm3, %v1876_v23 }
 0x328   :  { %4402 = vmatmul.mubr.msk.f32.gmra.mrb[14].mxu1 %vm973_vm3, %v1877_v28 }
 0x329   :  { %4404 = vmatprep.mubr.msk.f32.mxu1 %vm973_vm3, %v1878_v24 }
 0x32c   :  { %4405 = vmatmul.mubr.msk.f32.gmra.mrb[16].mxu1 %vm973_vm3, %v1879_v57 }
 0x32d   :  { %4407 = vmatprep.mubr.msk.f32.mxu1 %vm973_vm3, %v1880_v55 }
 0x330   :  { %4408 = vmatmul.mubr.msk.f32.gmra.mrb[18].mxu1 %vm973_vm3, %v1881_v20 }
 0x3df   :  { %v4382_v11 = vpop.f32.mrb[0].mxu1 }
 0x3e0   :  { %v2607_v0 = vadd.f32 %v4382_v11, %v6923_v22  ;;  %v2482_v6 = vpop.f32.mrb[1].mxu1 }
 0x3e1   :  { %v2606_v27 = vadd.f32 %v6923_v22, %v2482_v6 }
 0x3e2   :  { %v2627_v59 = vmul.f32 0.2, %v2607_v0 }
 0x3e3   :  { %v2626_v21 = vmul.f32 0.2, %v2606_v27  ;;  %v4385_v56 = vpop.f32.mrb[2].mxu1 }
 0x3e4   :  { %v2647_v37 = vmax.f32 %v2607_v0, %v2627_v59  ;;  %v2609_v54 = vadd.f32 %v4385_v56, %v6923_v22  ;;  %v2492_v53 = vpop.f32.mrb[3].mxu1 }
 0x3e5   :  { %v2646_v60 = vmax.f32 %v2606_v27, %v2626_v21  ;;  %v2608_v62 = vadd.f32 %v6923_v22, %v2492_v53 }
 0x3e6   :  { %v2629_v10 = vmul.f32 0.2, %v2609_v54 }
 0x3e7   :  { %v4621_v47 = vpack.c.bf16 %v2647_v37, %v2646_v60  ;;  %v2628_v35 = vmul.f32 0.2, %v2608_v62  ;;  %v4388_v13 = vpop.f32.mrb[4].mxu1 }
 0x3e8   :  { %v2649_v5 = vmax.f32 %v2609_v54, %v2629_v10  ;;  %v2611_v9 = vadd.f32 %v4388_v13, %v6923_v22  ;;  %v2502_v32 = vpop.f32.mrb[5].mxu1 }
 0x3e9   :  { %v2648_v50 = vmax.f32 %v2608_v62, %v2628_v35  ;;  %v2610_v61 = vadd.f32 %v6923_v22, %v2502_v32  ;;  %4622 = vmatpush1.bf16.msra.mxu0 %v4621_v47 }
 0x3ea   :  { %v2631_v40 = vmul.f32 0.2, %v2611_v9  ;;  %4623 = vmatprep.subr.bf16.mxu0 %v4892_v25 }
 0x3eb   :  { %v4624_v46 = vpack.c.bf16 %v2649_v5, %v2648_v50  ;;  %v2630_v8 = vmul.f32 0.2, %v2610_v61  ;;  %v4391_v43 = vpop.f32.mrb[6].mxu1 }
 0x3ec   :  { %v2651_v58 = vmax.f32 %v2611_v9, %v2631_v40  ;;  %v2613_v34 = vadd.f32 %v4391_v43, %v6923_v22  ;;  %v2512_v7 = vpop.f32.mrb[7].mxu1 }
 0x3ed   :  { %v2650_v51 = vmax.f32 %v2610_v61, %v2630_v8  ;;  %v2612_v15 = vadd.f32 %v6923_v22, %v2512_v7  ;;  %4625 = vmatpush1.bf16.msra.mxu0 %v4624_v46 }
 0x3ee   :  { %v2633_v29 = vmul.f32 0.2, %v2613_v34  ;;  %4626 = vmatprep.subr.bf16.mxu0 %v4892_v25 }
 0x3ef   :  { %v4627_v1 = vpack.c.bf16 %v2651_v58, %v2650_v51  ;;  %v2632_v31 = vmul.f32 0.2, %v2612_v15  ;;  %v4394_v38 = vpop.f32.mrb[8].mxu1 }
 0x3f0   :  { %v2653_v17 = vmax.f32 %v2613_v34, %v2633_v29  ;;  %v2615_v49 = vadd.f32 %v4394_v38, %v6923_v22  ;;  %v2522_v14 = vpop.f32.mrb[9].mxu1  ;;  %v2831_v29 = vld [vmem:[%s7209_s5 + $0x58] sm:$0xff] }
 0x3f1   :  { %v2652_v44 = vmax.f32 %v2612_v15, %v2632_v31  ;;  %v2614_v19 = vadd.f32 %v6923_v22, %v2522_v14  ;;  %4628 = vmatpush1.bf16.msra.mxu0 %v4627_v1  ;;  %v2666_v15 = vld [vmem:[%s7208_s4] sm:$0xff]  ;;  %v4894_v1 = vmov 0.0   ;;  %v2830_v14 = vld [vmem:[%s7209_s5 + $0x50] sm:$0xff] }
 0x3f2   :  { %v2635_v12 = vmul.f32 0.2, %v2615_v49  ;;  %4629 = vmatprep.subr.bf16.mxu0 %v4892_v25  ;;  %4418 = vmatprep.mubr.msk.f32.mxu1 %vm4893_vm5, %v4894_v1 }
 0x3f3   :  { %v4630_v3 = vpack.c.bf16 %v2653_v17, %v2652_v44  ;;  %v2634_v18 = vmul.f32 0.2, %v2614_v19  ;;  %v4397_v42 = vpop.f32.mrb[10].mxu1  ;;  %v2833_v44 = vld [vmem:[%s7209_s5 + $0xa0] sm:$0xff] }
 0x3f4   :  { %v2655_v23 = vmax.f32 %v2615_v49, %v2635_v12  ;;  %v2617_v16 = vadd.f32 %v4397_v42, %v6923_v22  ;;  %v2532_v28 = vpop.f32.mrb[11].mxu1  ;;  %v2828_v49 = vld [vmem:[%s7209_s5 + $0x8] sm:$0xff] }
 0x3f5   :  { %v2654_v52 = vmax.f32 %v2614_v19, %v2634_v18  ;;  %v2616_v24 = vadd.f32 %v6923_v22, %v2532_v28  ;;  %4631 = vmatpush1.bf16.msra.mxu0 %v4630_v3  ;;  %v4658_v19 = vpack.c.bf16 %v2830_v14, %v2828_v49  ;;  %v2835_v12 = vld [vmem:[%s7209_s5 + $0xe8] sm:$0xff]  ;;  %v2832_v3 = vld [vmem:[%s7209_s5 + $0x98] sm:$0xff]  ;;  %v2834_v18 = vld [vmem:[%s7209_s5 + $0xe0] sm:$0xff] }
 0x3f6   :  { %v2637_v39 = vmul.f32 0.2, %v2617_v16  ;;  %4632 = vmatprep.subr.bf16.mxu0 %v4892_v25  ;;  %v4660_v42 = vpack.c.bf16 %v2835_v12, %v2833_v44  ;;  %v2957_v44 = vld [vmem:[%s7207_s2 + $0x40] sm:$0xff] }
 0x3f7   :  { %v4633_v57 = vpack.c.bf16 %v2655_v23, %v2654_v52  ;;  %v2636_v26 = vmul.f32 0.2, %v2616_v24  ;;  %v4400_v55 = vpop.f32.mrb[12].mxu1  ;;  %v4662_v23 = vpack.c.bf16 %v2834_v18, %v2832_v3  ;;  %v3217_v3 = vld [vmem:[%s7209_s5 + $0x20] sm:$0xff]  ;;  %v3218_v18 = vld [vmem:[%s7209_s5 + $0x68] sm:$0xff] }
 0x3f8   :  { %v2657_v30 = vmax.f32 %v2617_v16, %v2637_v39  ;;  %v2619_v20 = vadd.f32 %v4400_v55, %v6923_v22  ;;  %v2542_v2 = vpop.f32.mrb[13].mxu1  ;;  %v3894_v16 = vld [vmem:[%s7210_s6] ss:$0 sm:$0xff]  ;;  %v2836_v55 = vld [vmem:[%s7210_s6 + $0x1] sm:$0x3] }
 0x3f9   :  { %v2656_v41 = vmax.f32 %v2616_v24, %v2636_v26  ;;  %v2618_v33 = vadd.f32 %v6923_v22, %v2542_v2  ;;  %4634 = vmatpush1.bf16.msra.mxu0 %v4633_v57  ;;  %v2844_v26 = vsub.s32 1, %v5175_v45 }
 0x3fa   :  { %v2639_v36 = vmul.f32 0.2, %v2619_v20  ;;  %4635 = vmatprep.subr.bf16.mxu0 %v4892_v25 }
 0x3fb   :  { %v4636_v4 = vpack.c.bf16 %v2657_v30, %v2656_v41  ;;  %v2638_v63 = vmul.f32 0.2, %v2618_v33  ;;  %v4403_v48 = vpop.f32.mrb[14].mxu1  ;;  %v2845_v30 = vrot.slane %v2836_v55, %v2844_v26 }
 0x3fc   :  { %v2659_v11 = vmax.f32 %v2619_v20, %v2639_v36  ;;  %v2621_v0 = vadd.f32 %v4403_v48, %v6923_v22  ;;  %v2552_v6 = vpop.f32.mrb[15].mxu1 }
 0x3fd   :  { %v2658_v27 = vmax.f32 %v2618_v33, %v2638_v63  ;;  %v2620_v59 = vadd.f32 %v6923_v22, %v2552_v6  ;;  %4637 = vmatpush1.bf16.msra.mxu0 %v4636_v4 }
 0x3fe   :  { %v2641_v21 = vmul.f32 0.2, %v2621_v0  ;;  %4638 = vmatprep.subr.bf16.mxu0 %v4892_v25 }
 0x3ff   :  { %v4639_v56 = vpack.c.bf16 %v2659_v11, %v2658_v27  ;;  %v2640_v37 = vmul.f32 0.2, %v2620_v59  ;;  %v4406_v54 = vpop.f32.mrb[16].mxu1  ;;  %v2840_v11 = vsub.s32 0, %v5175_v45 }
 0x400   :  { %v2661_v53 = vmax.f32 %v2621_v0, %v2641_v21  ;;  %v2623_v60 = vadd.f32 %v4406_v54, %v6923_v22  ;;  %v2562_v62 = vpop.f32.mrb[17].mxu1 }
 0x401   :  { %v2660_v10 = vmax.f32 %v2620_v59, %v2640_v37  ;;  %v2622_v47 = vadd.f32 %v6923_v22, %v2562_v62  ;;  %4640 = vmatpush1.bf16.msra.mxu0 %v4639_v56  ;;  %v2841_v6 = vrot.slane %v2836_v55, %v2840_v11  ;;  %v7010_v56 = vld [vmem:[%s7211_s1] sm:$0xf]  ;;  %s4898_s1 = smov 96   ;;  %v3318_v11 = vld [vmem:[%s7212_s7 + $0x8] sm:$0xff] }
 0x402   :  { %v2643_v35 = vmul.f32 0.2, %v2623_v60  ;;  %4641 = vmatprep.subr.bf16.mxu0 %v4892_v25 }
 0x403   :  { %v4642_v13 = vpack.c.bf16 %v2661_v53, %v2660_v10  ;;  %v2642_v5 = vmul.f32 0.2, %v2622_v47  ;;  %v4409_v9 = vpop.f32.mrb[18].mxu1 }
 0x404   :  { %v2663_v32 = vmax.f32 %v2623_v60, %v2643_v35  ;;  %v2625_v50 = vadd.f32 %v4409_v9, %v6923_v22  ;;  %v2572_v61 = vpop.f32.mrb[19].mxu1  ;;  %v2950_v9 = vld [vmem:[%s7207_s2 + $0x8] sm:$0xff] }
 0x405   :  { %v2662_v40 = vmax.f32 %v2622_v47, %v2642_v5  ;;  %v2624_v46 = vadd.f32 %v6923_v22, %v2572_v61  ;;  %4643 = vmatpush1.bf16.msra.mxu0 %v4642_v13  ;;  %v2829_v22 = vld [vmem:[%s7209_s5 + $0x10] sm:$0xff]  ;;  %v2953_v61 = vld [vmem:[%s7207_s2 + $0x20] sm:$0xff] }
 0x406   :  { %v2645_v8 = vmul.f32 0.2, %v2625_v50  ;;  %4644 = vmatprep.subr.bf16.mxu0 %v4892_v25  ;;  %v4656_v31 = vpack.c.bf16 %v2831_v29, %v2829_v22 }
 0x407   :  { %v4645_v43 = vpack.c.bf16 %v2663_v32, %v2662_v40  ;;  %v2644_v58 = vmul.f32 0.2, %v2624_v46  ;;  %v2951_v32 = vld [vmem:[%s7207_s2 + $0x10] sm:$0xff] }
 0x408   :  { %v2665_v34 = vmax.f32 %v2625_v50, %v2645_v8  ;;  %v2952_v50 = vld [vmem:[%s7207_s2 + $0x18] sm:$0xff] }
 0x409   :  { %v2664_v7 = vmax.f32 %v2624_v46, %v2644_v58  ;;  %4646 = vmatpush1.bf16.msra.mxu0 %v4645_v43  ;;  %v4665_v40 = vpack.c.bf16 %v2952_v50, %v2951_v32  ;;  %v2954_v46 = vld [vmem:[%s7207_s2 + $0x28] sm:$0xff]  ;;  %v2955_v43 = vld [vmem:[%s7207_s2 + $0x30] sm:$0xff]  ;;  %v2956_v58 = vld [vmem:[%s7207_s2 + $0x38] sm:$0xff] }
 0x40a   :  { %4647 = vmatprep.subr.bf16.mxu0 %v4892_v25  ;;  %v4668_v8 = vpack.c.bf16 %v2954_v46, %v2953_v61 }
 0x40b   :  { %v4648_v51 = vpack.c.bf16 %v2665_v34, %v2664_v7  ;;  %v4671_v34 = vpack.c.bf16 %v2956_v58, %v2955_v43  ;;  %v3406_v58 = vld [vmem:[%s7209_s5 + $0x70] sm:$0xff] }
 0x40d   :  { %4649 = vmatpush1.bf16.msra.mxu0 %v4648_v51  ;;  %v3129_v51 = vld [vmem:[%s7209_s5 + $0x18] sm:$0xff] }
 0x40e   :  { %4657 = vmatprep.subr.bf16.mxu0 %v4656_v31 }
 0x410   :  { %2737 = vmatmul.mubr.f32.vlgmr.msra.gmra.mrb[20].mxu0 %v2666_v15  ;;  %v3130_v15 = vld [vmem:[%s7209_s5 + $0x60] sm:$0xff] }
 0x411   :  { %2915 = vmatprep.mubr.f32.mxu0 %v4894_v1  ;;  %4659 = vmatpush1.bf16.msra.mxu0 %v4658_v19  ;;  %v4677_v29 = vpack.c.bf16 %v3130_v15, %v3129_v51  ;;  %v2958_v19 = vld [vmem:[%s7207_s2 + $0x48] sm:$0xff]  ;;  %v3408_v51 = vld [vmem:[%s7209_s5 + $0x100] sm:$0xff] }
 0x412   :  { %4661 = vmatprep.subr.bf16.mxu0 %v4660_v42  ;;  %v4674_v12 = vpack.c.bf16 %v2958_v19, %v2957_v44  ;;  %v3219_v42 = vld [vmem:[%s7209_s5 + $0xb0] sm:$0xff]  ;;  %v3492_v44 = vld [vmem:[%s7209_s5 + $0x78] sm:$0xff]  ;;  %v3493_v19 = vld [vmem:[%s7209_s5 + $0xc0] sm:$0xff] }
 0x415   :  { %4663 = vmatpush1.bf16.msra.mxu0 %v4662_v23  ;;  %v4683_v23 = vpack.c.bf16 %v3218_v18, %v3217_v3  ;;  %v3494_v3 = vld [vmem:[%s7209_s5 + $0x108] sm:$0xff] }
 0x416   :  { %4421 = vmatprep.subr.mxu0 %v4894_v1  ;;  %v4704_v18 = vpack.c.bf16 %v3494_v3, %v3493_v19 }
 0x4e3   :  { %v6966_v38 = vpop.f32.mrb[20].mxu0 }
 0x4e4   :  { %v2740_v17 = vpop.f32.mrb[21].mxu0  ;;  %4419 = vmatmul.mubr.msk.f32.vlgmr.msra.gmra.mrb[20].mxu1 %vm2668_vm4, %v6966_v38  ;;  %v3140_v5 = vrot.slane %v6966_v38, 4  ;;  %v3131_v38 = vld [vmem:[%s7209_s5 + $0xa8] sm:$0xff] }
 0x4e5   :  { %4442 = vmatprep.mubr.msk.f32.mxu1 %vm4893_vm5, %v4894_v1  ;;  %4666 = vmatpush3.bf16.msra.mxu1 %v4665_v40  ;;  %v3132_v17 = vld [vmem:[%s7209_s5 + $0xf0] sm:$0xff] }
 0x4e6   :  { %4667 = vmatprep.subr.bf16.mxu1 %v4892_v25  ;;  %v4680_v49 = vpack.c.bf16 %v3132_v17, %v3131_v38 }
 0x4e9   :  { %4669 = vmatpush3.bf16.msra.mxu1 %v4668_v8 }
 0x4ea   :  { %4670 = vmatprep.subr.bf16.mxu1 %v4892_v25 }
 0x4ed   :  { %4672 = vmatpush3.bf16.msra.mxu1 %v4671_v34  ;;  %v3407_v34 = vld [vmem:[%s7209_s5 + $0xb8] sm:$0xff] }
 0x4ee   :  { %4673 = vmatprep.subr.bf16.mxu1 %v4892_v25  ;;  %v4698_v15 = vpack.c.bf16 %v3408_v51, %v3407_v34 }
 0x4f1   :  { %4675 = vmatpush3.bf16.msra.mxu1 %v4674_v12 }
 0x4f2   :  { %4688 = vmatprep.subr.bf16.mxu1 %v4892_v25 }
 0x5b7   :  { %v2822_v28 = vpop.f32.mrb[20].mxu1 }
 0x5b8   :  { %v2823_v52 = vadd.f32 %v3894_v16, %v2822_v28  ;;  %v4420_v24 = vpop.f32.mrb[21].mxu1  ;;  %v3220_v16 = vld [vmem:[%s7209_s5 + $0xf8] sm:$0xff] }
 0x5b9   :  { %v4686_v28 = vpack.c.bf16 %v3220_v16, %v3219_v42  ;;  %v3906_v42 = vld [vmem:[%s7210_s6 + $0x6] ss:$0 sm:$0xff] }
 0x5ba   :  { %v2826_v39 = vmul.f32 0.2, %v2823_v52 }
 0x5bc   :  { %v2827_v57 = vmax.f32 %v2823_v52, %v2826_v39 }
 0x5be   :  { %3896 = vmatmul.mubr.msk.f32.vlgmr.msra.gmra.mrb[22].mxu0 %vm2668_vm4, %v2827_v57 }
 0x5bf   :  { %4423 = vmatprep.mubr.msk.f32.mxu0 %vm4893_vm5, %v4894_v1  ;;  %4422 = vmatpush3.msra.mxu0 %v2950_v9 }
 0x5c0   :  { %4676 = vmatprep.subr.bf16.mxu0 %v4892_v25 }
 0x691   :  { %v2917_v20 = vpop.f32.mrb[22].mxu0 }
 0x692   :  { %v2919_v2 = vpop.f32.mrb[23].mxu0  ;;  %v7004_v27 = vadd.f32 %v2917_v20, %v2841_v6 }
 0x693   :  { %v2920_v41 = vadd.f32 %v2919_v2, %v2845_v30  ;;  %v3900_v2 = vld [vmem:[%s7210_s6 + $0x3] ss:$0 sm:$0xff] }
 0x694   :  { %v3033_v59 = vmul.f32 0.5, %v7004_v27 }
 0x695   :  { %v2923_v33 = vsel %vm2922_vm6, %v2920_v41, -inf }
 0x696   :  { %2924 = vmax.xlane.f32.xlu1 %v2923_v33  ;;  %v3034_v21 = vmul.f32 1.442695, %v3033_v59 }
 0x723   :  { %v2925_v36 = vpop.xlane.xlu1 %2924 }
 0x724   :  { %v2926_v4 = vsub.f32 %v2920_v41, %v2925_v36 }
 0x726   :  { %v2927_v63 = vmul.f32 1.442695, %v2926_v4 }
 0x728   :  { %4877 = vpow2.f32 %v2927_v63 }
 0x729   :  { %4879 = vpow2.f32 %v3034_v21 }
 0x732   :  { %v4878_v48 = vpop.eup %4877 }
 0x733   :  { %v2929_v0 = vsel %vm2922_vm6, %v4878_v48, 0.0  ;;  %v4880_v45 = vpop.eup %4879 }
 0x734   :  { %2930 = vadd.xlane.f32.xlu0 %v2929_v0  ;;  %v3319_v0 = vld [vmem:[%s7212_s7 + $0x10] sm:$0xff] }
 0x74a   :  { %2935 = vrot.lane.b32.xlu0 %v7010_v56, %s4895_s24  ;;  %s4900_s24 = smov 120  }
 0x74e   :  { %3304 = vrot.lane.b32.xlu0 %v7010_v56, %s4896_s25  ;;  %s4901_s25 = smov 80  }
 0x752   :  { %3038 = vrot.lane.b32.xlu0 %v4880_v45, %s4897_s26 }
 0x756   :  { %3313 = vrot.lane.b32.xlu0 %v7010_v56, %s4899_s13 }
 0x7c1   :  { %v2931_v37 = vpop.xlane.xlu0 %2930 }
 0x7c2   :  { %4881 = vrcp.f32 %v2931_v37  ;;  %v3902_v37 = vld [vmem:[%s7210_s6 + $0x4] ss:$0 sm:$0xff] }
 0x7c5   :  { %v2936_v60 = vpop.permute.xlu0 %2935 }
 0x7c9   :  { %v3305_v52 = vpop.permute.xlu0 %3304 }
 0x7cc   :  { %v4882_v54 = vpop.eup %4881 }
 0x7cd   :  { %v2933_v53 = vmul.f32 %v4882_v54, %v4878_v48  ;;  %v3039_v24 = vpop.permute.xlu0 %3038  ;;  %v3317_v48 = vld [vmem:[%s7212_s7] sm:$0xff] }
 0x7ce   :  { %v4689_v6 = vpack.c.bf16 %v3318_v11, %v3317_v48  ;;  %v3664_v48 = vld [vmem:[%s7209_s5 + $0x88] sm:$0xff]  ;;  %v3665_v11 = vld [vmem:[%s7209_s5 + $0xd0] sm:$0xff] }
 0x7cf   :  { %v2938_v62 = vadd.f32 %v2936_v60, %v2933_v53 }
 0x7d1   :  { %v2939_v10 = vsel %vm2922_vm6, %v2938_v62, -inf  ;;  %v3314_v32 = vpop.permute.xlu0 %3313 }
 0x7d2   :  { %2940 = vmax.xlane.f32.xlu1 %v2939_v10 }
 0x85f   :  { %v2941_v47 = vpop.xlane.xlu1 %2940 }
 0x860   :  { %vm2942_vm7 = vcmp.ge.f32.partialorder %v2938_v62, %v2941_v47  ;;  %v3321_v47 = vld [vmem:[%s7212_s7 + $0x20] sm:$0xff] }
 0x861   :  { %v3897_v35 = vsel %vm2942_vm7, 1.0, %v4894_v1 }
 0x862   :  { %v2945_v13 = vsel %vm2922_vm6, %v3897_v35, 0.0 }
 0x863   :  { %2946 = vadd.xlane.f32.xlu1 %v2945_v13 }
 0x874   :  { %3141 = vrot.lane.b32.xlu1 %v3140_v5, %s4898_s1  ;;  %v3120_v5 = vrot.slane %v7010_v56, 4  ;;  %v3405_v56 = vld [vmem:[%s7209_s5 + $0x28] sm:$0xff] }
 0x8f0   :  { %v2947_v7 = vpop.xlane.xlu1 %2946 }
 0x8f1   :  { %4883 = vrcp.f32 %v2947_v7  ;;  %v4695_v7 = vpack.c.bf16 %v3406_v58, %v3405_v56 }
 0x8f4   :  { %v3142_v14 = vpop.permute.xlu1 %3141 }
 0x8fb   :  { %v4884_v22 = vpop.eup %4883 }
 0x8fc   :  { %v2949_v31 = vmul.f32 %v4884_v22, %v3897_v35  ;;  %v3904_v22 = vld [vmem:[%s7210_s6 + $0x5] ss:$0 sm:$0xff] }
 0x8fe   :  { %4424 = vmatmul.mubr.msk.f32.vlgmr.msra.gmra.mrb[24].mxu0 %vm2959_vm8, %v2949_v31 }
 0x8ff   :  { %4678 = vmatpush3.bf16.msra.mxu0 %v4677_v29  ;;  %4453 = vmatprep.mubr.msk.f32.mxu0 %vm4893_vm5, %v4894_v1 }
 0x900   :  { %4679 = vmatprep.subr.bf16.mxu0 %v4892_v25 }
 0x903   :  { %4681 = vmatpush3.bf16.msra.mxu0 %v4680_v49 }
 0x904   :  { %4682 = vmatprep.subr.bf16.mxu0 %v4892_v25 }
 0x906   :  { %4454 = vmatmul.mubr.msk.f32.vlgmr.msra.gmra.mrb[26].mxu0 %vm2668_vm4, %v3142_v14  ;;  %v3491_v14 = vld [vmem:[%s7209_s5 + $0x30] sm:$0xff] }
 0x907   :  { %4464 = vmatprep.mubr.msk.f32.mxu0 %vm4893_vm5, %v4894_v1  ;;  %4684 = vmatpush3.bf16.msra.mxu0 %v4683_v23  ;;  %v4701_v12 = vpack.c.bf16 %v3492_v44, %v3491_v14 }
 0x908   :  { %4685 = vmatprep.subr.bf16.mxu0 %v4892_v25 }
 0x90b   :  { %4687 = vmatpush3.bf16.msra.mxu0 %v4686_v28 }
 0x90c   :  { %4694 = vmatprep.subr.bf16.mxu0 %v4892_v25 }
 0x9d1   :  { %v3029_v39 = vpop.f32.mrb[24].mxu0 }
 0x9d2   :  { %v3041_v57 = vmul.f32 %v3039_v24, %v3029_v39  ;;  %v4425_v26 = vpop.f32.mrb[25].mxu0  ;;  %v3036_v55 = vmul.f32 %v3029_v39, %v7004_v27  ;;  %v3320_v27 = vld [vmem:[%s7212_s7 + $0x18] sm:$0xff]  ;;  %s4902_s7 = smov 16  }
 0x9d3   :  { %v4692_v59 = vpack.c.bf16 %v3320_v27, %v3319_v0  ;;  %v3577_v39 = vld [vmem:[%s7209_s5 + $0x38] sm:$0xff]  ;;  %v3579_v26 = vld [vmem:[%s7209_s5 + $0xc8] sm:$0xff] }
 0x9d4   :  { %v3043_v30 = vrot.slane %v3041_v57, 4  ;;  %v3578_v57 = vld [vmem:[%s7209_s5 + $0x80] sm:$0xff] }
 0x9d6   :  { %v3046_v20 = vsel %vm3045_vm9, %v3036_v55, %v3043_v30  ;;  %v4707_v55 = vpack.c.bf16 %v3578_v57, %v3577_v39  ;;  %v3580_v30 = vld [vmem:[%s7209_s5 + $0x110] sm:$0xff] }
 0x9d7   :  { %4443 = vmatmul.mubr.msk.f32.vlgmr.msra.gmra.mrb[22].mxu1 %vm973_vm3, %v3046_v20  ;;  %v4710_v20 = vpack.c.bf16 %v3580_v30, %v3579_v26 }
 0x9d8   :  { %4477 = vmatprep.mubr.msk.f32.mxu1 %vm4893_vm5, %v4894_v1  ;;  %4690 = vmatpush3.bf16.msra.mxu1 %v4689_v6  ;;  %v3666_v6 = vld [vmem:[%s7209_s5 + $0x118] sm:$0xff] }
 0x9d9   :  { %v3211_v41 = vpop.f32.mrb[26].mxu0  ;;  %4691 = vmatprep.subr.bf16.mxu1 %v4892_v25  ;;  %v4716_v27 = vpack.c.bf16 %v3666_v6, %v3665_v11 }
 0x9da   :  { %v3212_v33 = vadd.f32 %v3900_v2, %v3211_v41  ;;  %v4455_v36 = vpop.f32.mrb[27].mxu0 }
 0x9dc   :  { %v3215_v4 = vmul.f32 0.2, %v3212_v33  ;;  %4693 = vmatpush3.bf16.msra.mxu1 %v4692_v59  ;;  %v3910_v59 = vld [vmem:[%s7210_s6 + $0x8] ss:$0 sm:$0xff] }
 0x9dd   :  { %4475 = vmatprep.subr.mxu1 %v4894_v1 }
 0x9de   :  { %v3216_v63 = vmax.f32 %v3212_v33, %v3215_v4 }
 0x9e0   :  { %4465 = vmatmul.mubr.msk.f32.vlgmr.msra.gmra.mrb[28].mxu0 %vm2668_vm4, %v3216_v63  ;;  %4476 = vmatpush3.msra.mxu1 %v3321_v47  ;;  %v3663_v63 = vld [vmem:[%s7209_s5 + $0x40] sm:$0xff]  ;;  %s4903_s5 = smov 24  }
 0x9e1   :  { %4488 = vmatprep.mubr.msk.f32.mxu0 %vm4893_vm5, %v4894_v1  ;;  %4700 = vmatprep.subr.bf16.mxu1 %v4892_v25  ;;  %v4713_v0 = vpack.c.bf16 %v3664_v48, %v3663_v63 }
 0x9e2   :  { %4696 = vmatpush3.bf16.msra.mxu0 %v4695_v7 }
 0x9e3   :  { %4697 = vmatprep.subr.bf16.mxu0 %v4892_v25 }
 0x9e6   :  { %4699 = vmatpush3.bf16.msra.mxu0 %v4698_v15 }
 0x9e7   :  { %4706 = vmatprep.subr.bf16.mxu0 %v4892_v25 }
 0xaaa   :  { %v3116_v21 = vpop.f32.mrb[22].mxu1 }
 0xaab   :  { %v4444_v45 = vpop.f32.mrb[23].mxu1 }
 0xab3   :  { %v3297_v54 = vpop.f32.mrb[28].mxu0 }
 0xab4   :  { %v7112_v53 = vadd.f32 %v3902_v37, %v3297_v54  ;;  %v4466_v60 = vpop.f32.mrb[29].mxu0 }
 0xab6   :  { %v3301_v62 = vmul.f32 0.5, %v7112_v53 }
 0xab8   :  { %v3302_v10 = vmul.f32 1.442695, %v3301_v62  ;;  %v3912_v62 = vld [vmem:[%s7210_s6 + $0x9] ss:$0 sm:$0xff] }
 0xaba   :  { %4885 = vpow2.f32 %v3302_v10 }
 0xac4   :  { %v4886_v35 = vpop.eup %4885 }
 0xac5   :  { %v3307_v13 = vmul.f32 %v4886_v35, %v3305_v52 }
 0xac7   :  { %3309 = vrot.lane.b32.xlu1 %v3307_v13, %s4900_s24 }
 0xacb   :  { %3121 = vrot.lane.b32.xlu1 %v3120_v5, %s4901_s25 }
 0xb39   :  { %v3310_v9 = vpop.permute.xlu1 %3309 }
 0xb3a   :  { %v3312_v50 = vadd.f32 %v3310_v9, %v7112_v53 }
 0xb3c   :  { %v3316_v61 = vsel %vm2959_vm8, %v3312_v50, %v3314_v32 }
 0xb3d   :  { %v3122_v40 = vpop.permute.xlu1 %3121  ;;  %4478 = vmatmul.mubr.msk.f32.vlgmr.msra.gmra.mrb[24].mxu1 %vm3329_vm10, %v3316_v61 }
 0xb3e   :  { %v3124_v46 = vmul.f32 %v3122_v40, %v3116_v21  ;;  %4499 = vmatprep.mubr.msk.f32.mxu1 %vm4893_vm5, %v4894_v1  ;;  %4702 = vmatpush3.bf16.msra.mxu1 %v4701_v12 }
 0xb3f   :  { %4703 = vmatprep.subr.bf16.mxu1 %v4892_v25 }
 0xb40   :  { %v3126_v8 = vrot.slane %v3124_v46, 4 }
 0xb42   :  { %v3128_v43 = vadd.f32 %v3126_v8, %v3116_v21  ;;  %4705 = vmatpush3.bf16.msra.mxu1 %v4704_v18 }
 0xb43   :  { %4712 = vmatprep.subr.bf16.mxu1 %v4892_v25 }
 0xb44   :  { %3749 = vrot.lane.b32.xlu0 %v3128_v43, %s4902_s7 }
 0xbb6   :  { %v3750_v13 = vpop.permute.xlu0 %3749 }
 0xbb7   :  { %v3757_v5 = vsel %vm3756_vm11, %v7112_v53, %v3750_v13 }
 0xc10   :  { %v3399_v29 = vpop.f32.mrb[24].mxu1 }
 0xc11   :  { %v3400_v31 = vadd.f32 %v3904_v22, %v3399_v29  ;;  %v4479_v38 = vpop.f32.mrb[25].mxu1 }
 0xc13   :  { %v3403_v17 = vmul.f32 0.2, %v3400_v31 }
 0xc15   :  { %v3404_v49 = vmax.f32 %v3400_v31, %v3403_v17 }
 0xc17   :  { %4489 = vmatmul.mubr.msk.f32.vlgmr.msra.gmra.mrb[30].mxu0 %vm2668_vm4, %v3404_v49 }
 0xc18   :  { %4510 = vmatprep.mubr.msk.f32.mxu0 %vm4893_vm5, %v4894_v1  ;;  %4708 = vmatpush3.bf16.msra.mxu0 %v4707_v55 }
 0xc19   :  { %4709 = vmatprep.subr.bf16.mxu0 %v4892_v25 }
 0xc1c   :  { %4711 = vmatpush3.bf16.msra.mxu0 %v4710_v20 }
 0xcea   :  { %v3485_v23 = vpop.f32.mrb[30].mxu0 }
 0xceb   :  { %v3486_v16 = vadd.f32 %v3906_v42, %v3485_v23  ;;  %v4490_v28 = vpop.f32.mrb[31].mxu0 }
 0xced   :  { %v3489_v52 = vmul.f32 0.2, %v3486_v16 }
 0xcef   :  { %v3490_v24 = vmax.f32 %v3486_v16, %v3489_v52 }
 0xcf1   :  { %4500 = vmatmul.mubr.msk.f32.vlgmr.msra.gmra.mrb[26].mxu1 %vm2668_vm4, %v3490_v24 }
 0xcf2   :  { %4521 = vmatprep.mubr.msk.f32.mxu1 %vm4893_vm5, %v4894_v1  ;;  %v3908_v1 = vld [vmem:[%s7210_s6 + $0x7] ss:$0 sm:$0xff]  ;;  %4714 = vmatpush3.bf16.msra.mxu1 %v4713_v0 }
 0xcf3   :  { %4715 = vmatprep.subr.bf16.mxu1 %v4892_v25 }
 0xcf6   :  { %4717 = vmatpush3.bf16.msra.mxu1 %v4716_v27 }
 0xdc4   :  { %v3571_v2 = vpop.f32.mrb[26].mxu1 }
 0xdc5   :  { %v3572_v41 = vadd.f32 %v3908_v1, %v3571_v2  ;;  %v4501_v33 = vpop.f32.mrb[27].mxu1 }
 0xdc7   :  { %v3575_v36 = vmul.f32 0.2, %v3572_v41 }
 0xdc9   :  { %v3576_v4 = vmax.f32 %v3572_v41, %v3575_v36 }
 0xdcb   :  { %4511 = vmatmul.mubr.msk.f32.vlgmr.msra.gmra.mrb[32].mxu0 %vm2668_vm4, %v3576_v4 }
 0xe9e   :  { %v3657_v21 = vpop.f32.mrb[32].mxu0 }
 0xe9f   :  { %v3658_v45 = vadd.f32 %v3910_v59, %v3657_v21  ;;  %v4512_v37 = vpop.f32.mrb[33].mxu0 }
 0xea1   :  { %v3661_v54 = vmul.f32 0.2, %v3658_v45 }
 0xea3   :  { %v3662_v60 = vmax.f32 %v3658_v45, %v3661_v54 }
 0xea5   :  { %4522 = vmatmul.mubr.msk.f32.vlgmr.msra.gmra.mrb[28].mxu1 %vm2668_vm4, %v3662_v60 }
 0xf78   :  { %v3743_v10 = vpop.f32.mrb[28].mxu1 }
 0xf79   :  { %v3744_v47 = vadd.f32 %v3912_v62, %v3743_v10  ;;  %v4523_v35 = vpop.f32.mrb[29].mxu1 }
 0xf7b   :  { %v3747_v25 = vmax.f32 %v3744_v47, 0.0 }
 0xf7d   :  { %3753 = vrot.lane.b32.xlu1 %v3747_v25, %s4903_s5 }
 0xfef   :  { %v3754_v9 = vpop.permute.xlu1 %3753 }
 0xff0   :  { %v3759_v32 = vsel %vm3758_vm12, %v3757_v5, %v3754_v9 }
 0xff1   :  { %v3761_v50 = vsel %vm3760_vm13, %v3759_v32, 0.0 }
 0xff2   :  { %3762 = vst [vmem:[%s7213_s8] sm:$0xf] %v3761_v50 }

</bundles_post_ra>
